<compile_context>
chip_gen: v7x
topology: tpu7x:2x2x1
jax: 0.10.0
libtpu: 0.0.40
codegen_flags: <defaults>
</compile_context>

<pallas_src>
import jax
import jax.numpy as jnp
from jax.experimental import pallas as pl
from jax.experimental.pallas import tpu as pltpu


KH = KW = 11                  # conv2 kernel / stride (non-overlapping patches)
C_IN = 4
C1 = 13                       # conv1 out channels
K2 = C1 * KH * KW             # 1573  (conv2 im2col K)
K2P = C1 * 128                # 1664  (padded, lane/sublane aligned)
N2 = 3072                     # conv2 out channels == conv3 K
N3 = 1000                     # conv3 out channels
N3P = 1024                    # padded conv3 N (lane aligned)


def pick_tn2():
    """Generation-dependent conv2 output-channel tile (must divide N2)."""
    try:
        kind = jax.devices()[0].device_kind.lower()
    except Exception:
        kind = ""
    if "v7" in kind or "7x" in kind:
        return 1536           # nj=2: fewer grid steps on the ~5us v7x roofline
    return 768                # nj=4: ~8 MB double-buffered weights (v5e/v6e)


# ----------------------------------------------------------------------------
# Fused Pallas kernel:
#   grid = (j,)   j = conv2 output-channel tile == conv3 reduction (K) tile
#   o_ref is the VMEM-resident accumulator (output block index is constant
#   across j, so the tile is flushed to HBM only once, after the last j).
# ----------------------------------------------------------------------------
def _fused_conv23_kernel(a_ref, w2_ref, b2_ref, w3_ref, b3_ref, o_ref):
    j = pl.program_id(0)

    @pl.when(j == 0)
    def _init():
        o_ref[...] = jnp.zeros_like(o_ref)

    # conv2 tile:  (M, K2P) bf16 @ (K2P, tn2) bf16 -> f32, + bias, tanh
    z2 = jnp.dot(a_ref[...], w2_ref[0], preferred_element_type=jnp.float32)
    y2 = jnp.tanh(z2 + b2_ref[...])                       # (M, tn2) f32

    # conv3 partial accumulation directly into the output tile:
    # (M, tn2) @ (tn2, N3P) -> (M, N3P) f32
    # NOTE: correct only because out_specs' block index is constant across j.
    o_ref[...] += jnp.dot(y2.astype(w3_ref.dtype), w3_ref[...],
                          preferred_element_type=jnp.float32)

    @pl.when(j == pl.num_programs(0) - 1)
    def _finalize():
        # fused conv3 epilogue: bias + tanh (pad columns stay tanh(0)=0)
        o_ref[...] = jnp.tanh(o_ref[...] + b3_ref[...])


def fused_conv2_conv3(patches_bf16, w2b, b2v, w3m, b3v):
    """conv2(+bias,tanh) -> conv3(+bias,tanh), returns (M, N3P) f32.

    patches_bf16 : (M, K2P)        bf16 im2col matrix for conv2
    w2b          : (nj, K2P, tn2)  bf16 pre-blocked conv2 weights (contiguous)
    b2v          : (1, N2)         f32
    w3m          : (N2, N3P)       bf16
    b3v          : (1, N3P)        f32
    """
    M, k2p = patches_bf16.shape
    nj, k2p2, tn2 = w2b.shape
    assert k2p2 == k2p == K2P
    assert nj * tn2 == N2 and tn2 % 128 == 0
    assert w3m.shape == (N2, N3P) and b2v.shape == (1, N2) and b3v.shape == (1, N3P)

    return pl.pallas_call(
        _fused_conv23_kernel,
        out_shape=jax.ShapeDtypeStruct((M, N3P), jnp.float32),
        grid_spec=pltpu.PrefetchScalarGridSpec(
            num_scalar_prefetch=0,
            grid=(nj,),
            in_specs=[
                # A (patches): resident across the whole grid
                pl.BlockSpec((M, k2p), lambda j: (0, 0)),
                # W2 tile: one contiguous pre-blocked slab per step
                pl.BlockSpec((1, k2p, tn2), lambda j: (j, 0, 0)),
                # conv2 bias tile
                pl.BlockSpec((1, tn2), lambda j: (0, j)),
                # W3 tile: contiguous row-block over conv3's K
                pl.BlockSpec((tn2, N3P), lambda j: (j, 0)),
                # conv3 bias (resident)
                pl.BlockSpec((1, N3P), lambda j: (0, 0)),
            ],
            # constant block index across j => VMEM-resident accumulator
            out_specs=pl.BlockSpec((M, N3P), lambda j: (0, 0)),
        ),
        compiler_params=pltpu.CompilerParams(
            dimension_semantics=("arbitrary",),
            vmem_limit_bytes=32 * 1024 * 1024,
        ),
    )(patches_bf16, w2b, b2v, w3m, b3v)


# ----------------------------------------------------------------------------
# One-time weight packing (matmul-ready layout, bf16, padded, pre-blocked)
# ----------------------------------------------------------------------------
def pack_params(params, tn2):
    w1, b1, w2, b2, w3, b3 = params
    assert N2 % tn2 == 0
    nj = N2 // tn2
    # conv1 stays f32 / plain JAX
    w1m = w1.reshape(C1, C_IN).T.astype(jnp.float32)                 # (4, 13)
    b1v = b1.astype(jnp.float32)                                     # (13,)
    # conv2: (3072,13,11,11) -> (K2, N2) -> pad K -> pre-block into
    # (nj, K2P, tn2) bf16 so every grid step reads one contiguous slab.
    w2m = jnp.transpose(w2.reshape(N2, K2), (1, 0))
    w2m = jnp.pad(w2m, ((0, K2P - K2), (0, 0)))                      # (K2P, N2)
    w2b = jnp.transpose(w2m.reshape(K2P, nj, tn2), (1, 0, 2)).astype(jnp.bfloat16)
    b2v = b2.reshape(1, N2).astype(jnp.float32)
    # conv3: (1000,3072,1,1) -> (3072, 1000) -> pad N -> bf16
    w3m = jnp.transpose(w3.reshape(N3, N2), (1, 0))
    w3m = jnp.pad(w3m, ((0, 0), (0, N3P - N3))).astype(jnp.bfloat16)  # (N2, N3P)
    b3v = jnp.pad(b3, (0, N3P - N3)).reshape(1, N3P).astype(jnp.float32)
    return w1m, b1v, w2b, b2v, w3m, b3v


# ----------------------------------------------------------------------------
# Model forward (glue in plain JAX under jit, heavy matmuls in Pallas)
# ----------------------------------------------------------------------------
def model_forward(x_nchw, packed):
    w1m, b1v, w2b, b2v, w3m, b3v = packed
    n, c, h, w = x_nchw.shape
    assert n == 1 and c == C_IN, "module is used with batch-1 NCHW input"
    ho = (h - KH) // KH + 1
    wo = (w - KW) // KW + 1
    m = ho * wo

    # conv1 (1x1) + tanh: tiny, plain JAX
    x_hwc = jnp.transpose(x_nchw[0], (1, 2, 0))                      # (H, W, 4)
    y1 = jnp.tanh(jnp.matmul(x_hwc, w1m, precision="highest") + b1v)  # (H, W, 13)

    # im2col for non-overlapping 11x11/stride-11 conv: pure reshape/transpose,
    # patch features flattened (c, kh, kw) to match the PyTorch weight layout.
    y1c = y1[: ho * KH, : wo * KW, :]
    patches = (y1c.reshape(ho, KH, wo, KW, C1)
                   .transpose(0, 2, 4, 1, 3)
                   .reshape(m, K2))
    patches = jnp.pad(patches, ((0, 0), (0, K2P - K2))).astype(jnp.bfloat16)

    # fused conv2 + conv3 (bias + tanh epilogue inside the kernel)
    y3 = fused_conv2_conv3(patches, w2b, b2v, w3m, b3v)[:, :N3]      # (M, 1000)

    # back to NCHW: (1, 1000, Ho, Wo)
    return y3.reshape(ho, wo, N3).transpose(2, 0, 1)[None]


def reference_forward(x_nchw, params):
    """Pure-JAX f32 reference of the original module semantics."""
    w1, b1, w2, b2, w3, b3 = params
    _, _, h, w = x_nchw.shape
    ho = (h - KH) // KH + 1
    wo = (w - KW) // KW + 1
    x_hwc = jnp.transpose(x_nchw[0], (1, 2, 0))
    y1 = jnp.tanh(jnp.matmul(x_hwc.reshape(h * w, C_IN), w1.reshape(C1, C_IN).T,
                             precision="highest") + b1).reshape(h, w, C1)
    y1c = y1[: ho * KH, : wo * KW, :]
    patches = (y1c.reshape(ho, KH, wo, KW, C1).transpose(0, 2, 4, 1, 3)
                   .reshape(ho * wo, K2))
    y2 = jnp.tanh(jnp.matmul(patches, w2.reshape(N2, K2).T, precision="highest") + b2)
    y3 = jnp.tanh(jnp.matmul(y2, w3.reshape(N3, N2).T, precision="highest") + b3)
    return y3.reshape(ho, wo, N3).transpose(2, 0, 1)[None]


def init_params(key):
    k1, k2, k3, k4, k5, k6 = jax.random.split(key, 6)
    # PyTorch layout (out_ch, in_ch, kh, kw); ~1/sqrt(fan_in) scale
    w1 = jax.random.normal(k1, (C1, C_IN, 1, 1), jnp.float32) * (1.0 / 2.0)
    b1 = jax.random.normal(k2, (C1,), jnp.float32) * 0.1
    w2 = jax.random.normal(k3, (N2, C1, KH, KW), jnp.float32) * (1.0 / 39.7)
    b2 = jax.random.normal(k4, (N2,), jnp.float32) * 0.1
    w3 = jax.random.normal(k5, (N3, N2, 1, 1), jnp.float32) * (1.0 / 55.4)
    b3 = jax.random.normal(k6, (N3,), jnp.float32) * 0.1
    return (w1, b1, w2, b2, w3, b3)


if __name__ == "__main__":
    key = jax.random.PRNGKey(0)
    kx, kp = jax.random.split(key)

    # small spatial size consistent with the module (kernel 11 / stride 11)
    x = jax.random.normal(kx, (1, 4, 33, 33), jnp.float32)   # -> (1, 1000, 3, 3)
    params = init_params(kp)
    tn2 = pick_tn2()
    packed = pack_params(params, tn2)                        # one-time packing

    fwd = jax.jit(model_forward)
    out = jax.block_until_ready(fwd(x, packed))
    assert out.shape == (1, 1000, 3, 3), out.shape

    ref = jax.block_until_ready(reference_forward(x, params))
    err = float(jnp.max(jnp.abs(out - ref)))
    # Tolerance accounts for deliberate bf16 weight/activation streaming
    # (measured error is typically ~5e-3 vs the f32 "highest" reference).
    assert err < 3e-2, f"max abs error {err}"

    print("KERNEL_OK")
</pallas_src>

<mosaic_0001>
module attributes {stable_mosaic.version = 11 : i64} {
  func.func @_fused_conv23_kernel(%arg0: i32, %arg1: memref<9x1664xbf16, #tpu.memory_space<vmem>>, %arg2: memref<1x1664x768xbf16, #tpu.memory_space<vmem>>, %arg3: memref<1x768xf32, #tpu.memory_space<vmem>>, %arg4: memref<768x1024xbf16, #tpu.memory_space<vmem>>, %arg5: memref<1x1024xf32, #tpu.memory_space<vmem>>, %arg6: memref<9x1024xf32, #tpu.memory_space<vmem>>) attributes {dimension_semantics = [#tpu.dimension_semantics<arbitrary>], iteration_bounds = array<i64: 4>, scalar_prefetch = 0 : i64, scratch_operands = 0 : i64, tpu.core_type = #tpu.core_type<tc>, window_params = [{pipeline_mode = #tpu.pipeline_mode<synchronous>, transform_indices = @transform_0, window_bounds = array<i64: 9, 1664>}, {transform_indices = @transform_1, window_bounds = array<i64: 1, 1664, 768>}, {transform_indices = @transform_2, window_bounds = array<i64: 1, 768>}, {transform_indices = @transform_3, window_bounds = array<i64: 768, 1024>}, {pipeline_mode = #tpu.pipeline_mode<synchronous>, transform_indices = @transform_4, window_bounds = array<i64: 1, 1024>}, {pipeline_mode = #tpu.pipeline_mode<synchronous>, transform_indices = @transform_5, window_bounds = array<i64: 9, 1024>}]} {
    %c0_i32 = arith.constant 0 : i32
    %0 = arith.cmpi eq, %arg0, %c0_i32 : i32
    %1 = arith.extui %0 : i1 to i32
    %c0_i32_0 = arith.constant 0 : i32
    %2 = arith.cmpi ne, %1, %c0_i32_0 : i32
    scf.if %2 {
      %cst_15 = arith.constant 0.000000e+00 : f32
      %20 = vector.broadcast %cst_15 : f32 to vector<9x1024xf32>
      %c0_16 = arith.constant 0 : index
      %c0_17 = arith.constant 0 : index
      %21 = vector.load %arg6[%c0_16, %c0_17] : memref<9x1024xf32, #tpu.memory_space<vmem>>, vector<9x1024xf32>
      tpu.vector_store %arg6[%c0_16, %c0_17], %20 {strides = array<i32>} : memref<9x1024xf32, #tpu.memory_space<vmem>>, vector<9x1024xf32>,
    } else {
    }
    %c0 = arith.constant 0 : index
    %c0_1 = arith.constant 0 : index
    %3 = vector.load %arg1[%c0, %c0_1] : memref<9x1664xbf16, #tpu.memory_space<vmem>>, vector<9x1664xbf16>
    %c0_2 = arith.constant 0 : index
    %c0_3 = arith.constant 0 : index
    %c0_4 = arith.constant 0 : index
    %4 = vector.load %arg2[%c0_2, %c0_3, %c0_4] : memref<1x1664x768xbf16, #tpu.memory_space<vmem>>, vector<1x1664x768xbf16>
    %5 = vector.shape_cast %4 : vector<1x1664x768xbf16> to vector<1664x768xbf16>
    %cst = arith.constant dense<0.000000e+00> : vector<9x768xf32>
    %6 = tpu.matmul %3, %5, %cst {dimension_numbers = #tpu.dot_dimension_numbers<[1], [0], [0], [1], [0, 0, 1, 1], [], []>} : vector<9x1664xbf16>, vector<1664x768xbf16>, vector<9x768xf32> -> vector<9x768xf32>
    %c0_5 = arith.constant 0 : index
    %c0_6 = arith.constant 0 : index
    %7 = vector.load %arg3[%c0_5, %c0_6] : memref<1x768xf32, #tpu.memory_space<vmem>>, vector<1x768xf32>
    %8 = vector.broadcast %7 : vector<1x768xf32> to vector<9x768xf32>
    %9 = arith.addf %6, %8 : vector<9x768xf32>
    %10 = math.tanh %9 : vector<9x768xf32>
    %c0_7 = arith.constant 0 : index
    %c0_8 = arith.constant 0 : index
    %11 = vector.load %arg6[%c0_7, %c0_8] : memref<9x1024xf32, #tpu.memory_space<vmem>>, vector<9x1024xf32>
    %12 = arith.truncf %10 : vector<9x768xf32> to vector<9x768xbf16>
    %c0_9 = arith.constant 0 : index
    %c0_10 = arith.constant 0 : index
    %13 = vector.load %arg4[%c0_9, %c0_10] : memref<768x1024xbf16, #tpu.memory_space<vmem>>, vector<768x1024xbf16>
    %cst_11 = arith.constant dense<0.000000e+00> : vector<9x1024xf32>
    %14 = tpu.matmul %12, %13, %cst_11 {dimension_numbers = #tpu.dot_dimension_numbers<[1], [0], [0], [1], [0, 0, 1, 1], [], []>} : vector<9x768xbf16>, vector<768x1024xbf16>, vector<9x1024xf32> -> vector<9x1024xf32>
    %15 = arith.addf %11, %14 : vector<9x1024xf32>
    %c0_12 = arith.constant 0 : index
    %c0_13 = arith.constant 0 : index
    %16 = vector.load %arg6[%c0_12, %c0_13] : memref<9x1024xf32, #tpu.memory_space<vmem>>, vector<9x1024xf32>
    tpu.vector_store %arg6[%c0_12, %c0_13], %15 {strides = array<i32>} : memref<9x1024xf32, #tpu.memory_space<vmem>>, vector<9x1024xf32>,
    %c3_i32 = arith.constant 3 : i32
    %17 = arith.cmpi eq, %arg0, %c3_i32 : i32
    %18 = arith.extui %17 : i1 to i32
    %c0_i32_14 = arith.constant 0 : i32
    %19 = arith.cmpi ne, %18, %c0_i32_14 : i32
    scf.if %19 {
      %c0_15 = arith.constant 0 : index
      %c0_16 = arith.constant 0 : index
      %20 = vector.load %arg6[%c0_15, %c0_16] : memref<9x1024xf32, #tpu.memory_space<vmem>>, vector<9x1024xf32>
      %c0_17 = arith.constant 0 : index
      %c0_18 = arith.constant 0 : index
      %21 = vector.load %arg5[%c0_17, %c0_18] : memref<1x1024xf32, #tpu.memory_space<vmem>>, vector<1x1024xf32>
      %22 = vector.broadcast %21 : vector<1x1024xf32> to vector<9x1024xf32>
      %23 = arith.addf %20, %22 : vector<9x1024xf32>
      %24 = math.tanh %23 : vector<9x1024xf32>
      %c0_19 = arith.constant 0 : index
      %c0_20 = arith.constant 0 : index
      %25 = vector.load %arg6[%c0_19, %c0_20] : memref<9x1024xf32, #tpu.memory_space<vmem>>, vector<9x1024xf32>
      tpu.vector_store %arg6[%c0_19, %c0_20], %24 {strides = array<i32>} : memref<9x1024xf32, #tpu.memory_space<vmem>>, vector<9x1024xf32>,
    } else {
    }
    return
  }
  func.func @transform_0(%arg0: i32) -> (i32, i32) {
    %c0_i32 = arith.constant 0 : i32
    %c0_i32_0 = arith.constant 0 : i32
    %c0_i32_1 = arith.constant 0 : i32
    return %c0_i32, %c0_i32_0 : i32, i32
  }
  func.func @transform_1(%arg0: i32) -> (i32, i32, i32) {
    %c0_i32 = arith.constant 0 : i32
    %c0_i32_0 = arith.constant 0 : i32
    %c0_i32_1 = arith.constant 0 : i32
    return %arg0, %c0_i32, %c0_i32_0 : i32, i32, i32
  }
  func.func @transform_2(%arg0: i32) -> (i32, i32) {
    %c0_i32 = arith.constant 0 : i32
    %c0_i32_0 = arith.constant 0 : i32
    return %c0_i32, %arg0 : i32, i32
  }
  func.func @transform_3(%arg0: i32) -> (i32, i32) {
    %c0_i32 = arith.constant 0 : i32
    %c0_i32_0 = arith.constant 0 : i32
    return %arg0, %c0_i32 : i32, i32
  }
  func.func @transform_4(%arg0: i32) -> (i32, i32) {
    %c0_i32 = arith.constant 0 : i32
    %c0_i32_0 = arith.constant 0 : i32
    %c0_i32_1 = arith.constant 0 : i32
    return %c0_i32, %c0_i32_0 : i32, i32
  }
  func.func @transform_5(%arg0: i32) -> (i32, i32) {
    %c0_i32 = arith.constant 0 : i32
    %c0_i32_0 = arith.constant 0 : i32
    %c0_i32_1 = arith.constant 0 : i32
    return %c0_i32, %c0_i32_0 : i32, i32
  }
}

</mosaic_0001>

<bundles_post_ra>
// kernel: model_forward.1
= control target key start
LH: loop header
LB: loop body
LE: loop exit
PB: predicated region body
PF: predicated region fallthrough
CT: control target
= control target key end

     0   :  { %s12296_s0 = inlined_call_operand.vmem [shape: bf16[9,1664], index: 0, kind: input, shape index: {}]   ;;  %s12297_s1 = inlined_call_operand.hbm [shape: bf16[4,1664,768], index: 1, kind: input, shape index: {}]   ;;  %s12298_s2 = inlined_call_operand.hbm [shape: f32[1,3072], index: 2, kind: input, shape index: {}]   ;;  %s12299_s3 = inlined_call_operand.hbm [shape: bf16[3072,1024], index: 3, kind: input, shape index: {}]   ;;  %s12300_s4 = inlined_call_operand.hbm [shape: f32[1,1024], index: 4, kind: input, shape index: {}]   ;;  %s12301_s5 = inlined_call_operand.vmem [shape: f32[9,1024], index: 5, kind: output, shape index: {}]  }
   0x1   :  { %12309 = sst [smem:[#allocation12_spill]] %s12298_s2 }
   0x2   :  { %10 = vsyncpa [#allocation3], 0 }
   0x3   :  { %12 = vsyncpa [#allocation3 + $0x1], 0 }
   0x4   :  { %13 = vsyncpa [#allocation5], 0 }
   0x5   :  { %15 = vsyncpa [#allocation5 + $0x1], 0 }
   0x6   :  { %16 = vsyncpa [#allocation8], 0  ;;  %s10644_s18 = smov 0   ;;  %s10646_s19 = smov 0  }
   0x7   :  { %s10648_s20 = smov 0   ;;  %s10650_s21 = smov 0  }
   0x8 LB: > { %s10665_s22 = sadd.s32 1, %s10602_s21   ;;  %s50_s23 = sadd.s32 1, %s10598_s20  ;;  %s10602_s21 = sphi %s10650_s21, %s12327_s21   ;;  %s10598_s20 = sphi %s10648_s20, %s12326_s20   ;;  %s10594_s19 = sphi %s10646_s19, %s12325_s19   ;;  %s10590_s18 = sphi %s10644_s18, %s12324_s18  }
   0x9   : > { %s47_s24 = ssub.s32 %s10602_s21, %s10665_s22  ;;  %p57_p0 = scmp.ne.s32.totalorder %s10598_s20, %s10594_s19 }
   0xa   : > { %p48_p1 = scmp.eq.s32.totalorder %s47_s24, 0  ;;  %p58_p2 = scmp.eq.s32.totalorder %s10602_s21, 0 }
   0xb   : > { %p9376_p3 = scmp.lt.s32.totalorder %s10602_s21, 4  ;;  %s10678_s26 = sand.u32 1, %s10598_s20  }
   0xc   : > { %s10675_s25 = scalar_select %p48_p1, %s10598_s20, %s50_s23  }
   0xd   : > { %p59_p4 = por %p58_p2, %p57_p0  ;;  %s216_s27 = sand.u32 1, %s10602_s21  }
   0xe   : > { %s9346_s28 = smul.u32 6, %s10678_s26  ;;  %s12311_s2 = sld [smem:[#allocation12_spill]] }
   0xf   : > { %p10682_p5 = pnand %p9376_p3, %p59_p4  ;;  %s9224_s30 = smul.u32 96, %s10602_s21 }
  0x10   : > { %s220_s6 = scalar_lea.vmem [#allocation4], %s9346_s28  ;;  %s10694_s11 = scalar_lea.sflag [#allocation5], %s216_s27 }
  0x11   : > { %s12310_s29 = scalar_select %p10682_p5, 1, 0 }
  0x12   : > { %s228_s7 = sshll.u32 %s220_s6, 4  ;;  %p10700_p7 = pneg %p10682_p5  ;;  %s10692_s7 = int_to_ptr.vmem [resolvable:$true] %s228_s7 }
  0x14   : > { %s10690_s10 = scalar_lea.hbm %s12311_s2, %s9224_s30  ;;  %s10447_s16 = scalar_lea.hbm %s12311_s2, 384 }
  0x15   : > { %s10442_s12 = scalar_lea.hbm %s10690_s10, 96  ;;  %p10448_p10 = scmp.lt.u32.totalorder %s10690_s10, %s12311_s2 }
  0x16   : > { %p10443_p6 = scmp.ne.s32.totalorder %s10690_s10, %s10442_s12  ;;  %p10449_p11 = scmp.lt.u32.totalorder %s10447_s16, %s10442_s12 }
  0x17   : > { %s12312_s13 = scalar_select %p10700_p7, 1, 0 }
  0x18   : > { %p10445_p8 = pnand %p10700_p7, %p10443_p6  ;;  %p10450_p12 = por %p10449_p11, %p10448_p10 }
  0x19   : > { %p10451_p13 = scmp.lt.u32.totalorder %s10442_s12, %s10690_s10 }
  0x1a   : > { %p10446_p9 = pneg %p10445_p8 }
  0x1b   : > { %p10452_p0 = por %p10451_p13, %p10450_p12 }
  0x1d   : > { %p10453_p1 = pnand %p10452_p0, %p10446_p9 }
  0x1f   : > { %10456 = shalt.err (!%p10453_p1)
}
  0x20   : > { %s10457_s24 = scalar_lea.vmem %s10692_s7, 96  ;;  %s10604_s27 = smov [#allocation4]  }
  0x21   : > { %p10458_p2 = scmp.ne.s32.totalorder %s10692_s7, %s10457_s24  ;;  %s10462_s28 = sshll.u32 %s10604_s27, 4  ;;  %s10463_s28 = int_to_ptr.vmem [resolvable:$false] %s10462_s28 }
  0x22   : > { %s10464_s30 = scalar_lea.vmem %s10463_s28, 192  ;;  %p10465_p6 = scmp.lt.s32.totalorder %s10692_s7, %s10463_s28 }
  0x23   : > { %p10460_p3 = pnand %p10458_p2, %p10700_p7  ;;  %p10466_p8 = scmp.lt.s32.totalorder %s10464_s30, %s10457_s24 }
  0x25   : > { %p10461_p4 = pneg %p10460_p3  ;;  %p10467_p10 = por %p10466_p8, %p10465_p6 }
  0x27   : > { %p10468_p11 = pnand %p10467_p10, %p10461_p4 }
  0x29   : > { %10471 = shalt.err (!%p10468_p11)
}
  0x2a   : > { %9371 = dma.hbm_to_vmem [thread:$0]  (!%p10682_p5), %s10690_s10, 96, %s10692_s7, %s10694_s11  }
  0x2b   : > { %s10726_s8 = sadd.s32 4294967295, %s10602_s21   ;;  %p63_p9 = scmp.ne.s32.totalorder %s10594_s19, %s10590_s18 }
  0x2c   : > { %p12302_p12 = scmp.eq.s32.totalorder %s10726_s8, 0  ;;  %p8190_p13 = scmp.ge.s32.totalorder %s10602_s21, 1 }
  0x2d   : > { %p168_p0 = scmp.lt.s32.totalorder %s10602_s21, 5  ;;  %s10605_s10 = smov [#allocation7]  }
  0x2e   : > { %p10735_p1 = por %p12302_p12, %p63_p9  ;;  %s184_s12 = sshll.u32 %s10605_s10, 4  ;;  %s185_s12 = int_to_ptr.vmem [resolvable:$true] %s184_s12 }
  0x2f   : > { %p10740_p3 = pnand %p8190_p13, %p168_p0  ;;  %s9344_s18 = smul.u32 4992, %s10678_s26 }
  0x30   : > { %s12313_s9 = scalar_select %p10735_p1, 1, 0 }
  0x31   : > { %s12314_s7 = scalar_select %p10740_p3, 1, 0 }
  0x32   : > { %p9361_p4 = pneg %p10740_p3  ;;  %s9345_s15 = smul.u32 79872, %s10602_s21 }
  0x33   : > { %s10472_s28 = scalar_lea.hbm %s12300_s4, 128 }
  0x34   : > { %p10749_p6 = pnand %p9361_p4, %p12302_p12  ;;  %s10757_s23 = scalar_lea.hbm %s12297_s1, %s9345_s15 }
  0x35   : > { %p10473_p8 = scmp.ne.s32.totalorder %s12300_s4, %s10472_s28  ;;  %p10479_p13 = scmp.lt.u32.totalorder %s10472_s28, %s12300_s4 }
  0x36   : > { %p10474_p10 = pneg %p10749_p6 }
  0x38   : > { %p10475_p11 = pnand %p10474_p10, %p10473_p8 }
  0x3a   : > { %p10476_p9 = pneg %p10475_p11 }
  0x3c   : > { %p10481_p0 = pnand %p10479_p13, %p10476_p9 }
  0x3e   : > { %10484 = shalt.err (!%p10481_p0)
}
  0x3f   : > { %s10485_s15 = scalar_lea.vmem %s185_s12, 128  ;;  %p10493_p1 = scmp.lt.s32.totalorder %s185_s12, %s185_s12 }
  0x40   : > { %p10486_p4 = scmp.ne.s32.totalorder %s185_s12, %s10485_s15  ;;  %p10494_p3 = scmp.lt.s32.totalorder %s10485_s15, %s10485_s15 }
  0x42   : > { %p10488_p2 = pnand %p10486_p4, %p10474_p10  ;;  %p10495_p5 = por %p10494_p3, %p10493_p1 }
  0x44   : > { %p10489_p12 = pneg %p10488_p2 }
  0x46   : > { %p10496_p7 = pnand %p10495_p5, %p10489_p12 }
  0x48   : > { %10499 = shalt.err (!%p10496_p7)
}
  0x49   : > { %9364 = dma.hbm_to_vmem [thread:$0]  (!%p10749_p6), %s12300_s4, 128, %s185_s12, [#allocation8]  }
  0x4a   : > { %s199_s2 = scalar_lea.vmem [#allocation2], %s9344_s18  ;;  %s9227_s24 = smul.u32 49152, %s10602_s21 }
  0x4b   : > { %s206_s6 = sshll.u32 %s199_s2, 4  ;;  %s196_s27 = scalar_lea.sflag [#allocation3], %s10678_s26  ;;  %s10775_s6 = int_to_ptr.vmem [resolvable:$true] %s206_s6 }
  0x4c   : > { %s10500_s28 = scalar_lea.hbm %s10757_s23, 79872  ;;  %p12316_p7 = scmp.ne.s32.totalorder %s12312_s13, 0 }
  0x4d   : > { %p10501_p5 = scmp.ne.s32.totalorder %s10757_s23, %s10500_s28  ;;  %s10505_s10 = scalar_lea.hbm %s12297_s1, 319488 }
  0x4e   : > { %p10506_p2 = scmp.lt.u32.totalorder %s10757_s23, %s12297_s1  ;;  %p10507_p3 = scmp.lt.u32.totalorder %s10505_s10, %s10500_s28 }
  0x4f   : > { %p10503_p12 = pnand %p10501_p5, %p12316_p7  ;;  %p10509_p8 = scmp.lt.u32.totalorder %s10500_s28, %s10757_s23 }
  0x50   : > { %p10508_p6 = por %p10507_p3, %p10506_p2 }
  0x51   : > { %p10504_p1 = pneg %p10503_p12 }
  0x52   : > { %p10510_p10 = por %p10509_p8, %p10508_p6 }
  0x54   : > { %p10511_p11 = pnand %p10510_p10, %p10504_p1 }
  0x56   : > { %10514 = shalt.err (!%p10511_p11)
}
  0x57   : > { %s10515_s12 = scalar_lea.vmem %s10775_s6, 79872  ;;  %s10606_s18 = smov [#allocation2]  }
  0x58   : > { %p10516_p9 = scmp.ne.s32.totalorder %s10775_s6, %s10515_s12  ;;  %s10520_s17 = sshll.u32 %s10606_s18, 4  ;;  %s10521_s17 = int_to_ptr.vmem [resolvable:$false] %s10520_s17 }
  0x59   : > { %s10522_s2 = scalar_lea.vmem %s10521_s17, 159744  ;;  %p10523_p4 = scmp.lt.s32.totalorder %s10775_s6, %s10521_s17 }
  0x5a   : > { %p10518_p13 = pnand %p10516_p9, %p12316_p7  ;;  %p10524_p5 = scmp.lt.s32.totalorder %s10522_s2, %s10515_s12 }
  0x5c   : > { %p10519_p0 = pneg %p10518_p13  ;;  %p10525_p12 = por %p10524_p5, %p10523_p4 }
  0x5e   : > { %p10526_p2 = pnand %p10525_p12, %p10519_p0 }
  0x60   : > { %10529 = shalt.err (!%p10526_p2)
}
  0x61   : > { %s10607_s28 = smov 384   ;;  %s10608_s14 = smov 24  }
  0x62   : > { %p12317_p1 = scmp.ne.s32.totalorder %s12310_s29, 0  ;;  %s10807_s15 = scalar_lea.hbm %s12299_s3, %s9227_s24 }
  0x63   : > { %s12318_s16 = smul.u32 3072, %s10678_s26  ;;  %s10530_s17 = scalar_lea.hbm %s10807_s15, 49152 }
  0x64   : > { %9368 = dma.hbm_to_vmem [thread:$0]  (!%p12317_p1), %s10757_s23, 79872, %s10775_s6, %s196_s27, %s10607_s28, %s10607_s28, %s10608_s14  }
  0x65   : > { %s239_s12 = scalar_lea.vmem [#allocation6], %s12318_s16  ;;  %p10531_p3 = scmp.ne.s32.totalorder %s10807_s15, %s10530_s17 }
  0x66   : > { %s247_s18 = sshll.u32 %s239_s12, 4  ;;  %s10535_s6 = scalar_lea.hbm %s12299_s3, 196608  ;;  %s10811_s18 = int_to_ptr.vmem [resolvable:$true] %s247_s18 }
  0x67   : > { %p10533_p6 = pnand %p10531_p3, %p12316_p7  ;;  %p10536_p10 = scmp.lt.u32.totalorder %s10807_s15, %s12299_s3 }
  0x68   : > { %p10537_p11 = scmp.lt.u32.totalorder %s10535_s6, %s10530_s17  ;;  %p10539_p13 = scmp.lt.u32.totalorder %s10530_s17, %s10807_s15 }
  0x69   : > { %p10534_p8 = pneg %p10533_p6 }
  0x6a   : > { %p10538_p9 = por %p10537_p11, %p10536_p10 }
  0x6c   : > { %p10540_p0 = por %p10539_p13, %p10538_p9 }
  0x6e   : > { %p10541_p4 = pnand %p10540_p0, %p10534_p8 }
  0x70   : > { %10544 = shalt.err (!%p10541_p4)
}
  0x71   : > { %s10545_s26 = scalar_lea.vmem %s10811_s18, 49152  ;;  %s10609_s2 = smov [#allocation6]  }
  0x72   : > { %p10546_p5 = scmp.ne.s32.totalorder %s10811_s18, %s10545_s26  ;;  %s10550_s28 = sshll.u32 %s10609_s2, 4  ;;  %s10551_s28 = int_to_ptr.vmem [resolvable:$false] %s10550_s28 }
  0x73   : > { %s10552_s14 = scalar_lea.vmem %s10551_s28, 98304  ;;  %p10553_p3 = scmp.lt.s32.totalorder %s10811_s18, %s10551_s28 }
  0x74   : > { %p10548_p12 = pnand %p10546_p5, %p12316_p7  ;;  %p10554_p6 = scmp.lt.s32.totalorder %s10552_s14, %s10545_s26 }
  0x76   : > { %p10549_p2 = pneg %p10548_p12  ;;  %p10555_p10 = por %p10554_p6, %p10553_p3 }
  0x78   : > { %p10556_p11 = pnand %p10555_p10, %p10549_p2 }
  0x7a   : > { %10559 = shalt.err (!%p10556_p11)
}
  0x7b   : > { %s10610_s30 = smov 512   ;;  %s10611_s10 = smov 32  }
  0x7c   : > { %9374 = dma.hbm_to_vmem [thread:$0]  (!%p12317_p1), %s10807_s15, 49152, %s10811_s18, %s10694_s11, %s10610_s30, %s10610_s30, %s10611_s10  }
  0x7d   : > { %p12319_p7 = scmp.ne.s32.totalorder %s12314_s7, 0 }
  0x7e   : > { %s261_s13 = sand.u32 (!%p12319_p7), 1, %s10594_s19   ;;  %p12320_p8 = scmp.ne.s32.totalorder (!%p12319_p7), %s12313_s9, 0 }
  0x7f   : > { %259 = sbr.rel (%p12319_p7) target bundleno = 1848 (0x738), region = 40  ;;  %s262_s12 = scalar_lea.sflag (!%p12319_p7), [#allocation3], %s261_s13 }
  0x80   : > { %s9348_s16 = smul.u32 (!%p12319_p7), 4992, %s261_s13 }
  0x82   : > { %s10838_s17 = scalar_lea.vmem (!%p12319_p7), [#allocation2], %s9348_s16 }
  0x86   : > { %10577 = dma.done.wait (%p12320_p8), %s262_s12, 79872  }
  0x87   : > { %10579 = vsyncadd (%p12320_p8), %s262_s12, 4294887424  ;;  %s270_s21 = sand.u32 1, %s10726_s8   ;;  %s9349_s29 = smul.u32 6, %s261_s13 }
  0x88   : > { %s271_s11 = scalar_lea.sflag [#allocation5], %s270_s21 }
  0x89   : > { %s10845_s15 = scalar_lea.vmem [#allocation4], %s9349_s29 }
  0x8a   : > { %10581 = dma.done.wait (%p12320_p8), %s271_s11, 49248  }
  0x8b   : > { %10583 = vsyncadd (%p12320_p8), %s271_s11, 4294918048  ;;  %s9350_s7 = smul.u32 3072, %s261_s13  ;;  %p12321_p1 = scmp.eq.s32.totalorder %s10726_s8, 0 }
  0x8d   : > { %s10851_s18 = scalar_lea.vmem [#allocation6], %s9350_s7 }
  0x8e   : > { %10585 = dma.done.wait (%p12321_p1), [#allocation8], 128   ;;  %p12322_p9 = pmov %p12321_p1 }
  0x8f   : > { %p12323_p13 = scmp.ne.s32.totalorder %s10726_s8, 0 }
  0x90   : > { %10587 = vsyncadd (%p12322_p9), [#allocation8], 4294967168  ;;  %v10612_v0 = vmov (!%p12323_p13), 0.0  }
  0x91   : > { %325 = sbr.rel (%p12323_p13) target bundleno = 153 (0x99), region = 60  ;;  %326 = vst [vmem:[%s12301_s5] sm:$0xff] (!%p12323_p13), %v10612_v0  ;;  %327 = vst [vmem:[%s12301_s5 + $0x8] sm:$0xff] (!%p12323_p13), %v10612_v0 }
  0x92   : > { %328 = vst [vmem:[%s12301_s5 + $0x10] sm:$0xff] (!%p12323_p13), %v10612_v0  ;;  %329 = vst [vmem:[%s12301_s5 + $0x18] sm:$0xff] (!%p12323_p13), %v10612_v0 }
  0x93   : > { %330 = vst [vmem:[%s12301_s5 + $0x20] sm:$0xff] (!%p12323_p13), %v10612_v0  ;;  %331 = vst [vmem:[%s12301_s5 + $0x28] sm:$0xff] (!%p12323_p13), %v10612_v0 }
  0x94   : > { %332 = vst [vmem:[%s12301_s5 + $0x30] sm:$0xff] (!%p12323_p13), %v10612_v0  ;;  %333 = vst [vmem:[%s12301_s5 + $0x38] sm:$0xff] (!%p12323_p13), %v10612_v0 }
  0x95   : > { %334 = vst [vmem:[%s12301_s5 + $0x40] sm:$0x1] (!%p12323_p13), %v10612_v0  ;;  %335 = vst [vmem:[%s12301_s5 + $0x48] sm:$0x1] (!%p12323_p13), %v10612_v0 }
  0x96   : > { %336 = vst [vmem:[%s12301_s5 + $0x50] sm:$0x1] (!%p12323_p13), %v10612_v0  ;;  %337 = vst [vmem:[%s12301_s5 + $0x58] sm:$0x1] (!%p12323_p13), %v10612_v0 }
  0x97   : > { %338 = vst [vmem:[%s12301_s5 + $0x60] sm:$0x1] (!%p12323_p13), %v10612_v0  ;;  %339 = vst [vmem:[%s12301_s5 + $0x68] sm:$0x1] (!%p12323_p13), %v10612_v0 }
  0x98   : > { %340 = vst [vmem:[%s12301_s5 + $0x70] sm:$0x1] %v10612_v0  ;;  %341 = vst [vmem:[%s12301_s5 + $0x78] sm:$0x1] %v10612_v0 }
  0x99 PF: > { %v9417_v1 = vld [vmem:[%s10838_s17 + $0x4] ss:$24 sps:$4 sm:$0xff]   ;;  %v9421_v3 = vld [vmem:[%s10838_s17] ss:$24 sps:$4 sm:$0xff]   ;;  %v9423_v5 = vld [vmem:[%s10838_s17 + $0x34] ss:$24 sps:$4 sm:$0xff]  }
  0x9a   : > { %v9419_v2 = vld [vmem:[%s10838_s17 + $0xc] ss:$24 sps:$4 sm:$0xff]   ;;  %4198 = vmatprep.subr.bf16.mxu0 %v9417_v1  ;;  %v9422_v4 = vld [vmem:[%s10838_s17 + $0x8] ss:$24 sps:$4 sm:$0xff]   ;;  %v9425_v6 = vld [vmem:[%s10838_s17 + $0x3c] ss:$24 sps:$4 sm:$0xff]  }
  0x9b   : > { %4499 = vmatprep.subr.bf16.mxu1 %v9419_v2  ;;  %4199 = vmatpush1.bf16.msra.mxu0 %v9421_v3  ;;  %v9427_v7 = vld [vmem:[%s10838_s17 + $0x30] ss:$24 sps:$4 sm:$0xff]   ;;  %v9429_v9 = vld [vmem:[%s10838_s17 + $0x64] ss:$24 sps:$4 sm:$0xff]   ;;  %v9433_v11 = vld [vmem:[%s10838_s17 + $0x60] ss:$24 sps:$4 sm:$0xff]  }
  0x9c   : > { %4500 = vmatpush1.bf16.msra.mxu1 %v9422_v4  ;;  %4200 = vmatprep.subr.bf16.mxu0 %v9423_v5  ;;  %v9428_v8 = vld [vmem:[%s10838_s17 + $0x38] ss:$24 sps:$4 sm:$0xff]   ;;  %v9431_v10 = vld [vmem:[%s10838_s17 + $0x6c] ss:$24 sps:$4 sm:$0xff]   ;;  %v9434_v12 = vld [vmem:[%s10838_s17 + $0x68] ss:$24 sps:$4 sm:$0xff]  }
  0x9d   : > { %4501 = vmatprep.subr.bf16.mxu1 %v9425_v6  ;;  %v9435_v13 = vld [vmem:[%s10838_s17 + $0x94] ss:$24 sps:$4 sm:$0xff]   ;;  %v9439_v15 = vld [vmem:[%s10838_s17 + $0x90] ss:$24 sps:$4 sm:$0xff]   ;;  %v9441_v17 = vld [vmem:[%s10838_s17 + $0xc4] ss:$24 sps:$4 sm:$0xff]  }
  0x9e   : > { %v9437_v14 = vld [vmem:[%s10838_s17 + $0x9c] ss:$24 sps:$4 sm:$0xff]   ;;  %v9440_v16 = vld [vmem:[%s10838_s17 + $0x98] ss:$24 sps:$4 sm:$0xff]   ;;  %v9443_v18 = vld [vmem:[%s10838_s17 + $0xcc] ss:$24 sps:$4 sm:$0xff]  }
  0x9f   : > { %4201 = vmatpush1.bf16.msra.mxu0 %v9427_v7  ;;  %v9445_v19 = vld [vmem:[%s10838_s17 + $0xc0] ss:$24 sps:$4 sm:$0xff]   ;;  %v9447_v21 = vld [vmem:[%s10838_s17 + $0xf4] ss:$24 sps:$4 sm:$0xff]   ;;  %v9451_v23 = vld [vmem:[%s10838_s17 + $0xf0] ss:$24 sps:$4 sm:$0xff]  }
  0xa0   : > { %4502 = vmatpush1.bf16.msra.mxu1 %v9428_v8  ;;  %4202 = vmatprep.subr.bf16.mxu0 %v9429_v9  ;;  %v9446_v20 = vld [vmem:[%s10838_s17 + $0xc8] ss:$24 sps:$4 sm:$0xff]   ;;  %v9449_v22 = vld [vmem:[%s10838_s17 + $0xfc] ss:$24 sps:$4 sm:$0xff]   ;;  %v9452_v24 = vld [vmem:[%s10838_s17 + $0xf8] ss:$24 sps:$4 sm:$0xff]  }
  0xa1   : > { %4503 = vmatprep.subr.bf16.mxu1 %v9431_v10  ;;  %v9453_v25 = vld [vmem:[%s10838_s17 + $0x124] ss:$24 sps:$4 sm:$0xff]   ;;  %v9457_v27 = vld [vmem:[%s10838_s17 + $0x120] ss:$24 sps:$4 sm:$0xff]   ;;  %v9459_v29 = vld [vmem:[%s10838_s17 + $0x154] ss:$24 sps:$4 sm:$0xff]  }
  0xa2   : > { %v9455_v26 = vld [vmem:[%s10838_s17 + $0x12c] ss:$24 sps:$4 sm:$0xff]   ;;  %v9458_v28 = vld [vmem:[%s10838_s17 + $0x128] ss:$24 sps:$4 sm:$0xff]   ;;  %v9461_v30 = vld [vmem:[%s10838_s17 + $0x15c] ss:$24 sps:$4 sm:$0xff]  }
  0xa3   : > { %4203 = vmatpush1.bf16.msra.mxu0 %v9433_v11  ;;  %v9463_v31 = vld [vmem:[%s10838_s17 + $0x150] ss:$24 sps:$4 sm:$0xff]   ;;  %v9465_v33 = vld [vmem:[%s10838_s17 + $0x184] ss:$24 sps:$4 sm:$0xff]   ;;  %v9469_v35 = vld [vmem:[%s10838_s17 + $0x180] ss:$24 sps:$4 sm:$0xff]  }
  0xa4   : > { %4504 = vmatpush1.bf16.msra.mxu1 %v9434_v12  ;;  %4204 = vmatprep.subr.bf16.mxu0 %v9435_v13  ;;  %v9464_v32 = vld [vmem:[%s10838_s17 + $0x158] ss:$24 sps:$4 sm:$0xff]   ;;  %v9467_v34 = vld [vmem:[%s10838_s17 + $0x18c] ss:$24 sps:$4 sm:$0xff]   ;;  %v9470_v36 = vld [vmem:[%s10838_s17 + $0x188] ss:$24 sps:$4 sm:$0xff]  }
  0xa5   : > { %4505 = vmatprep.subr.bf16.mxu1 %v9437_v14  ;;  %v9471_v37 = vld [vmem:[%s10838_s17 + $0x1b4] ss:$24 sps:$4 sm:$0xff]   ;;  %v9475_v39 = vld [vmem:[%s10838_s17 + $0x1b0] ss:$24 sps:$4 sm:$0xff]   ;;  %v9477_v41 = vld [vmem:[%s10838_s17 + $0x1e4] ss:$24 sps:$4 sm:$0xff]  }
  0xa6   : > { %v9473_v38 = vld [vmem:[%s10838_s17 + $0x1bc] ss:$24 sps:$4 sm:$0xff]   ;;  %v9476_v40 = vld [vmem:[%s10838_s17 + $0x1b8] ss:$24 sps:$4 sm:$0xff]   ;;  %v9479_v42 = vld [vmem:[%s10838_s17 + $0x1ec] ss:$24 sps:$4 sm:$0xff]  }
  0xa7   : > { %4205 = vmatpush1.bf16.msra.mxu0 %v9439_v15  ;;  %v9481_v43 = vld [vmem:[%s10838_s17 + $0x1e0] ss:$24 sps:$4 sm:$0xff]   ;;  %v9483_v45 = vld [vmem:[%s10838_s17 + $0x214] ss:$24 sps:$4 sm:$0xff]   ;;  %v9487_v47 = vld [vmem:[%s10838_s17 + $0x210] ss:$24 sps:$4 sm:$0xff]  }
  0xa8   : > { %4506 = vmatpush1.bf16.msra.mxu1 %v9440_v16  ;;  %4206 = vmatprep.subr.bf16.mxu0 %v9441_v17  ;;  %v9482_v44 = vld [vmem:[%s10838_s17 + $0x1e8] ss:$24 sps:$4 sm:$0xff]   ;;  %v9485_v46 = vld [vmem:[%s10838_s17 + $0x21c] ss:$24 sps:$4 sm:$0xff]   ;;  %v9488_v49 = vld [vmem:[%s10838_s17 + $0x218] ss:$24 sps:$4 sm:$0xff]  }
  0xa9   : > { %4507 = vmatprep.subr.bf16.mxu1 %v9443_v18  ;;  %v9513_v48 = vld [vmem:[%s12296_s0 + $0x4] ss:$52 sps:$4 sm:$0x1f]   ;;  %v9494_v53 = vld [vmem:[%s10838_s17 + $0x248] ss:$24 sps:$4 sm:$0xff]   ;;  %p9221_p0 = scmp.ne.s32.totalorder %s10726_s8, 3 }
  0xaa   : > { %v9489_v50 = vld [vmem:[%s10838_s17 + $0x244] ss:$24 sps:$4 sm:$0xff]   ;;  %4230 = vmatprep.mubr.bf16.mxu0 %v9513_v48  ;;  %4531 = vmatprep.mubr.bf16.mxu1 %v9513_v48  ;;  %v9493_v52 = vld [vmem:[%s10838_s17 + $0x240] ss:$24 sps:$4 sm:$0xff]   ;;  %v9495_v54 = vld [vmem:[%s10838_s17 + $0x274] ss:$24 sps:$4 sm:$0xff]  }
  0xab   : > { %4207 = vmatpush1.bf16.msra.mxu0 %v9445_v19  ;;  %v9491_v51 = vld [vmem:[%s10838_s17 + $0x24c] ss:$24 sps:$4 sm:$0xff]   ;;  %v9497_v55 = vld [vmem:[%s10838_s17 + $0x27c] ss:$24 sps:$4 sm:$0xff]   ;;  %v9499_v56 = vld [vmem:[%s10838_s17 + $0x270] ss:$24 sps:$4 sm:$0xff]  }
  0xac   : > { %4508 = vmatpush1.bf16.msra.mxu1 %v9446_v20  ;;  %4208 = vmatprep.subr.bf16.mxu0 %v9447_v21  ;;  %v9500_v57 = vld [vmem:[%s10838_s17 + $0x278] ss:$24 sps:$4 sm:$0xff]   ;;  %v9501_v58 = vld [vmem:[%s10838_s17 + $0x2a4] ss:$24 sps:$4 sm:$0xff]   ;;  %v9506_v61 = vld [vmem:[%s10838_s17 + $0x2a8] ss:$24 sps:$4 sm:$0xff]  }
  0xad   : > { %4509 = vmatprep.subr.bf16.mxu1 %v9449_v22  ;;  %v9503_v59 = vld [vmem:[%s10838_s17 + $0x2ac] ss:$24 sps:$4 sm:$0xff]   ;;  %v9505_v60 = vld [vmem:[%s10838_s17 + $0x2a0] ss:$24 sps:$4 sm:$0xff]   ;;  %v9509_v63 = vld [vmem:[%s10838_s17 + $0x2dc] ss:$24 sps:$4 sm:$0xff]  }
  0xae   : > { %v9507_v62 = vld [vmem:[%s10838_s17 + $0x2d4] ss:$24 sps:$4 sm:$0xff]   ;;  %v9511_v0 = vld [vmem:[%s10838_s17 + $0x2d0] ss:$24 sps:$4 sm:$0xff]   ;;  %v9517_v2 = vld [vmem:[%s10838_s17 + $0x304] ss:$24 sps:$4 sm:$0xff]  }
  0xaf   : > { %4209 = vmatpush1.bf16.msra.mxu0 %v9451_v23  ;;  %v9512_v1 = vld [vmem:[%s10838_s17 + $0x2d8] ss:$24 sps:$4 sm:$0xff]   ;;  %v9520_v3 = vld [vmem:[%s10838_s17 + $0x30c] ss:$24 sps:$4 sm:$0xff]   ;;  %v9518_v5 = vld [vmem:[%s10838_s17 + $0x308] ss:$24 sps:$4 sm:$0xff]  }
  0xb0   : > { %4510 = vmatpush1.bf16.msra.mxu1 %v9452_v24  ;;  %4210 = vmatprep.subr.bf16.mxu0 %v9453_v25  ;;  %v9515_v4 = vld [vmem:[%s10838_s17 + $0x300] ss:$24 sps:$4 sm:$0xff]   ;;  %v9524_v7 = vld [vmem:[%s10838_s17 + $0x334] ss:$24 sps:$4 sm:$0xff]   ;;  %v9522_v9 = vld [vmem:[%s10838_s17 + $0x330] ss:$24 sps:$4 sm:$0xff]  }
  0xb1   : > { %4511 = vmatprep.subr.bf16.mxu1 %v9455_v26  ;;  %v9521_v6 = vld [vmem:[%s12296_s0] ss:$52 sps:$4 sm:$0x1f]   ;;  %v9525_v10 = vld [vmem:[%s10838_s17 + $0x338] ss:$24 sps:$4 sm:$0xff]  }
  0xb2   : > { %v9527_v8 = vld [vmem:[%s10838_s17 + $0x33c] ss:$24 sps:$4 sm:$0xff]   ;;  %v9533_v12 = vld [vmem:[%s10838_s17 + $0x36c] ss:$24 sps:$4 sm:$0xff]   ;;  %v9528_v13 = vld [vmem:[%s10838_s17 + $0x360] ss:$24 sps:$4 sm:$0xff]  }
  0xb3   : > { %4211 = vmatpush1.bf16.msra.mxu0 %v9457_v27  ;;  %v9530_v11 = vld [vmem:[%s10838_s17 + $0x364] ss:$24 sps:$4 sm:$0xff]   ;;  %v9531_v14 = vld [vmem:[%s10838_s17 + $0x368] ss:$24 sps:$4 sm:$0xff]   ;;  %v9536_v15 = vld [vmem:[%s10838_s17 + $0x394] ss:$24 sps:$4 sm:$0xff]  }
  0xb4   : > { %4512 = vmatpush1.bf16.msra.mxu1 %v9458_v28  ;;  %4212 = vmatprep.subr.bf16.mxu0 %v9459_v29  ;;  %v9539_v16 = vld [vmem:[%s10838_s17 + $0x39c] ss:$24 sps:$4 sm:$0xff]   ;;  %v9534_v17 = vld [vmem:[%s10838_s17 + $0x390] ss:$24 sps:$4 sm:$0xff]   ;;  %v9545_v20 = vld [vmem:[%s10838_s17 + $0x3cc] ss:$24 sps:$4 sm:$0xff]  }
  0xb5   : > { %4513 = vmatprep.subr.bf16.mxu1 %v9461_v30  ;;  %v9537_v18 = vld [vmem:[%s10838_s17 + $0x398] ss:$24 sps:$4 sm:$0xff]   ;;  %v9542_v19 = vld [vmem:[%s10838_s17 + $0x3c4] ss:$24 sps:$4 sm:$0xff]   ;;  %v9543_v22 = vld [vmem:[%s10838_s17 + $0x3c8] ss:$24 sps:$4 sm:$0xff]  }
  0xb6   : > { %v9540_v21 = vld [vmem:[%s10838_s17 + $0x3c0] ss:$24 sps:$4 sm:$0xff]   ;;  %v9548_v23 = vld [vmem:[%s10838_s17 + $0x3f4] ss:$24 sps:$4 sm:$0xff]   ;;  %v9546_v25 = vld [vmem:[%s10838_s17 + $0x3f0] ss:$24 sps:$4 sm:$0xff]  }
  0xb7   : > { %4213 = vmatpush1.bf16.msra.mxu0 %v9463_v31  ;;  %v9551_v24 = vld [vmem:[%s10838_s17 + $0x3fc] ss:$24 sps:$4 sm:$0xff]   ;;  %v9549_v26 = vld [vmem:[%s10838_s17 + $0x3f8] ss:$24 sps:$4 sm:$0xff]   ;;  %v9557_v28 = vld [vmem:[%s10838_s17 + $0x42c] ss:$24 sps:$4 sm:$0xff]  }
  0xb8   : > { %4514 = vmatpush1.bf16.msra.mxu1 %v9464_v32  ;;  %4214 = vmatprep.subr.bf16.mxu0 %v9465_v33  ;;  %v9554_v27 = vld [vmem:[%s10838_s17 + $0x424] ss:$24 sps:$4 sm:$0xff]   ;;  %v9552_v29 = vld [vmem:[%s10838_s17 + $0x420] ss:$24 sps:$4 sm:$0xff]   ;;  %v9560_v31 = vld [vmem:[%s10838_s17 + $0x454] ss:$24 sps:$4 sm:$0xff]  }
  0xb9   : > { %4515 = vmatprep.subr.bf16.mxu1 %v9467_v34  ;;  %v9555_v30 = vld [vmem:[%s10838_s17 + $0x428] ss:$24 sps:$4 sm:$0xff]   ;;  %v9563_v33 = vld [vmem:[%s10838_s17 + $0x45c] ss:$24 sps:$4 sm:$0xff]  }
  0xba   : > { %v9614_v32 = vld [vmem:[%s12296_s0 + $0xc] ss:$52 sps:$4 sm:$0x1f]   ;;  %v9558_v34 = vld [vmem:[%s10838_s17 + $0x450] ss:$24 sps:$4 sm:$0xff]  }
  0xbb   : > { %4215 = vmatpush1.bf16.msra.mxu0 %v9469_v35  ;;  %v9561_v35 = vld [vmem:[%s10838_s17 + $0x458] ss:$24 sps:$4 sm:$0xff]   ;;  %v9584_v48 = vld [vmem:[%s10838_s17 + $0x514] ss:$24 sps:$4 sm:$0xff]  }
  0xbc   : > { %4516 = vmatpush1.bf16.msra.mxu1 %v9470_v36  ;;  %4216 = vmatprep.subr.bf16.mxu0 %v9471_v37  ;;  %v9566_v36 = vld [vmem:[%s10838_s17 + $0x484] ss:$24 sps:$4 sm:$0xff]  }
  0xbd   : > { %4517 = vmatprep.subr.bf16.mxu1 %v9473_v38  ;;  %v9569_v37 = vld [vmem:[%s10838_s17 + $0x48c] ss:$24 sps:$4 sm:$0xff]   ;;  %v9564_v38 = vld [vmem:[%s10838_s17 + $0x480] ss:$24 sps:$4 sm:$0xff]  }
  0xbf   : > { %4217 = vmatpush1.bf16.msra.mxu0 %v9475_v39  ;;  %v9567_v39 = vld [vmem:[%s10838_s17 + $0x488] ss:$24 sps:$4 sm:$0xff]  }
  0xc0   : > { %4518 = vmatpush1.bf16.msra.mxu1 %v9476_v40  ;;  %4218 = vmatprep.subr.bf16.mxu0 %v9477_v41  ;;  %v9572_v40 = vld [vmem:[%s10838_s17 + $0x4b4] ss:$24 sps:$4 sm:$0xff]  }
  0xc1   : > { %4519 = vmatprep.subr.bf16.mxu1 %v9479_v42  ;;  %v9575_v41 = vld [vmem:[%s10838_s17 + $0x4bc] ss:$24 sps:$4 sm:$0xff]   ;;  %v9570_v42 = vld [vmem:[%s10838_s17 + $0x4b0] ss:$24 sps:$4 sm:$0xff]  }
  0xc3   : > { %4219 = vmatpush1.bf16.msra.mxu0 %v9481_v43  ;;  %v9573_v43 = vld [vmem:[%s10838_s17 + $0x4b8] ss:$24 sps:$4 sm:$0xff]  }
  0xc4   : > { %4520 = vmatpush1.bf16.msra.mxu1 %v9482_v44  ;;  %4220 = vmatprep.subr.bf16.mxu0 %v9483_v45  ;;  %v9578_v44 = vld [vmem:[%s10838_s17 + $0x4e4] ss:$24 sps:$4 sm:$0xff]  }
  0xc5   : > { %4521 = vmatprep.subr.bf16.mxu1 %v9485_v46  ;;  %v9581_v45 = vld [vmem:[%s10838_s17 + $0x4ec] ss:$24 sps:$4 sm:$0xff]   ;;  %v9576_v46 = vld [vmem:[%s10838_s17 + $0x4e0] ss:$24 sps:$4 sm:$0xff]  }
  0xc7   : > { %4221 = vmatpush1.bf16.msra.mxu0 %v9487_v47  ;;  %v9579_v47 = vld [vmem:[%s10838_s17 + $0x4e8] ss:$24 sps:$4 sm:$0xff]  }
  0xc8   : > { %4522 = vmatpush1.bf16.msra.mxu1 %v9488_v49  ;;  %4222 = vmatprep.subr.bf16.mxu0 %v9489_v50  ;;  %v9587_v49 = vld [vmem:[%s10838_s17 + $0x51c] ss:$24 sps:$4 sm:$0xff]   ;;  %v9582_v50 = vld [vmem:[%s10838_s17 + $0x510] ss:$24 sps:$4 sm:$0xff]  }
  0xc9   : > { %4523 = vmatprep.subr.bf16.mxu1 %v9491_v51  ;;  %v9585_v51 = vld [vmem:[%s10838_s17 + $0x518] ss:$24 sps:$4 sm:$0xff]  }
  0xcb   : > { %4223 = vmatpush1.bf16.msra.mxu0 %v9493_v52  ;;  %v9590_v52 = vld [vmem:[%s10838_s17 + $0x544] ss:$24 sps:$4 sm:$0xff]  }
  0xcc   : > { %4524 = vmatpush1.bf16.msra.mxu1 %v9494_v53  ;;  %4224 = vmatprep.subr.bf16.mxu0 %v9495_v54  ;;  %v9593_v53 = vld [vmem:[%s10838_s17 + $0x54c] ss:$24 sps:$4 sm:$0xff]   ;;  %v9588_v54 = vld [vmem:[%s10838_s17 + $0x540] ss:$24 sps:$4 sm:$0xff]  }
  0xcd   : > { %4525 = vmatprep.subr.bf16.mxu1 %v9497_v55  ;;  %v9591_v55 = vld [vmem:[%s10838_s17 + $0x548] ss:$24 sps:$4 sm:$0xff]  }
  0xcf   : > { %4225 = vmatpush1.bf16.msra.mxu0 %v9499_v56  ;;  %v9596_v56 = vld [vmem:[%s10838_s17 + $0x574] ss:$24 sps:$4 sm:$0xff]  }
  0xd0   : > { %4526 = vmatpush1.bf16.msra.mxu1 %v9500_v57  ;;  %4226 = vmatprep.subr.bf16.mxu0 %v9501_v58  ;;  %v9599_v57 = vld [vmem:[%s10838_s17 + $0x57c] ss:$24 sps:$4 sm:$0xff]   ;;  %v9594_v58 = vld [vmem:[%s10838_s17 + $0x570] ss:$24 sps:$4 sm:$0xff]  }
  0xd1   : > { %4527 = vmatprep.subr.bf16.mxu1 %v9503_v59  ;;  %v9597_v59 = vld [vmem:[%s10838_s17 + $0x578] ss:$24 sps:$4 sm:$0xff]  }
  0xd3   : > { %4227 = vmatpush1.bf16.msra.mxu0 %v9505_v60  ;;  %v9602_v60 = vld [vmem:[%s10838_s17 + $0x5a4] ss:$24 sps:$4 sm:$0xff]  }
  0xd4   : > { %4528 = vmatpush1.bf16.msra.mxu1 %v9506_v61  ;;  %4228 = vmatprep.subr.bf16.mxu0 %v9507_v62  ;;  %v9605_v61 = vld [vmem:[%s10838_s17 + $0x5ac] ss:$24 sps:$4 sm:$0xff]   ;;  %v9600_v62 = vld [vmem:[%s10838_s17 + $0x5a0] ss:$24 sps:$4 sm:$0xff]  }
  0xd5   : > { %4529 = vmatprep.subr.bf16.mxu1 %v9509_v63  ;;  %v9603_v63 = vld [vmem:[%s10838_s17 + $0x5a8] ss:$24 sps:$4 sm:$0xff]  }
  0xd7   : > { %4229 = vmatpush1.bf16.msra.mxu0 %v9511_v0  ;;  %v9608_v0 = vld [vmem:[%s10838_s17 + $0x5d4] ss:$24 sps:$4 sm:$0xff]  }
  0xd8   : > { %4530 = vmatpush1.bf16.msra.mxu1 %v9512_v1  ;;  %4241 = vmatprep.subr.bf16.mxu0 %v9517_v2  ;;  %v9611_v1 = vld [vmem:[%s10838_s17 + $0x5dc] ss:$24 sps:$4 sm:$0xff]   ;;  %v9606_v2 = vld [vmem:[%s10838_s17 + $0x5d0] ss:$24 sps:$4 sm:$0xff]  }
  0xd9   : > { %4542 = vmatprep.subr.bf16.mxu1 %v9520_v3  ;;  %v9609_v3 = vld [vmem:[%s10838_s17 + $0x5d8] ss:$24 sps:$4 sm:$0xff]  }
  0xda   : > { %4231 = vmatmul.mubr.bf16.vlgmr.msra.gmra.mrb[0].mxu0 %v9521_v6 }
  0xdb   : > { %4532 = vmatmul.mubr.bf16.vlgmr.msra.gmra.mrb[0].mxu1 %v9521_v6  ;;  %4242 = vmatpush1.bf16.msra.mxu0 %v9515_v4  ;;  %v9617_v4 = vld [vmem:[%s10838_s17 + $0x604] ss:$24 sps:$4 sm:$0xff]  }
  0xdc   : > { %4543 = vmatpush1.bf16.msra.mxu1 %v9518_v5  ;;  %4243 = vmatprep.subr.bf16.mxu0 %v9524_v7  ;;  %v9620_v5 = vld [vmem:[%s10838_s17 + $0x60c] ss:$24 sps:$4 sm:$0xff]   ;;  %v9612_v6 = vld [vmem:[%s12296_s0 + $0x8] ss:$52 sps:$4 sm:$0x1f]  }
  0xdd   : > { %4544 = vmatprep.subr.bf16.mxu1 %v9527_v8  ;;  %4273 = vmatprep.mubr.bf16.mxu0 %v9614_v32  ;;  %v9615_v7 = vld [vmem:[%s10838_s17 + $0x600] ss:$24 sps:$4 sm:$0xff]  }
  0xde   : > { %4574 = vmatprep.mubr.bf16.mxu1 %v9614_v32  ;;  %v9618_v8 = vld [vmem:[%s10838_s17 + $0x608] ss:$24 sps:$4 sm:$0xff]  }
  0xdf   : > { %4244 = vmatpush1.bf16.msra.mxu0 %v9522_v9  ;;  %v9623_v9 = vld [vmem:[%s10838_s17 + $0x634] ss:$24 sps:$4 sm:$0xff]   ;;  %v9651_v32 = vld [vmem:[%s10838_s17 + $0x720] ss:$24 sps:$4 sm:$0xff]  }
  0xe0   : > { %4545 = vmatpush1.bf16.msra.mxu1 %v9525_v10  ;;  %4245 = vmatprep.subr.bf16.mxu0 %v9530_v11  ;;  %v9626_v10 = vld [vmem:[%s10838_s17 + $0x63c] ss:$24 sps:$4 sm:$0xff]   ;;  %v9621_v11 = vld [vmem:[%s10838_s17 + $0x630] ss:$24 sps:$4 sm:$0xff]  }
  0xe1   : > { %4546 = vmatprep.subr.bf16.mxu1 %v9533_v12  ;;  %v9624_v12 = vld [vmem:[%s10838_s17 + $0x638] ss:$24 sps:$4 sm:$0xff]  }
  0xe3   : > { %4246 = vmatpush1.bf16.msra.mxu0 %v9528_v13  ;;  %v9629_v13 = vld [vmem:[%s10838_s17 + $0x664] ss:$24 sps:$4 sm:$0xff]  }
  0xe4   : > { %4547 = vmatpush1.bf16.msra.mxu1 %v9531_v14  ;;  %4247 = vmatprep.subr.bf16.mxu0 %v9536_v15  ;;  %v9713_v14 = vld [vmem:[%s12296_s0 + $0x14] ss:$52 sps:$4 sm:$0x1f]   ;;  %v9632_v15 = vld [vmem:[%s10838_s17 + $0x66c] ss:$24 sps:$4 sm:$0xff]  }
  0xe5   : > { %4548 = vmatprep.subr.bf16.mxu1 %v9539_v16  ;;  %v9627_v16 = vld [vmem:[%s10838_s17 + $0x660] ss:$24 sps:$4 sm:$0xff]  }
  0xe7   : > { %4248 = vmatpush1.bf16.msra.mxu0 %v9534_v17  ;;  %v9630_v17 = vld [vmem:[%s10838_s17 + $0x668] ss:$24 sps:$4 sm:$0xff]  }
  0xe8   : > { %4549 = vmatpush1.bf16.msra.mxu1 %v9537_v18  ;;  %4249 = vmatprep.subr.bf16.mxu0 %v9542_v19  ;;  %v9635_v18 = vld [vmem:[%s10838_s17 + $0x694] ss:$24 sps:$4 sm:$0xff]  }
  0xe9   : > { %4550 = vmatprep.subr.bf16.mxu1 %v9545_v20  ;;  %v9638_v19 = vld [vmem:[%s10838_s17 + $0x69c] ss:$24 sps:$4 sm:$0xff]   ;;  %v9633_v20 = vld [vmem:[%s10838_s17 + $0x690] ss:$24 sps:$4 sm:$0xff]  }
  0xeb   : > { %4250 = vmatpush1.bf16.msra.mxu0 %v9540_v21  ;;  %v9636_v21 = vld [vmem:[%s10838_s17 + $0x698] ss:$24 sps:$4 sm:$0xff]  }
  0xec   : > { %4551 = vmatpush1.bf16.msra.mxu1 %v9543_v22  ;;  %4251 = vmatprep.subr.bf16.mxu0 %v9548_v23  ;;  %v9641_v22 = vld [vmem:[%s10838_s17 + $0x6c4] ss:$24 sps:$4 sm:$0xff]  }
  0xed   : > { %4552 = vmatprep.subr.bf16.mxu1 %v9551_v24  ;;  %v9644_v23 = vld [vmem:[%s10838_s17 + $0x6cc] ss:$24 sps:$4 sm:$0xff]   ;;  %v9639_v24 = vld [vmem:[%s10838_s17 + $0x6c0] ss:$24 sps:$4 sm:$0xff]  }
  0xef   : > { %4252 = vmatpush1.bf16.msra.mxu0 %v9546_v25  ;;  %v9642_v25 = vld [vmem:[%s10838_s17 + $0x6c8] ss:$24 sps:$4 sm:$0xff]  }
  0xf0   : > { %4553 = vmatpush1.bf16.msra.mxu1 %v9549_v26  ;;  %4253 = vmatprep.subr.bf16.mxu0 %v9554_v27  ;;  %v9647_v26 = vld [vmem:[%s10838_s17 + $0x6f4] ss:$24 sps:$4 sm:$0xff]  }
  0xf1   : > { %4554 = vmatprep.subr.bf16.mxu1 %v9557_v28  ;;  %v9650_v27 = vld [vmem:[%s10838_s17 + $0x6fc] ss:$24 sps:$4 sm:$0xff]   ;;  %v9645_v28 = vld [vmem:[%s10838_s17 + $0x6f0] ss:$24 sps:$4 sm:$0xff]  }
  0xf3   : > { %4254 = vmatpush1.bf16.msra.mxu0 %v9552_v29  ;;  %v9648_v29 = vld [vmem:[%s10838_s17 + $0x6f8] ss:$24 sps:$4 sm:$0xff]  }
  0xf4   : > { %4555 = vmatpush1.bf16.msra.mxu1 %v9555_v30  ;;  %4255 = vmatprep.subr.bf16.mxu0 %v9560_v31  ;;  %v9653_v30 = vld [vmem:[%s10838_s17 + $0x724] ss:$24 sps:$4 sm:$0xff]  }
  0xf5   : > { %4556 = vmatprep.subr.bf16.mxu1 %v9563_v33  ;;  %v9656_v31 = vld [vmem:[%s10838_s17 + $0x72c] ss:$24 sps:$4 sm:$0xff]   ;;  %v9654_v33 = vld [vmem:[%s10838_s17 + $0x728] ss:$24 sps:$4 sm:$0xff]  }
  0xf7   : > { %4256 = vmatpush1.bf16.msra.mxu0 %v9558_v34  ;;  %v9659_v34 = vld [vmem:[%s10838_s17 + $0x754] ss:$24 sps:$4 sm:$0xff]  }
  0xf8   : > { %4557 = vmatpush1.bf16.msra.mxu1 %v9561_v35  ;;  %4257 = vmatprep.subr.bf16.mxu0 %v9566_v36  ;;  %v9662_v35 = vld [vmem:[%s10838_s17 + $0x75c] ss:$24 sps:$4 sm:$0xff]   ;;  %v9657_v36 = vld [vmem:[%s10838_s17 + $0x750] ss:$24 sps:$4 sm:$0xff]  }
  0xf9   : > { %4558 = vmatprep.subr.bf16.mxu1 %v9569_v37  ;;  %v9660_v37 = vld [vmem:[%s10838_s17 + $0x758] ss:$24 sps:$4 sm:$0xff]  }
  0xfb   : > { %4258 = vmatpush1.bf16.msra.mxu0 %v9564_v38  ;;  %v9665_v38 = vld [vmem:[%s10838_s17 + $0x784] ss:$24 sps:$4 sm:$0xff]  }
  0xfc   : > { %4559 = vmatpush1.bf16.msra.mxu1 %v9567_v39  ;;  %4259 = vmatprep.subr.bf16.mxu0 %v9572_v40  ;;  %v9668_v39 = vld [vmem:[%s10838_s17 + $0x78c] ss:$24 sps:$4 sm:$0xff]   ;;  %v9663_v40 = vld [vmem:[%s10838_s17 + $0x780] ss:$24 sps:$4 sm:$0xff]  }
  0xfd   : > { %4560 = vmatprep.subr.bf16.mxu1 %v9575_v41  ;;  %v9666_v41 = vld [vmem:[%s10838_s17 + $0x788] ss:$24 sps:$4 sm:$0xff]  }
  0xff   : > { %4260 = vmatpush1.bf16.msra.mxu0 %v9570_v42  ;;  %v9671_v42 = vld [vmem:[%s10838_s17 + $0x7b4] ss:$24 sps:$4 sm:$0xff]  }
 0x100   : > { %4561 = vmatpush1.bf16.msra.mxu1 %v9573_v43  ;;  %4261 = vmatprep.subr.bf16.mxu0 %v9578_v44  ;;  %v9674_v43 = vld [vmem:[%s10838_s17 + $0x7bc] ss:$24 sps:$4 sm:$0xff]   ;;  %v9669_v44 = vld [vmem:[%s10838_s17 + $0x7b0] ss:$24 sps:$4 sm:$0xff]  }
 0x101   : > { %4562 = vmatprep.subr.bf16.mxu1 %v9581_v45  ;;  %v9672_v45 = vld [vmem:[%s10838_s17 + $0x7b8] ss:$24 sps:$4 sm:$0xff]  }
 0x103   : > { %4262 = vmatpush1.bf16.msra.mxu0 %v9576_v46  ;;  %v9677_v46 = vld [vmem:[%s10838_s17 + $0x7e4] ss:$24 sps:$4 sm:$0xff]  }
 0x104   : > { %4563 = vmatpush1.bf16.msra.mxu1 %v9579_v47  ;;  %4263 = vmatprep.subr.bf16.mxu0 %v9584_v48  ;;  %v9680_v47 = vld [vmem:[%s10838_s17 + $0x7ec] ss:$24 sps:$4 sm:$0xff]   ;;  %v9675_v48 = vld [vmem:[%s10838_s17 + $0x7e0] ss:$24 sps:$4 sm:$0xff]  }
 0x105   : > { %4564 = vmatprep.subr.bf16.mxu1 %v9587_v49  ;;  %v9678_v49 = vld [vmem:[%s10838_s17 + $0x7e8] ss:$24 sps:$4 sm:$0xff]  }
 0x107   : > { %4264 = vmatpush1.bf16.msra.mxu0 %v9582_v50  ;;  %v9683_v50 = vld [vmem:[%s10838_s17 + $0x814] ss:$24 sps:$4 sm:$0xff]  }
 0x108   : > { %4565 = vmatpush1.bf16.msra.mxu1 %v9585_v51  ;;  %4265 = vmatprep.subr.bf16.mxu0 %v9590_v52  ;;  %v9686_v51 = vld [vmem:[%s10838_s17 + $0x81c] ss:$24 sps:$4 sm:$0xff]   ;;  %v9681_v52 = vld [vmem:[%s10838_s17 + $0x810] ss:$24 sps:$4 sm:$0xff]  }
 0x109   : > { %4566 = vmatprep.subr.bf16.mxu1 %v9593_v53  ;;  %v9684_v53 = vld [vmem:[%s10838_s17 + $0x818] ss:$24 sps:$4 sm:$0xff]  }
 0x10b   : > { %4266 = vmatpush1.bf16.msra.mxu0 %v9588_v54  ;;  %v9689_v54 = vld [vmem:[%s10838_s17 + $0x844] ss:$24 sps:$4 sm:$0xff]  }
 0x10c   : > { %4567 = vmatpush1.bf16.msra.mxu1 %v9591_v55  ;;  %4267 = vmatprep.subr.bf16.mxu0 %v9596_v56  ;;  %v9692_v55 = vld [vmem:[%s10838_s17 + $0x84c] ss:$24 sps:$4 sm:$0xff]   ;;  %v9687_v56 = vld [vmem:[%s10838_s17 + $0x840] ss:$24 sps:$4 sm:$0xff]  }
 0x10d   : > { %4568 = vmatprep.subr.bf16.mxu1 %v9599_v57  ;;  %v9690_v57 = vld [vmem:[%s10838_s17 + $0x848] ss:$24 sps:$4 sm:$0xff]  }
 0x10f   : > { %4268 = vmatpush1.bf16.msra.mxu0 %v9594_v58  ;;  %v9695_v58 = vld [vmem:[%s10838_s17 + $0x874] ss:$24 sps:$4 sm:$0xff]  }
 0x110   : > { %4569 = vmatpush1.bf16.msra.mxu1 %v9597_v59  ;;  %4269 = vmatprep.subr.bf16.mxu0 %v9602_v60  ;;  %v9698_v59 = vld [vmem:[%s10838_s17 + $0x87c] ss:$24 sps:$4 sm:$0xff]   ;;  %v9693_v60 = vld [vmem:[%s10838_s17 + $0x870] ss:$24 sps:$4 sm:$0xff]  }
 0x111   : > { %4570 = vmatprep.subr.bf16.mxu1 %v9605_v61  ;;  %v9696_v61 = vld [vmem:[%s10838_s17 + $0x878] ss:$24 sps:$4 sm:$0xff]  }
 0x113   : > { %4270 = vmatpush1.bf16.msra.mxu0 %v9600_v62  ;;  %v9701_v62 = vld [vmem:[%s10838_s17 + $0x8a4] ss:$24 sps:$4 sm:$0xff]  }
 0x114   : > { %4571 = vmatpush1.bf16.msra.mxu1 %v9603_v63  ;;  %4271 = vmatprep.subr.bf16.mxu0 %v9608_v0  ;;  %v9704_v63 = vld [vmem:[%s10838_s17 + $0x8ac] ss:$24 sps:$4 sm:$0xff]   ;;  %v9699_v0 = vld [vmem:[%s10838_s17 + $0x8a0] ss:$24 sps:$4 sm:$0xff]  }
 0x115   : > { %4572 = vmatprep.subr.bf16.mxu1 %v9611_v1  ;;  %v9702_v1 = vld [vmem:[%s10838_s17 + $0x8a8] ss:$24 sps:$4 sm:$0xff]  }
 0x117   : > { %4272 = vmatpush1.bf16.msra.mxu0 %v9606_v2  ;;  %v9707_v2 = vld [vmem:[%s10838_s17 + $0x8d4] ss:$24 sps:$4 sm:$0xff]  }
 0x118   : > { %4573 = vmatpush1.bf16.msra.mxu1 %v9609_v3  ;;  %4284 = vmatprep.subr.bf16.mxu0 %v9617_v4  ;;  %v9710_v3 = vld [vmem:[%s10838_s17 + $0x8dc] ss:$24 sps:$4 sm:$0xff]   ;;  %v9705_v4 = vld [vmem:[%s10838_s17 + $0x8d0] ss:$24 sps:$4 sm:$0xff]  }
 0x119   : > { %4585 = vmatprep.subr.bf16.mxu1 %v9620_v5  ;;  %v9708_v5 = vld [vmem:[%s10838_s17 + $0x8d8] ss:$24 sps:$4 sm:$0xff]  }
 0x11a   : > { %4274 = vmatmul.mubr.bf16.vlgmr.msra.gmra.mrb[0].mxu0 %v9612_v6 }
 0x11b   : > { %4575 = vmatmul.mubr.bf16.vlgmr.msra.gmra.mrb[0].mxu1 %v9612_v6  ;;  %4285 = vmatpush1.bf16.msra.mxu0 %v9615_v7  ;;  %v9716_v6 = vld [vmem:[%s10838_s17 + $0x904] ss:$24 sps:$4 sm:$0xff]  }
 0x11c   : > { %4586 = vmatpush1.bf16.msra.mxu1 %v9618_v8  ;;  %4286 = vmatprep.subr.bf16.mxu0 %v9623_v9  ;;  %v9719_v7 = vld [vmem:[%s10838_s17 + $0x90c] ss:$24 sps:$4 sm:$0xff]   ;;  %v9714_v9 = vld [vmem:[%s10838_s17 + $0x900] ss:$24 sps:$4 sm:$0xff]  }
 0x11d   : > { %4587 = vmatprep.subr.bf16.mxu1 %v9626_v10  ;;  %4316 = vmatprep.mubr.bf16.mxu0 %v9713_v14  ;;  %v9711_v8 = vld [vmem:[%s12296_s0 + $0x10] ss:$52 sps:$4 sm:$0x1f]   ;;  %v9717_v10 = vld [vmem:[%s10838_s17 + $0x908] ss:$24 sps:$4 sm:$0xff]  }
 0x11e   : > { %4617 = vmatprep.mubr.bf16.mxu1 %v9713_v14  ;;  %v9720_v14 = vld [vmem:[%s10838_s17 + $0x930] ss:$24 sps:$4 sm:$0xff]  }
 0x11f   : > { %4287 = vmatpush1.bf16.msra.mxu0 %v9621_v11  ;;  %v9722_v11 = vld [vmem:[%s10838_s17 + $0x934] ss:$24 sps:$4 sm:$0xff]  }
 0x120   : > { %4588 = vmatpush1.bf16.msra.mxu1 %v9624_v12  ;;  %4288 = vmatprep.subr.bf16.mxu0 %v9629_v13  ;;  %v9725_v12 = vld [vmem:[%s10838_s17 + $0x93c] ss:$24 sps:$4 sm:$0xff]  }
 0x121   : > { %4589 = vmatprep.subr.bf16.mxu1 %v9632_v15  ;;  %v9812_v13 = vld [vmem:[%s12296_s0 + $0x1c] ss:$52 sps:$4 sm:$0x1f]  }
 0x122   : > { %v9723_v15 = vld [vmem:[%s10838_s17 + $0x938] ss:$24 sps:$4 sm:$0xff]  }
 0x123   : > { %4289 = vmatpush1.bf16.msra.mxu0 %v9627_v16  ;;  %v9728_v16 = vld [vmem:[%s10838_s17 + $0x964] ss:$24 sps:$4 sm:$0xff]  }
 0x124   : > { %4590 = vmatpush1.bf16.msra.mxu1 %v9630_v17  ;;  %4290 = vmatprep.subr.bf16.mxu0 %v9635_v18  ;;  %v9731_v17 = vld [vmem:[%s10838_s17 + $0x96c] ss:$24 sps:$4 sm:$0xff]   ;;  %v9726_v18 = vld [vmem:[%s10838_s17 + $0x960] ss:$24 sps:$4 sm:$0xff]  }
 0x125   : > { %4591 = vmatprep.subr.bf16.mxu1 %v9638_v19  ;;  %v9729_v19 = vld [vmem:[%s10838_s17 + $0x968] ss:$24 sps:$4 sm:$0xff]  }
 0x127   : > { %4291 = vmatpush1.bf16.msra.mxu0 %v9633_v20  ;;  %v9734_v20 = vld [vmem:[%s10838_s17 + $0x994] ss:$24 sps:$4 sm:$0xff]  }
 0x128   : > { %4592 = vmatpush1.bf16.msra.mxu1 %v9636_v21  ;;  %4292 = vmatprep.subr.bf16.mxu0 %v9641_v22  ;;  %v9737_v21 = vld [vmem:[%s10838_s17 + $0x99c] ss:$24 sps:$4 sm:$0xff]   ;;  %v9732_v22 = vld [vmem:[%s10838_s17 + $0x990] ss:$24 sps:$4 sm:$0xff]  }
 0x129   : > { %4593 = vmatprep.subr.bf16.mxu1 %v9644_v23  ;;  %v9735_v23 = vld [vmem:[%s10838_s17 + $0x998] ss:$24 sps:$4 sm:$0xff]  }
 0x12b   : > { %4293 = vmatpush1.bf16.msra.mxu0 %v9639_v24  ;;  %v9740_v24 = vld [vmem:[%s10838_s17 + $0x9c4] ss:$24 sps:$4 sm:$0xff]  }
 0x12c   : > { %4594 = vmatpush1.bf16.msra.mxu1 %v9642_v25  ;;  %4294 = vmatprep.subr.bf16.mxu0 %v9647_v26  ;;  %v9743_v25 = vld [vmem:[%s10838_s17 + $0x9cc] ss:$24 sps:$4 sm:$0xff]   ;;  %v9738_v26 = vld [vmem:[%s10838_s17 + $0x9c0] ss:$24 sps:$4 sm:$0xff]  }
 0x12d   : > { %4595 = vmatprep.subr.bf16.mxu1 %v9650_v27  ;;  %v9741_v27 = vld [vmem:[%s10838_s17 + $0x9c8] ss:$24 sps:$4 sm:$0xff]  }
 0x12f   : > { %4295 = vmatpush1.bf16.msra.mxu0 %v9645_v28  ;;  %v9746_v28 = vld [vmem:[%s10838_s17 + $0x9f4] ss:$24 sps:$4 sm:$0xff]  }
 0x130   : > { %4596 = vmatpush1.bf16.msra.mxu1 %v9648_v29  ;;  %4296 = vmatprep.subr.bf16.mxu0 %v9653_v30  ;;  %v9749_v29 = vld [vmem:[%s10838_s17 + $0x9fc] ss:$24 sps:$4 sm:$0xff]   ;;  %v9744_v30 = vld [vmem:[%s10838_s17 + $0x9f0] ss:$24 sps:$4 sm:$0xff]  }
 0x131   : > { %4597 = vmatprep.subr.bf16.mxu1 %v9656_v31  ;;  %v9747_v31 = vld [vmem:[%s10838_s17 + $0x9f8] ss:$24 sps:$4 sm:$0xff]  }
 0x133   : > { %4297 = vmatpush1.bf16.msra.mxu0 %v9651_v32  ;;  %v9752_v32 = vld [vmem:[%s10838_s17 + $0xa24] ss:$24 sps:$4 sm:$0xff]  }
 0x134   : > { %4598 = vmatpush1.bf16.msra.mxu1 %v9654_v33  ;;  %4298 = vmatprep.subr.bf16.mxu0 %v9659_v34  ;;  %v9755_v33 = vld [vmem:[%s10838_s17 + $0xa2c] ss:$24 sps:$4 sm:$0xff]   ;;  %v9750_v34 = vld [vmem:[%s10838_s17 + $0xa20] ss:$24 sps:$4 sm:$0xff]  }
 0x135   : > { %4599 = vmatprep.subr.bf16.mxu1 %v9662_v35  ;;  %v9753_v35 = vld [vmem:[%s10838_s17 + $0xa28] ss:$24 sps:$4 sm:$0xff]  }
 0x137   : > { %4299 = vmatpush1.bf16.msra.mxu0 %v9657_v36  ;;  %v9758_v36 = vld [vmem:[%s10838_s17 + $0xa54] ss:$24 sps:$4 sm:$0xff]  }
 0x138   : > { %4600 = vmatpush1.bf16.msra.mxu1 %v9660_v37  ;;  %4300 = vmatprep.subr.bf16.mxu0 %v9665_v38  ;;  %v9761_v37 = vld [vmem:[%s10838_s17 + $0xa5c] ss:$24 sps:$4 sm:$0xff]   ;;  %v9756_v38 = vld [vmem:[%s10838_s17 + $0xa50] ss:$24 sps:$4 sm:$0xff]  }
 0x139   : > { %4601 = vmatprep.subr.bf16.mxu1 %v9668_v39  ;;  %v9759_v39 = vld [vmem:[%s10838_s17 + $0xa58] ss:$24 sps:$4 sm:$0xff]  }
 0x13b   : > { %4301 = vmatpush1.bf16.msra.mxu0 %v9663_v40  ;;  %v9764_v40 = vld [vmem:[%s10838_s17 + $0xa84] ss:$24 sps:$4 sm:$0xff]  }
 0x13c   : > { %4602 = vmatpush1.bf16.msra.mxu1 %v9666_v41  ;;  %4302 = vmatprep.subr.bf16.mxu0 %v9671_v42  ;;  %v9767_v41 = vld [vmem:[%s10838_s17 + $0xa8c] ss:$24 sps:$4 sm:$0xff]   ;;  %v9762_v42 = vld [vmem:[%s10838_s17 + $0xa80] ss:$24 sps:$4 sm:$0xff]  }
 0x13d   : > { %4603 = vmatprep.subr.bf16.mxu1 %v9674_v43  ;;  %v9765_v43 = vld [vmem:[%s10838_s17 + $0xa88] ss:$24 sps:$4 sm:$0xff]  }
 0x13f   : > { %4303 = vmatpush1.bf16.msra.mxu0 %v9669_v44  ;;  %v9770_v44 = vld [vmem:[%s10838_s17 + $0xab4] ss:$24 sps:$4 sm:$0xff]  }
 0x140   : > { %4604 = vmatpush1.bf16.msra.mxu1 %v9672_v45  ;;  %4304 = vmatprep.subr.bf16.mxu0 %v9677_v46  ;;  %v9773_v45 = vld [vmem:[%s10838_s17 + $0xabc] ss:$24 sps:$4 sm:$0xff]   ;;  %v9768_v46 = vld [vmem:[%s10838_s17 + $0xab0] ss:$24 sps:$4 sm:$0xff]  }
 0x141   : > { %4605 = vmatprep.subr.bf16.mxu1 %v9680_v47  ;;  %v9771_v47 = vld [vmem:[%s10838_s17 + $0xab8] ss:$24 sps:$4 sm:$0xff]  }
 0x143   : > { %4305 = vmatpush1.bf16.msra.mxu0 %v9675_v48  ;;  %v9776_v48 = vld [vmem:[%s10838_s17 + $0xae4] ss:$24 sps:$4 sm:$0xff]  }
 0x144   : > { %4606 = vmatpush1.bf16.msra.mxu1 %v9678_v49  ;;  %4306 = vmatprep.subr.bf16.mxu0 %v9683_v50  ;;  %v9779_v49 = vld [vmem:[%s10838_s17 + $0xaec] ss:$24 sps:$4 sm:$0xff]   ;;  %v9774_v50 = vld [vmem:[%s10838_s17 + $0xae0] ss:$24 sps:$4 sm:$0xff]  }
 0x145   : > { %4607 = vmatprep.subr.bf16.mxu1 %v9686_v51  ;;  %v9777_v51 = vld [vmem:[%s10838_s17 + $0xae8] ss:$24 sps:$4 sm:$0xff]  }
 0x147   : > { %4307 = vmatpush1.bf16.msra.mxu0 %v9681_v52  ;;  %v9782_v52 = vld [vmem:[%s10838_s17 + $0xb14] ss:$24 sps:$4 sm:$0xff]  }
 0x148   : > { %4608 = vmatpush1.bf16.msra.mxu1 %v9684_v53  ;;  %4308 = vmatprep.subr.bf16.mxu0 %v9689_v54  ;;  %v9785_v53 = vld [vmem:[%s10838_s17 + $0xb1c] ss:$24 sps:$4 sm:$0xff]   ;;  %v9780_v54 = vld [vmem:[%s10838_s17 + $0xb10] ss:$24 sps:$4 sm:$0xff]  }
 0x149   : > { %4609 = vmatprep.subr.bf16.mxu1 %v9692_v55  ;;  %v9783_v55 = vld [vmem:[%s10838_s17 + $0xb18] ss:$24 sps:$4 sm:$0xff]  }
 0x14b   : > { %4309 = vmatpush1.bf16.msra.mxu0 %v9687_v56  ;;  %v9788_v56 = vld [vmem:[%s10838_s17 + $0xb44] ss:$24 sps:$4 sm:$0xff]  }
 0x14c   : > { %4610 = vmatpush1.bf16.msra.mxu1 %v9690_v57  ;;  %4310 = vmatprep.subr.bf16.mxu0 %v9695_v58  ;;  %v9791_v57 = vld [vmem:[%s10838_s17 + $0xb4c] ss:$24 sps:$4 sm:$0xff]   ;;  %v9786_v58 = vld [vmem:[%s10838_s17 + $0xb40] ss:$24 sps:$4 sm:$0xff]  }
 0x14d   : > { %4611 = vmatprep.subr.bf16.mxu1 %v9698_v59  ;;  %v9789_v59 = vld [vmem:[%s10838_s17 + $0xb48] ss:$24 sps:$4 sm:$0xff]  }
 0x14f   : > { %4311 = vmatpush1.bf16.msra.mxu0 %v9693_v60  ;;  %v9794_v60 = vld [vmem:[%s10838_s17 + $0xb74] ss:$24 sps:$4 sm:$0xff]  }
 0x150   : > { %4612 = vmatpush1.bf16.msra.mxu1 %v9696_v61  ;;  %4312 = vmatprep.subr.bf16.mxu0 %v9701_v62  ;;  %v9797_v61 = vld [vmem:[%s10838_s17 + $0xb7c] ss:$24 sps:$4 sm:$0xff]   ;;  %v9792_v62 = vld [vmem:[%s10838_s17 + $0xb70] ss:$24 sps:$4 sm:$0xff]  }
 0x151   : > { %4613 = vmatprep.subr.bf16.mxu1 %v9704_v63  ;;  %v9795_v63 = vld [vmem:[%s10838_s17 + $0xb78] ss:$24 sps:$4 sm:$0xff]  }
 0x153   : > { %4313 = vmatpush1.bf16.msra.mxu0 %v9699_v0  ;;  %v9800_v0 = vld [vmem:[%s10838_s17 + $0xba4] ss:$24 sps:$4 sm:$0xff]  }
 0x154   : > { %4614 = vmatpush1.bf16.msra.mxu1 %v9702_v1  ;;  %4314 = vmatprep.subr.bf16.mxu0 %v9707_v2  ;;  %v9803_v1 = vld [vmem:[%s10838_s17 + $0xbac] ss:$24 sps:$4 sm:$0xff]   ;;  %v9798_v2 = vld [vmem:[%s10838_s17 + $0xba0] ss:$24 sps:$4 sm:$0xff]  }
 0x155   : > { %4615 = vmatprep.subr.bf16.mxu1 %v9710_v3  ;;  %v9801_v3 = vld [vmem:[%s10838_s17 + $0xba8] ss:$24 sps:$4 sm:$0xff]  }
 0x157   : > { %4315 = vmatpush1.bf16.msra.mxu0 %v9705_v4  ;;  %v9806_v4 = vld [vmem:[%s10838_s17 + $0xbd4] ss:$24 sps:$4 sm:$0xff]  }
 0x158   : > { %4616 = vmatpush1.bf16.msra.mxu1 %v9708_v5  ;;  %4327 = vmatprep.subr.bf16.mxu0 %v9716_v6  ;;  %v9809_v5 = vld [vmem:[%s10838_s17 + $0xbdc] ss:$24 sps:$4 sm:$0xff]   ;;  %v9804_v6 = vld [vmem:[%s10838_s17 + $0xbd0] ss:$24 sps:$4 sm:$0xff]  }
 0x159   : > { %4628 = vmatprep.subr.bf16.mxu1 %v9719_v7  ;;  %v9807_v7 = vld [vmem:[%s10838_s17 + $0xbd8] ss:$24 sps:$4 sm:$0xff]  }
 0x15a   : > { %4317 = vmatmul.mubr.bf16.vlgmr.msra.gmra.mrb[0].mxu0 %v9711_v8 }
 0x15b   : > { %4618 = vmatmul.mubr.bf16.vlgmr.msra.gmra.mrb[0].mxu1 %v9711_v8  ;;  %4328 = vmatpush1.bf16.msra.mxu0 %v9714_v9  ;;  %v9815_v8 = vld [vmem:[%s10838_s17 + $0xc04] ss:$24 sps:$4 sm:$0xff]  }
 0x15c   : > { %4629 = vmatpush1.bf16.msra.mxu1 %v9717_v10  ;;  %4329 = vmatprep.subr.bf16.mxu0 %v9722_v11  ;;  %v9818_v9 = vld [vmem:[%s10838_s17 + $0xc0c] ss:$24 sps:$4 sm:$0xff]   ;;  %v9813_v11 = vld [vmem:[%s10838_s17 + $0xc00] ss:$24 sps:$4 sm:$0xff]  }
 0x15d   : > { %4630 = vmatprep.subr.bf16.mxu1 %v9725_v12  ;;  %4359 = vmatprep.mubr.bf16.mxu0 %v9812_v13  ;;  %v9810_v10 = vld [vmem:[%s12296_s0 + $0x18] ss:$52 sps:$4 sm:$0x1f]   ;;  %v9816_v12 = vld [vmem:[%s10838_s17 + $0xc08] ss:$24 sps:$4 sm:$0xff]  }
 0x15e   : > { %4660 = vmatprep.mubr.bf16.mxu1 %v9812_v13  ;;  %v9821_v13 = vld [vmem:[%s10838_s17 + $0xc34] ss:$24 sps:$4 sm:$0xff]  }
 0x15f   : > { %4330 = vmatpush1.bf16.msra.mxu0 %v9720_v14  ;;  %v9824_v14 = vld [vmem:[%s10838_s17 + $0xc3c] ss:$24 sps:$4 sm:$0xff]  }
 0x160   : > { %4631 = vmatpush1.bf16.msra.mxu1 %v9723_v15  ;;  %4331 = vmatprep.subr.bf16.mxu0 %v9728_v16  ;;  %v9911_v15 = vld [vmem:[%s12296_s0 + $0x24] ss:$52 sps:$4 sm:$0x1f]   ;;  %v9819_v16 = vld [vmem:[%s10838_s17 + $0xc30] ss:$24 sps:$4 sm:$0xff]  }
 0x161   : > { %4632 = vmatprep.subr.bf16.mxu1 %v9731_v17  ;;  %v9822_v17 = vld [vmem:[%s10838_s17 + $0xc38] ss:$24 sps:$4 sm:$0xff]  }
 0x163   : > { %4332 = vmatpush1.bf16.msra.mxu0 %v9726_v18  ;;  %v9827_v18 = vld [vmem:[%s10838_s17 + $0xc64] ss:$24 sps:$4 sm:$0xff]  }
 0x164   : > { %4633 = vmatpush1.bf16.msra.mxu1 %v9729_v19  ;;  %4333 = vmatprep.subr.bf16.mxu0 %v9734_v20  ;;  %v9830_v19 = vld [vmem:[%s10838_s17 + $0xc6c] ss:$24 sps:$4 sm:$0xff]   ;;  %v9825_v20 = vld [vmem:[%s10838_s17 + $0xc60] ss:$24 sps:$4 sm:$0xff]  }
 0x165   : > { %4634 = vmatprep.subr.bf16.mxu1 %v9737_v21  ;;  %v9828_v21 = vld [vmem:[%s10838_s17 + $0xc68] ss:$24 sps:$4 sm:$0xff]  }
 0x167   : > { %4334 = vmatpush1.bf16.msra.mxu0 %v9732_v22  ;;  %v9833_v22 = vld [vmem:[%s10838_s17 + $0xc94] ss:$24 sps:$4 sm:$0xff]  }
 0x168   : > { %4635 = vmatpush1.bf16.msra.mxu1 %v9735_v23  ;;  %4335 = vmatprep.subr.bf16.mxu0 %v9740_v24  ;;  %v9836_v23 = vld [vmem:[%s10838_s17 + $0xc9c] ss:$24 sps:$4 sm:$0xff]   ;;  %v9831_v24 = vld [vmem:[%s10838_s17 + $0xc90] ss:$24 sps:$4 sm:$0xff]  }
 0x169   : > { %4636 = vmatprep.subr.bf16.mxu1 %v9743_v25  ;;  %v9834_v25 = vld [vmem:[%s10838_s17 + $0xc98] ss:$24 sps:$4 sm:$0xff]  }
 0x16b   : > { %4336 = vmatpush1.bf16.msra.mxu0 %v9738_v26  ;;  %v9839_v26 = vld [vmem:[%s10838_s17 + $0xcc4] ss:$24 sps:$4 sm:$0xff]  }
 0x16c   : > { %4637 = vmatpush1.bf16.msra.mxu1 %v9741_v27  ;;  %4337 = vmatprep.subr.bf16.mxu0 %v9746_v28  ;;  %v9842_v27 = vld [vmem:[%s10838_s17 + $0xccc] ss:$24 sps:$4 sm:$0xff]   ;;  %v9837_v28 = vld [vmem:[%s10838_s17 + $0xcc0] ss:$24 sps:$4 sm:$0xff]  }
 0x16d   : > { %4638 = vmatprep.subr.bf16.mxu1 %v9749_v29  ;;  %v9840_v29 = vld [vmem:[%s10838_s17 + $0xcc8] ss:$24 sps:$4 sm:$0xff]  }
 0x16f   : > { %4338 = vmatpush1.bf16.msra.mxu0 %v9744_v30  ;;  %v9845_v30 = vld [vmem:[%s10838_s17 + $0xcf4] ss:$24 sps:$4 sm:$0xff]  }
 0x170   : > { %4639 = vmatpush1.bf16.msra.mxu1 %v9747_v31  ;;  %4339 = vmatprep.subr.bf16.mxu0 %v9752_v32  ;;  %v9848_v31 = vld [vmem:[%s10838_s17 + $0xcfc] ss:$24 sps:$4 sm:$0xff]   ;;  %v9843_v32 = vld [vmem:[%s10838_s17 + $0xcf0] ss:$24 sps:$4 sm:$0xff]  }
 0x171   : > { %4640 = vmatprep.subr.bf16.mxu1 %v9755_v33  ;;  %v9846_v33 = vld [vmem:[%s10838_s17 + $0xcf8] ss:$24 sps:$4 sm:$0xff]  }
 0x173   : > { %4340 = vmatpush1.bf16.msra.mxu0 %v9750_v34  ;;  %v9851_v34 = vld [vmem:[%s10838_s17 + $0xd24] ss:$24 sps:$4 sm:$0xff]  }
 0x174   : > { %4641 = vmatpush1.bf16.msra.mxu1 %v9753_v35  ;;  %4341 = vmatprep.subr.bf16.mxu0 %v9758_v36  ;;  %v9854_v35 = vld [vmem:[%s10838_s17 + $0xd2c] ss:$24 sps:$4 sm:$0xff]   ;;  %v9849_v36 = vld [vmem:[%s10838_s17 + $0xd20] ss:$24 sps:$4 sm:$0xff]  }
 0x175   : > { %4642 = vmatprep.subr.bf16.mxu1 %v9761_v37  ;;  %v9852_v37 = vld [vmem:[%s10838_s17 + $0xd28] ss:$24 sps:$4 sm:$0xff]  }
 0x177   : > { %4342 = vmatpush1.bf16.msra.mxu0 %v9756_v38  ;;  %v9857_v38 = vld [vmem:[%s10838_s17 + $0xd54] ss:$24 sps:$4 sm:$0xff]  }
 0x178   : > { %4643 = vmatpush1.bf16.msra.mxu1 %v9759_v39  ;;  %4343 = vmatprep.subr.bf16.mxu0 %v9764_v40  ;;  %v9860_v39 = vld [vmem:[%s10838_s17 + $0xd5c] ss:$24 sps:$4 sm:$0xff]   ;;  %v9855_v40 = vld [vmem:[%s10838_s17 + $0xd50] ss:$24 sps:$4 sm:$0xff]  }
 0x179   : > { %4644 = vmatprep.subr.bf16.mxu1 %v9767_v41  ;;  %v9858_v41 = vld [vmem:[%s10838_s17 + $0xd58] ss:$24 sps:$4 sm:$0xff]  }
 0x17b   : > { %4344 = vmatpush1.bf16.msra.mxu0 %v9762_v42  ;;  %v9863_v42 = vld [vmem:[%s10838_s17 + $0xd84] ss:$24 sps:$4 sm:$0xff]  }
 0x17c   : > { %4645 = vmatpush1.bf16.msra.mxu1 %v9765_v43  ;;  %4345 = vmatprep.subr.bf16.mxu0 %v9770_v44  ;;  %v9866_v43 = vld [vmem:[%s10838_s17 + $0xd8c] ss:$24 sps:$4 sm:$0xff]   ;;  %v9861_v44 = vld [vmem:[%s10838_s17 + $0xd80] ss:$24 sps:$4 sm:$0xff]  }
 0x17d   : > { %4646 = vmatprep.subr.bf16.mxu1 %v9773_v45  ;;  %v9864_v45 = vld [vmem:[%s10838_s17 + $0xd88] ss:$24 sps:$4 sm:$0xff]  }
 0x17f   : > { %4346 = vmatpush1.bf16.msra.mxu0 %v9768_v46  ;;  %v9869_v46 = vld [vmem:[%s10838_s17 + $0xdb4] ss:$24 sps:$4 sm:$0xff]  }
 0x180   : > { %4647 = vmatpush1.bf16.msra.mxu1 %v9771_v47  ;;  %4347 = vmatprep.subr.bf16.mxu0 %v9776_v48  ;;  %v9872_v47 = vld [vmem:[%s10838_s17 + $0xdbc] ss:$24 sps:$4 sm:$0xff]   ;;  %v9867_v48 = vld [vmem:[%s10838_s17 + $0xdb0] ss:$24 sps:$4 sm:$0xff]  }
 0x181   : > { %4648 = vmatprep.subr.bf16.mxu1 %v9779_v49  ;;  %v9870_v49 = vld [vmem:[%s10838_s17 + $0xdb8] ss:$24 sps:$4 sm:$0xff]  }
 0x183   : > { %4348 = vmatpush1.bf16.msra.mxu0 %v9774_v50  ;;  %v9875_v50 = vld [vmem:[%s10838_s17 + $0xde4] ss:$24 sps:$4 sm:$0xff]  }
 0x184   : > { %4649 = vmatpush1.bf16.msra.mxu1 %v9777_v51  ;;  %4349 = vmatprep.subr.bf16.mxu0 %v9782_v52  ;;  %v9878_v51 = vld [vmem:[%s10838_s17 + $0xdec] ss:$24 sps:$4 sm:$0xff]   ;;  %v9873_v52 = vld [vmem:[%s10838_s17 + $0xde0] ss:$24 sps:$4 sm:$0xff]  }
 0x185   : > { %4650 = vmatprep.subr.bf16.mxu1 %v9785_v53  ;;  %v9876_v53 = vld [vmem:[%s10838_s17 + $0xde8] ss:$24 sps:$4 sm:$0xff]  }
 0x187   : > { %4350 = vmatpush1.bf16.msra.mxu0 %v9780_v54  ;;  %v9881_v54 = vld [vmem:[%s10838_s17 + $0xe14] ss:$24 sps:$4 sm:$0xff]  }
 0x188   : > { %4651 = vmatpush1.bf16.msra.mxu1 %v9783_v55  ;;  %4351 = vmatprep.subr.bf16.mxu0 %v9788_v56  ;;  %v9884_v55 = vld [vmem:[%s10838_s17 + $0xe1c] ss:$24 sps:$4 sm:$0xff]   ;;  %v9879_v56 = vld [vmem:[%s10838_s17 + $0xe10] ss:$24 sps:$4 sm:$0xff]  }
 0x189   : > { %4652 = vmatprep.subr.bf16.mxu1 %v9791_v57  ;;  %v9882_v57 = vld [vmem:[%s10838_s17 + $0xe18] ss:$24 sps:$4 sm:$0xff]  }
 0x18b   : > { %4352 = vmatpush1.bf16.msra.mxu0 %v9786_v58  ;;  %v9887_v58 = vld [vmem:[%s10838_s17 + $0xe44] ss:$24 sps:$4 sm:$0xff]  }
 0x18c   : > { %4653 = vmatpush1.bf16.msra.mxu1 %v9789_v59  ;;  %4353 = vmatprep.subr.bf16.mxu0 %v9794_v60  ;;  %v9890_v59 = vld [vmem:[%s10838_s17 + $0xe4c] ss:$24 sps:$4 sm:$0xff]   ;;  %v9885_v60 = vld [vmem:[%s10838_s17 + $0xe40] ss:$24 sps:$4 sm:$0xff]  }
 0x18d   : > { %4654 = vmatprep.subr.bf16.mxu1 %v9797_v61  ;;  %v9888_v61 = vld [vmem:[%s10838_s17 + $0xe48] ss:$24 sps:$4 sm:$0xff]  }
 0x18f   : > { %4354 = vmatpush1.bf16.msra.mxu0 %v9792_v62  ;;  %v9893_v62 = vld [vmem:[%s10838_s17 + $0xe74] ss:$24 sps:$4 sm:$0xff]  }
 0x190   : > { %4655 = vmatpush1.bf16.msra.mxu1 %v9795_v63  ;;  %4355 = vmatprep.subr.bf16.mxu0 %v9800_v0  ;;  %v9896_v63 = vld [vmem:[%s10838_s17 + $0xe7c] ss:$24 sps:$4 sm:$0xff]   ;;  %v9891_v0 = vld [vmem:[%s10838_s17 + $0xe70] ss:$24 sps:$4 sm:$0xff]  }
 0x191   : > { %4656 = vmatprep.subr.bf16.mxu1 %v9803_v1  ;;  %v9894_v1 = vld [vmem:[%s10838_s17 + $0xe78] ss:$24 sps:$4 sm:$0xff]  }
 0x193   : > { %4356 = vmatpush1.bf16.msra.mxu0 %v9798_v2  ;;  %v9899_v2 = vld [vmem:[%s10838_s17 + $0xea4] ss:$24 sps:$4 sm:$0xff]  }
 0x194   : > { %4657 = vmatpush1.bf16.msra.mxu1 %v9801_v3  ;;  %4357 = vmatprep.subr.bf16.mxu0 %v9806_v4  ;;  %v9902_v3 = vld [vmem:[%s10838_s17 + $0xeac] ss:$24 sps:$4 sm:$0xff]   ;;  %v9897_v4 = vld [vmem:[%s10838_s17 + $0xea0] ss:$24 sps:$4 sm:$0xff]  }
 0x195   : > { %4658 = vmatprep.subr.bf16.mxu1 %v9809_v5  ;;  %v9900_v5 = vld [vmem:[%s10838_s17 + $0xea8] ss:$24 sps:$4 sm:$0xff]  }
 0x197   : > { %4358 = vmatpush1.bf16.msra.mxu0 %v9804_v6  ;;  %v9905_v6 = vld [vmem:[%s10838_s17 + $0xed4] ss:$24 sps:$4 sm:$0xff]  }
 0x198   : > { %4659 = vmatpush1.bf16.msra.mxu1 %v9807_v7  ;;  %4370 = vmatprep.subr.bf16.mxu0 %v9815_v8  ;;  %v9908_v7 = vld [vmem:[%s10838_s17 + $0xedc] ss:$24 sps:$4 sm:$0xff]   ;;  %v9903_v8 = vld [vmem:[%s10838_s17 + $0xed0] ss:$24 sps:$4 sm:$0xff]  }
 0x199   : > { %4671 = vmatprep.subr.bf16.mxu1 %v9818_v9  ;;  %v9906_v9 = vld [vmem:[%s10838_s17 + $0xed8] ss:$24 sps:$4 sm:$0xff]  }
 0x19a   : > { %4360 = vmatmul.mubr.bf16.vlgmr.msra.gmra.mrb[0].mxu0 %v9810_v10 }
 0x19b   : > { %4661 = vmatmul.mubr.bf16.vlgmr.msra.gmra.mrb[0].mxu1 %v9810_v10  ;;  %4371 = vmatpush1.bf16.msra.mxu0 %v9813_v11  ;;  %v9914_v10 = vld [vmem:[%s10838_s17 + $0xf04] ss:$24 sps:$4 sm:$0xff]  }
 0x19c   : > { %4672 = vmatpush1.bf16.msra.mxu1 %v9816_v12  ;;  %4372 = vmatprep.subr.bf16.mxu0 %v9821_v13  ;;  %v9917_v11 = vld [vmem:[%s10838_s17 + $0xf0c] ss:$24 sps:$4 sm:$0xff]   ;;  %v9909_v12 = vld [vmem:[%s12296_s0 + $0x20] ss:$52 sps:$4 sm:$0x1f]  }
 0x19d   : > { %4673 = vmatprep.subr.bf16.mxu1 %v9824_v14  ;;  %4402 = vmatprep.mubr.bf16.mxu0 %v9911_v15  ;;  %v9912_v13 = vld [vmem:[%s10838_s17 + $0xf00] ss:$24 sps:$4 sm:$0xff]  }
 0x19e   : > { %4703 = vmatprep.mubr.bf16.mxu1 %v9911_v15  ;;  %v9915_v14 = vld [vmem:[%s10838_s17 + $0xf08] ss:$24 sps:$4 sm:$0xff]   ;;  %v9920_v15 = vld [vmem:[%s10838_s17 + $0xf34] ss:$24 sps:$4 sm:$0xff]  }
 0x19f   : > { %4373 = vmatpush1.bf16.msra.mxu0 %v9819_v16  ;;  %v9923_v16 = vld [vmem:[%s10838_s17 + $0xf3c] ss:$24 sps:$4 sm:$0xff]  }
 0x1a0   : > { %4674 = vmatpush1.bf16.msra.mxu1 %v9822_v17  ;;  %4374 = vmatprep.subr.bf16.mxu0 %v9827_v18  ;;  %v10010_v17 = vld [vmem:[%s12296_s0 + $0x2c] ss:$52 sps:$4 sm:$0x1f]   ;;  %v9918_v18 = vld [vmem:[%s10838_s17 + $0xf30] ss:$24 sps:$4 sm:$0xff]  }
 0x1a1   : > { %4675 = vmatprep.subr.bf16.mxu1 %v9830_v19  ;;  %v9921_v19 = vld [vmem:[%s10838_s17 + $0xf38] ss:$24 sps:$4 sm:$0xff]  }
 0x1a3   : > { %4375 = vmatpush1.bf16.msra.mxu0 %v9825_v20  ;;  %v9926_v20 = vld [vmem:[%s10838_s17 + $0xf64] ss:$24 sps:$4 sm:$0xff]  }
 0x1a4   : > { %4676 = vmatpush1.bf16.msra.mxu1 %v9828_v21  ;;  %4376 = vmatprep.subr.bf16.mxu0 %v9833_v22  ;;  %v9929_v21 = vld [vmem:[%s10838_s17 + $0xf6c] ss:$24 sps:$4 sm:$0xff]   ;;  %v9924_v22 = vld [vmem:[%s10838_s17 + $0xf60] ss:$24 sps:$4 sm:$0xff]  }
 0x1a5   : > { %4677 = vmatprep.subr.bf16.mxu1 %v9836_v23  ;;  %v9927_v23 = vld [vmem:[%s10838_s17 + $0xf68] ss:$24 sps:$4 sm:$0xff]  }
 0x1a7   : > { %4377 = vmatpush1.bf16.msra.mxu0 %v9831_v24  ;;  %v9932_v24 = vld [vmem:[%s10838_s17 + $0xf94] ss:$24 sps:$4 sm:$0xff]  }
 0x1a8   : > { %4678 = vmatpush1.bf16.msra.mxu1 %v9834_v25  ;;  %4378 = vmatprep.subr.bf16.mxu0 %v9839_v26  ;;  %v9935_v25 = vld [vmem:[%s10838_s17 + $0xf9c] ss:$24 sps:$4 sm:$0xff]   ;;  %v9930_v26 = vld [vmem:[%s10838_s17 + $0xf90] ss:$24 sps:$4 sm:$0xff]  }
 0x1a9   : > { %4679 = vmatprep.subr.bf16.mxu1 %v9842_v27  ;;  %v9933_v27 = vld [vmem:[%s10838_s17 + $0xf98] ss:$24 sps:$4 sm:$0xff]  }
 0x1ab   : > { %4379 = vmatpush1.bf16.msra.mxu0 %v9837_v28  ;;  %v9938_v28 = vld [vmem:[%s10838_s17 + $0xfc4] ss:$24 sps:$4 sm:$0xff]  }
 0x1ac   : > { %4680 = vmatpush1.bf16.msra.mxu1 %v9840_v29  ;;  %4380 = vmatprep.subr.bf16.mxu0 %v9845_v30  ;;  %v9941_v29 = vld [vmem:[%s10838_s17 + $0xfcc] ss:$24 sps:$4 sm:$0xff]   ;;  %v9936_v30 = vld [vmem:[%s10838_s17 + $0xfc0] ss:$24 sps:$4 sm:$0xff]  }
 0x1ad   : > { %4681 = vmatprep.subr.bf16.mxu1 %v9848_v31  ;;  %v9939_v31 = vld [vmem:[%s10838_s17 + $0xfc8] ss:$24 sps:$4 sm:$0xff]  }
 0x1af   : > { %4381 = vmatpush1.bf16.msra.mxu0 %v9843_v32  ;;  %v9944_v32 = vld [vmem:[%s10838_s17 + $0xff4] ss:$24 sps:$4 sm:$0xff]  }
 0x1b0   : > { %4682 = vmatpush1.bf16.msra.mxu1 %v9846_v33  ;;  %4382 = vmatprep.subr.bf16.mxu0 %v9851_v34  ;;  %v9947_v33 = vld [vmem:[%s10838_s17 + $0xffc] ss:$24 sps:$4 sm:$0xff]   ;;  %v9942_v34 = vld [vmem:[%s10838_s17 + $0xff0] ss:$24 sps:$4 sm:$0xff]  }
 0x1b1   : > { %4683 = vmatprep.subr.bf16.mxu1 %v9854_v35  ;;  %v9945_v35 = vld [vmem:[%s10838_s17 + $0xff8] ss:$24 sps:$4 sm:$0xff]  }
 0x1b3   : > { %4383 = vmatpush1.bf16.msra.mxu0 %v9849_v36  ;;  %v9950_v36 = vld [vmem:[%s10838_s17 + $0x1024] ss:$24 sps:$4 sm:$0xff]  }
 0x1b4   : > { %4684 = vmatpush1.bf16.msra.mxu1 %v9852_v37  ;;  %4384 = vmatprep.subr.bf16.mxu0 %v9857_v38  ;;  %v9953_v37 = vld [vmem:[%s10838_s17 + $0x102c] ss:$24 sps:$4 sm:$0xff]   ;;  %v9948_v38 = vld [vmem:[%s10838_s17 + $0x1020] ss:$24 sps:$4 sm:$0xff]  }
 0x1b5   : > { %4685 = vmatprep.subr.bf16.mxu1 %v9860_v39  ;;  %v9951_v39 = vld [vmem:[%s10838_s17 + $0x1028] ss:$24 sps:$4 sm:$0xff]  }
 0x1b7   : > { %4385 = vmatpush1.bf16.msra.mxu0 %v9855_v40  ;;  %v9956_v40 = vld [vmem:[%s10838_s17 + $0x1054] ss:$24 sps:$4 sm:$0xff]  }
 0x1b8   : > { %4686 = vmatpush1.bf16.msra.mxu1 %v9858_v41  ;;  %4386 = vmatprep.subr.bf16.mxu0 %v9863_v42  ;;  %v9959_v41 = vld [vmem:[%s10838_s17 + $0x105c] ss:$24 sps:$4 sm:$0xff]   ;;  %v9954_v42 = vld [vmem:[%s10838_s17 + $0x1050] ss:$24 sps:$4 sm:$0xff]  }
 0x1b9   : > { %4687 = vmatprep.subr.bf16.mxu1 %v9866_v43  ;;  %v9957_v43 = vld [vmem:[%s10838_s17 + $0x1058] ss:$24 sps:$4 sm:$0xff]  }
 0x1bb   : > { %4387 = vmatpush1.bf16.msra.mxu0 %v9861_v44  ;;  %v9962_v44 = vld [vmem:[%s10838_s17 + $0x1084] ss:$24 sps:$4 sm:$0xff]  }
 0x1bc   : > { %4688 = vmatpush1.bf16.msra.mxu1 %v9864_v45  ;;  %4388 = vmatprep.subr.bf16.mxu0 %v9869_v46  ;;  %v9965_v45 = vld [vmem:[%s10838_s17 + $0x108c] ss:$24 sps:$4 sm:$0xff]   ;;  %v9960_v46 = vld [vmem:[%s10838_s17 + $0x1080] ss:$24 sps:$4 sm:$0xff]  }
 0x1bd   : > { %4689 = vmatprep.subr.bf16.mxu1 %v9872_v47  ;;  %v9963_v47 = vld [vmem:[%s10838_s17 + $0x1088] ss:$24 sps:$4 sm:$0xff]  }
 0x1bf   : > { %4389 = vmatpush1.bf16.msra.mxu0 %v9867_v48  ;;  %v9968_v48 = vld [vmem:[%s10838_s17 + $0x10b4] ss:$24 sps:$4 sm:$0xff]  }
 0x1c0   : > { %4690 = vmatpush1.bf16.msra.mxu1 %v9870_v49  ;;  %4390 = vmatprep.subr.bf16.mxu0 %v9875_v50  ;;  %v9971_v49 = vld [vmem:[%s10838_s17 + $0x10bc] ss:$24 sps:$4 sm:$0xff]   ;;  %v9966_v50 = vld [vmem:[%s10838_s17 + $0x10b0] ss:$24 sps:$4 sm:$0xff]  }
 0x1c1   : > { %4691 = vmatprep.subr.bf16.mxu1 %v9878_v51  ;;  %v9969_v51 = vld [vmem:[%s10838_s17 + $0x10b8] ss:$24 sps:$4 sm:$0xff]  }
 0x1c3   : > { %4391 = vmatpush1.bf16.msra.mxu0 %v9873_v52  ;;  %v9974_v52 = vld [vmem:[%s10838_s17 + $0x10e4] ss:$24 sps:$4 sm:$0xff]  }
 0x1c4   : > { %4692 = vmatpush1.bf16.msra.mxu1 %v9876_v53  ;;  %4392 = vmatprep.subr.bf16.mxu0 %v9881_v54  ;;  %v9977_v53 = vld [vmem:[%s10838_s17 + $0x10ec] ss:$24 sps:$4 sm:$0xff]   ;;  %v9972_v54 = vld [vmem:[%s10838_s17 + $0x10e0] ss:$24 sps:$4 sm:$0xff]  }
 0x1c5   : > { %4693 = vmatprep.subr.bf16.mxu1 %v9884_v55  ;;  %v9975_v55 = vld [vmem:[%s10838_s17 + $0x10e8] ss:$24 sps:$4 sm:$0xff]  }
 0x1c7   : > { %4393 = vmatpush1.bf16.msra.mxu0 %v9879_v56  ;;  %v9980_v56 = vld [vmem:[%s10838_s17 + $0x1114] ss:$24 sps:$4 sm:$0xff]  }
 0x1c8   : > { %4694 = vmatpush1.bf16.msra.mxu1 %v9882_v57  ;;  %4394 = vmatprep.subr.bf16.mxu0 %v9887_v58  ;;  %v9983_v57 = vld [vmem:[%s10838_s17 + $0x111c] ss:$24 sps:$4 sm:$0xff]   ;;  %v9978_v58 = vld [vmem:[%s10838_s17 + $0x1110] ss:$24 sps:$4 sm:$0xff]  }
 0x1c9   : > { %4695 = vmatprep.subr.bf16.mxu1 %v9890_v59  ;;  %v9981_v59 = vld [vmem:[%s10838_s17 + $0x1118] ss:$24 sps:$4 sm:$0xff]  }
 0x1cb   : > { %4395 = vmatpush1.bf16.msra.mxu0 %v9885_v60  ;;  %v9986_v60 = vld [vmem:[%s10838_s17 + $0x1144] ss:$24 sps:$4 sm:$0xff]  }
 0x1cc   : > { %4696 = vmatpush1.bf16.msra.mxu1 %v9888_v61  ;;  %4396 = vmatprep.subr.bf16.mxu0 %v9893_v62  ;;  %v9989_v61 = vld [vmem:[%s10838_s17 + $0x114c] ss:$24 sps:$4 sm:$0xff]   ;;  %v9984_v62 = vld [vmem:[%s10838_s17 + $0x1140] ss:$24 sps:$4 sm:$0xff]  }
 0x1cd   : > { %4697 = vmatprep.subr.bf16.mxu1 %v9896_v63  ;;  %v9987_v63 = vld [vmem:[%s10838_s17 + $0x1148] ss:$24 sps:$4 sm:$0xff]  }
 0x1cf   : > { %4397 = vmatpush1.bf16.msra.mxu0 %v9891_v0  ;;  %v9992_v0 = vld [vmem:[%s10838_s17 + $0x1174] ss:$24 sps:$4 sm:$0xff]  }
 0x1d0   : > { %4698 = vmatpush1.bf16.msra.mxu1 %v9894_v1  ;;  %4398 = vmatprep.subr.bf16.mxu0 %v9899_v2  ;;  %v9995_v1 = vld [vmem:[%s10838_s17 + $0x117c] ss:$24 sps:$4 sm:$0xff]   ;;  %v9990_v2 = vld [vmem:[%s10838_s17 + $0x1170] ss:$24 sps:$4 sm:$0xff]  }
 0x1d1   : > { %4699 = vmatprep.subr.bf16.mxu1 %v9902_v3  ;;  %v9993_v3 = vld [vmem:[%s10838_s17 + $0x1178] ss:$24 sps:$4 sm:$0xff]  }
 0x1d3   : > { %4399 = vmatpush1.bf16.msra.mxu0 %v9897_v4  ;;  %v9998_v4 = vld [vmem:[%s10838_s17 + $0x11a4] ss:$24 sps:$4 sm:$0xff]  }
 0x1d4   : > { %4700 = vmatpush1.bf16.msra.mxu1 %v9900_v5  ;;  %4400 = vmatprep.subr.bf16.mxu0 %v9905_v6  ;;  %v10001_v5 = vld [vmem:[%s10838_s17 + $0x11ac] ss:$24 sps:$4 sm:$0xff]   ;;  %v9996_v6 = vld [vmem:[%s10838_s17 + $0x11a0] ss:$24 sps:$4 sm:$0xff]  }
 0x1d5   : > { %4701 = vmatprep.subr.bf16.mxu1 %v9908_v7  ;;  %v9999_v7 = vld [vmem:[%s10838_s17 + $0x11a8] ss:$24 sps:$4 sm:$0xff]  }
 0x1d7   : > { %4401 = vmatpush1.bf16.msra.mxu0 %v9903_v8  ;;  %v10004_v8 = vld [vmem:[%s10838_s17 + $0x11d4] ss:$24 sps:$4 sm:$0xff]  }
 0x1d8   : > { %4702 = vmatpush1.bf16.msra.mxu1 %v9906_v9  ;;  %4413 = vmatprep.subr.bf16.mxu0 %v9914_v10  ;;  %v10007_v9 = vld [vmem:[%s10838_s17 + $0x11dc] ss:$24 sps:$4 sm:$0xff]   ;;  %v10002_v10 = vld [vmem:[%s10838_s17 + $0x11d0] ss:$24 sps:$4 sm:$0xff]  }
 0x1d9   : > { %4714 = vmatprep.subr.bf16.mxu1 %v9917_v11  ;;  %v10005_v11 = vld [vmem:[%s10838_s17 + $0x11d8] ss:$24 sps:$4 sm:$0xff]  }
 0x1da   : > { %4403 = vmatmul.mubr.bf16.vlgmr.msra.gmra.mrb[0].mxu0 %v9909_v12 }
 0x1db   : > { %4704 = vmatmul.mubr.bf16.vlgmr.msra.gmra.mrb[0].mxu1 %v9909_v12  ;;  %4414 = vmatpush1.bf16.msra.mxu0 %v9912_v13  ;;  %v10013_v12 = vld [vmem:[%s10838_s17 + $0x1204] ss:$24 sps:$4 sm:$0xff]  }
 0x1dc   : > { %4715 = vmatpush1.bf16.msra.mxu1 %v9915_v14  ;;  %4415 = vmatprep.subr.bf16.mxu0 %v9920_v15  ;;  %v10016_v13 = vld [vmem:[%s10838_s17 + $0x120c] ss:$24 sps:$4 sm:$0xff]   ;;  %v10008_v14 = vld [vmem:[%s12296_s0 + $0x28] ss:$52 sps:$4 sm:$0x1f]  }
 0x1dd   : > { %4716 = vmatprep.subr.bf16.mxu1 %v9923_v16  ;;  %4445 = vmatprep.mubr.bf16.mxu0 %v10010_v17  ;;  %v10011_v15 = vld [vmem:[%s10838_s17 + $0x1200] ss:$24 sps:$4 sm:$0xff]  }
 0x1de   : > { %4746 = vmatprep.mubr.bf16.mxu1 %v10010_v17  ;;  %v10014_v16 = vld [vmem:[%s10838_s17 + $0x1208] ss:$24 sps:$4 sm:$0xff]   ;;  %v10019_v17 = vld [vmem:[%s10838_s17 + $0x1234] ss:$24 sps:$4 sm:$0xff]  }
 0x1df   : > { %4416 = vmatpush1.bf16.msra.mxu0 %v9918_v18  ;;  %v10022_v18 = vld [vmem:[%s10838_s17 + $0x123c] ss:$24 sps:$4 sm:$0xff]  }
 0x1e0   : > { %4717 = vmatpush1.bf16.msra.mxu1 %v9921_v19  ;;  %4417 = vmatprep.subr.bf16.mxu0 %v9926_v20  ;;  %v10017_v19 = vld [vmem:[%s10838_s17 + $0x1230] ss:$24 sps:$4 sm:$0xff]  }
 0x1e1   : > { %4718 = vmatprep.subr.bf16.mxu1 %v9929_v21  ;;  %v10020_v20 = vld [vmem:[%s10838_s17 + $0x1238] ss:$24 sps:$4 sm:$0xff]   ;;  %v10025_v21 = vld [vmem:[%s10838_s17 + $0x1264] ss:$24 sps:$4 sm:$0xff]  }
 0x1e3   : > { %4418 = vmatpush1.bf16.msra.mxu0 %v9924_v22  ;;  %v10028_v22 = vld [vmem:[%s10838_s17 + $0x126c] ss:$24 sps:$4 sm:$0xff]  }
 0x1e4   : > { %4719 = vmatpush1.bf16.msra.mxu1 %v9927_v23  ;;  %4419 = vmatprep.subr.bf16.mxu0 %v9932_v24  ;;  %v10613_v23 = vmov 0   ;;  %v10023_v24 = vld [vmem:[%s10838_s17 + $0x1260] ss:$24 sps:$4 sm:$0xff]  }
 0x1e5   : > { %4720 = vmatprep.subr.bf16.mxu1 %v9935_v25  ;;  %v10026_v25 = vld [vmem:[%s10838_s17 + $0x1268] ss:$24 sps:$4 sm:$0xff]  }
 0x1e7   : > { %4420 = vmatpush1.bf16.msra.mxu0 %v9930_v26  ;;  %v10031_v26 = vld [vmem:[%s10838_s17 + $0x1294] ss:$24 sps:$4 sm:$0xff]  }
 0x1e8   : > { %4721 = vmatpush1.bf16.msra.mxu1 %v9933_v27  ;;  %4421 = vmatprep.subr.bf16.mxu0 %v9938_v28  ;;  %v10034_v27 = vld [vmem:[%s10838_s17 + $0x129c] ss:$24 sps:$4 sm:$0xff]   ;;  %v10029_v28 = vld [vmem:[%s10838_s17 + $0x1290] ss:$24 sps:$4 sm:$0xff]  }
 0x1e9   : > { %4722 = vmatprep.subr.bf16.mxu1 %v9941_v29  ;;  %v10032_v29 = vld [vmem:[%s10838_s17 + $0x1298] ss:$24 sps:$4 sm:$0xff]  }
 0x1eb   : > { %4422 = vmatpush1.bf16.msra.mxu0 %v9936_v30  ;;  %v10037_v30 = vld [vmem:[%s10838_s17 + $0x12c4] ss:$24 sps:$4 sm:$0xff]  }
 0x1ec   : > { %4723 = vmatpush1.bf16.msra.mxu1 %v9939_v31  ;;  %4423 = vmatprep.subr.bf16.mxu0 %v9944_v32  ;;  %v10040_v31 = vld [vmem:[%s10838_s17 + $0x12cc] ss:$24 sps:$4 sm:$0xff]   ;;  %v10035_v32 = vld [vmem:[%s10838_s17 + $0x12c0] ss:$24 sps:$4 sm:$0xff]  }
 0x1ed   : > { %4724 = vmatprep.subr.bf16.mxu1 %v9947_v33  ;;  %v10038_v33 = vld [vmem:[%s10838_s17 + $0x12c8] ss:$24 sps:$4 sm:$0xff]  }
 0x1ef   : > { %4424 = vmatpush1.bf16.msra.mxu0 %v9942_v34  ;;  %v10043_v34 = vld [vmem:[%s10838_s17 + $0x12f4] ss:$24 sps:$4 sm:$0xff]  }
 0x1f0   : > { %4725 = vmatpush1.bf16.msra.mxu1 %v9945_v35  ;;  %4425 = vmatprep.subr.bf16.mxu0 %v9950_v36  ;;  %v10046_v35 = vld [vmem:[%s10838_s17 + $0x12fc] ss:$24 sps:$4 sm:$0xff]   ;;  %v10041_v36 = vld [vmem:[%s10838_s17 + $0x12f0] ss:$24 sps:$4 sm:$0xff]  }
 0x1f1   : > { %4726 = vmatprep.subr.bf16.mxu1 %v9953_v37  ;;  %v10044_v37 = vld [vmem:[%s10838_s17 + $0x12f8] ss:$24 sps:$4 sm:$0xff]  }
 0x1f3   : > { %4426 = vmatpush1.bf16.msra.mxu0 %v9948_v38  ;;  %v10049_v38 = vld [vmem:[%s10838_s17 + $0x1324] ss:$24 sps:$4 sm:$0xff]  }
 0x1f4   : > { %4727 = vmatpush1.bf16.msra.mxu1 %v9951_v39  ;;  %4427 = vmatprep.subr.bf16.mxu0 %v9956_v40  ;;  %v10052_v39 = vld [vmem:[%s10838_s17 + $0x132c] ss:$24 sps:$4 sm:$0xff]   ;;  %v10047_v40 = vld [vmem:[%s10838_s17 + $0x1320] ss:$24 sps:$4 sm:$0xff]  }
 0x1f5   : > { %4728 = vmatprep.subr.bf16.mxu1 %v9959_v41  ;;  %v10050_v41 = vld [vmem:[%s10838_s17 + $0x1328] ss:$24 sps:$4 sm:$0xff]  }
 0x1f7   : > { %4428 = vmatpush1.bf16.msra.mxu0 %v9954_v42  ;;  %v10055_v42 = vld [vmem:[%s10838_s17 + $0x1354] ss:$24 sps:$4 sm:$0xff]  }
 0x1f8   : > { %4729 = vmatpush1.bf16.msra.mxu1 %v9957_v43  ;;  %4429 = vmatprep.subr.bf16.mxu0 %v9962_v44  ;;  %v10058_v43 = vld [vmem:[%s10838_s17 + $0x135c] ss:$24 sps:$4 sm:$0xff]   ;;  %v10053_v44 = vld [vmem:[%s10838_s17 + $0x1350] ss:$24 sps:$4 sm:$0xff]  }
 0x1f9   : > { %4730 = vmatprep.subr.bf16.mxu1 %v9965_v45  ;;  %v10056_v45 = vld [vmem:[%s10838_s17 + $0x1358] ss:$24 sps:$4 sm:$0xff]  }
 0x1fb   : > { %4430 = vmatpush1.bf16.msra.mxu0 %v9960_v46  ;;  %v10062_v46 = vld [vmem:[%s10838_s17 + $0x14] ss:$24 sps:$4 sm:$0xff]  }
 0x1fc   : > { %4731 = vmatpush1.bf16.msra.mxu1 %v9963_v47  ;;  %4431 = vmatprep.subr.bf16.mxu0 %v9968_v48  ;;  %v10059_v47 = vld [vmem:[%s12296_s0 + $0x30] ss:$52 sps:$4 sm:$0x1f]  }
 0x1fd   : > { %4732 = vmatprep.subr.bf16.mxu1 %v9971_v49  ;;  %v10060_v48 = vld [vmem:[%s10838_s17 + $0x10] ss:$24 sps:$4 sm:$0xff]   ;;  %v10065_v49 = vld [vmem:[%s10838_s17 + $0x44] ss:$24 sps:$4 sm:$0xff]  }
 0x1ff   : > { %4432 = vmatpush1.bf16.msra.mxu0 %v9966_v50  ;;  %v10063_v50 = vld [vmem:[%s10838_s17 + $0x40] ss:$24 sps:$4 sm:$0xff]  }
 0x200   : > { %4733 = vmatpush1.bf16.msra.mxu1 %v9969_v51  ;;  %4433 = vmatprep.subr.bf16.mxu0 %v9974_v52  ;;  %v10396_v51 = vld [vmem:[%s12296_s0 + $0x4] ss:$52 sps:$4 sm:$0x1f]   ;;  %v10068_v52 = vld [vmem:[%s10838_s17 + $0x74] ss:$24 sps:$4 sm:$0xff]  }
 0x201   : > { %4734 = vmatprep.subr.bf16.mxu1 %v9977_v53  ;;  %v10066_v53 = vld [vmem:[%s10838_s17 + $0x70] ss:$24 sps:$4 sm:$0xff]  }
 0x203   : > { %4434 = vmatpush1.bf16.msra.mxu0 %v9972_v54  ;;  %v10071_v54 = vld [vmem:[%s10838_s17 + $0xa4] ss:$24 sps:$4 sm:$0xff]  }
 0x204   : > { %4735 = vmatpush1.bf16.msra.mxu1 %v9975_v55  ;;  %4435 = vmatprep.subr.bf16.mxu0 %v9980_v56  ;;  %v10069_v55 = vld [vmem:[%s10838_s17 + $0xa0] ss:$24 sps:$4 sm:$0xff]   ;;  %v10074_v56 = vld [vmem:[%s10838_s17 + $0xd4] ss:$24 sps:$4 sm:$0xff]  }
 0x205   : > { %4736 = vmatprep.subr.bf16.mxu1 %v9983_v57  ;;  %v10072_v57 = vld [vmem:[%s10838_s17 + $0xd0] ss:$24 sps:$4 sm:$0xff]  }
 0x207   : > { %4436 = vmatpush1.bf16.msra.mxu0 %v9978_v58  ;;  %v10077_v58 = vld [vmem:[%s10838_s17 + $0x104] ss:$24 sps:$4 sm:$0xff]  }
 0x208   : > { %4737 = vmatpush1.bf16.msra.mxu1 %v9981_v59  ;;  %4437 = vmatprep.subr.bf16.mxu0 %v9986_v60  ;;  %v10075_v59 = vld [vmem:[%s10838_s17 + $0x100] ss:$24 sps:$4 sm:$0xff]   ;;  %v10080_v60 = vld [vmem:[%s10838_s17 + $0x134] ss:$24 sps:$4 sm:$0xff]  }
 0x209   : > { %4738 = vmatprep.subr.bf16.mxu1 %v9989_v61  ;;  %v10078_v61 = vld [vmem:[%s10838_s17 + $0x130] ss:$24 sps:$4 sm:$0xff]  }
 0x20b   : > { %4438 = vmatpush1.bf16.msra.mxu0 %v9984_v62  ;;  %v10083_v62 = vld [vmem:[%s10838_s17 + $0x164] ss:$24 sps:$4 sm:$0xff]  }
 0x20c   : > { %4739 = vmatpush1.bf16.msra.mxu1 %v9987_v63  ;;  %4439 = vmatprep.subr.bf16.mxu0 %v9992_v0  ;;  %v10081_v63 = vld [vmem:[%s10838_s17 + $0x160] ss:$24 sps:$4 sm:$0xff]   ;;  %v10086_v0 = vld [vmem:[%s10838_s17 + $0x194] ss:$24 sps:$4 sm:$0xff]  }
 0x20d   : > { %4740 = vmatprep.subr.bf16.mxu1 %v9995_v1  ;;  %v10084_v1 = vld [vmem:[%s10838_s17 + $0x190] ss:$24 sps:$4 sm:$0xff]  }
 0x20f   : > { %4440 = vmatpush1.bf16.msra.mxu0 %v9990_v2  ;;  %v10089_v2 = vld [vmem:[%s10838_s17 + $0x1c4] ss:$24 sps:$4 sm:$0xff]  }
 0x210   : > { %4741 = vmatpush1.bf16.msra.mxu1 %v9993_v3  ;;  %4441 = vmatprep.subr.bf16.mxu0 %v9998_v4  ;;  %v10087_v3 = vld [vmem:[%s10838_s17 + $0x1c0] ss:$24 sps:$4 sm:$0xff]   ;;  %v10092_v4 = vld [vmem:[%s10838_s17 + $0x1f4] ss:$24 sps:$4 sm:$0xff]  }
 0x211   : > { %4742 = vmatprep.subr.bf16.mxu1 %v10001_v5  ;;  %v5135_v5 = vld [vmem:[%s10851_s18] sm:$0xff] }
 0x213   : > { %4442 = vmatpush1.bf16.msra.mxu0 %v9996_v6  ;;  %v5139_v6 = vld [vmem:[%s10851_s18 + $0x20] sm:$0xff] }
 0x214   : > { %4743 = vmatpush1.bf16.msra.mxu1 %v9999_v7  ;;  %4443 = vmatprep.subr.bf16.mxu0 %v10004_v8  ;;  %v8838_v7 = vcombine.high %v5135_v5, %v5139_v6  ;;  %v10090_v8 = vld [vmem:[%s10838_s17 + $0x1f0] ss:$24 sps:$4 sm:$0xff]  }
 0x215   : > { %4744 = vmatprep.subr.bf16.mxu1 %v10007_v9  ;;  %v8837_v9 = vcombine.low %v5135_v5, %v5139_v6  ;;  %v5219_v5 = vld [vmem:[%s10851_s18 + $0x2a0] sm:$0xff] }
 0x217   : > { %4444 = vmatpush1.bf16.msra.mxu0 %v10002_v10  ;;  %v10095_v10 = vld [vmem:[%s10838_s17 + $0x224] ss:$24 sps:$4 sm:$0xff]  }
 0x218   : > { %4745 = vmatpush1.bf16.msra.mxu1 %v10005_v11  ;;  %4456 = vmatprep.subr.bf16.mxu0 %v10013_v12  ;;  %v5143_v11 = vld [vmem:[%s10851_s18 + $0x40] sm:$0xff] }
 0x219   : > { %4757 = vmatprep.subr.bf16.mxu1 %v10016_v13  ;;  %v5147_v12 = vld [vmem:[%s10851_s18 + $0x60] sm:$0xff] }
 0x21a   : > { %4446 = vmatmul.mubr.bf16.vlgmr.msra.gmra.mrb[0].mxu0 %v10008_v14  ;;  %v8846_v13 = vcombine.high %v5143_v11, %v5147_v12 }
 0x21b   : > { %4747 = vmatmul.mubr.bf16.vlgmr.msra.gmra.mrb[0].mxu1 %v10008_v14  ;;  %4457 = vmatpush1.bf16.msra.mxu0 %v10011_v15  ;;  %v10093_v14 = vld [vmem:[%s10838_s17 + $0x220] ss:$24 sps:$4 sm:$0xff]   ;;  %v8845_v15 = vcombine.low %v5143_v11, %v5147_v12  ;;  %v5227_v11 = vld [vmem:[%s10851_s18 + $0x2e0] sm:$0xff] }
 0x21c   : > { %4758 = vmatpush1.bf16.msra.mxu1 %v10014_v16  ;;  %4458 = vmatprep.subr.bf16.mxu0 %v10019_v17  ;;  %v10098_v16 = vld [vmem:[%s10838_s17 + $0x254] ss:$24 sps:$4 sm:$0xff]  }
 0x21d   : > { %4759 = vmatprep.subr.bf16.mxu1 %v10022_v18  ;;  %4488 = vmatprep.mubr.bf16.mxu0 %v10613_v23  ;;  %v5151_v17 = vld [vmem:[%s10851_s18 + $0x80] sm:$0xff] }
 0x21e   : > { %4789 = vmatprep.mubr.bf16.mxu1 %v10613_v23  ;;  %v5155_v18 = vld [vmem:[%s10851_s18 + $0xa0] sm:$0xff] }
 0x21f   : > { %4459 = vmatpush1.bf16.msra.mxu0 %v10017_v19  ;;  %v8854_v19 = vcombine.high %v5151_v17, %v5155_v18 }
 0x220   : > { %4760 = vmatpush1.bf16.msra.mxu1 %v10020_v20  ;;  %4460 = vmatprep.subr.bf16.mxu0 %v10025_v21  ;;  %v10096_v20 = vld [vmem:[%s10838_s17 + $0x250] ss:$24 sps:$4 sm:$0xff]   ;;  %v8853_v21 = vcombine.low %v5151_v17, %v5155_v18  ;;  %v10131_v17 = vld [vmem:[%s10838_s17 + $0x464] ss:$24 sps:$4 sm:$0xff]  }
 0x221   : > { %4761 = vmatprep.subr.bf16.mxu1 %v10028_v22  ;;  %v10101_v22 = vld [vmem:[%s10838_s17 + $0x284] ss:$24 sps:$4 sm:$0xff]   ;;  %v5231_v18 = vld [vmem:[%s10851_s18 + $0x300] sm:$0xff] }
 0x223   : > { %4461 = vmatpush1.bf16.msra.mxu0 %v10023_v24  ;;  %v5159_v24 = vld [vmem:[%s10851_s18 + $0xc0] sm:$0xff] }
 0x224   : > { %4762 = vmatpush1.bf16.msra.mxu1 %v10026_v25  ;;  %4462 = vmatprep.subr.bf16.mxu0 %v10031_v26  ;;  %v5163_v25 = vld [vmem:[%s10851_s18 + $0xe0] sm:$0xff] }
 0x225   : > { %4763 = vmatprep.subr.bf16.mxu1 %v10034_v27  ;;  %v8862_v26 = vcombine.high %v5159_v24, %v5163_v25  ;;  %v10099_v27 = vld [vmem:[%s10838_s17 + $0x280] ss:$24 sps:$4 sm:$0xff]  }
 0x227   : > { %4463 = vmatpush1.bf16.msra.mxu0 %v10029_v28  ;;  %v8861_v28 = vcombine.low %v5159_v24, %v5163_v25  ;;  %v10134_v24 = vld [vmem:[%s10838_s17 + $0x494] ss:$24 sps:$4 sm:$0xff]  }
 0x228   : > { %4764 = vmatpush1.bf16.msra.mxu1 %v10032_v29  ;;  %4464 = vmatprep.subr.bf16.mxu0 %v10037_v30  ;;  %v10104_v29 = vld [vmem:[%s10838_s17 + $0x2b4] ss:$24 sps:$4 sm:$0xff]  }
 0x229   : > { %4765 = vmatprep.subr.bf16.mxu1 %v10040_v31  ;;  %v5167_v30 = vld [vmem:[%s10851_s18 + $0x100] sm:$0xff] }
 0x22a   : > { %v5171_v31 = vld [vmem:[%s10851_s18 + $0x120] sm:$0xff] }
 0x22b   : > { %4465 = vmatpush1.bf16.msra.mxu0 %v10035_v32  ;;  %v8870_v32 = vcombine.high %v5167_v30, %v5171_v31  ;;  %v5239_v25 = vld [vmem:[%s10851_s18 + $0x340] sm:$0xff] }
 0x22c   : > { %4766 = vmatpush1.bf16.msra.mxu1 %v10038_v33  ;;  %4466 = vmatprep.subr.bf16.mxu0 %v10043_v34  ;;  %v10102_v33 = vld [vmem:[%s10838_s17 + $0x2b0] ss:$24 sps:$4 sm:$0xff]   ;;  %v8869_v34 = vcombine.low %v5167_v30, %v5171_v31  ;;  %v10137_v31 = vld [vmem:[%s10838_s17 + $0x4c4] ss:$24 sps:$4 sm:$0xff]  }
 0x22d   : > { %4767 = vmatprep.subr.bf16.mxu1 %v10046_v35  ;;  %v10107_v35 = vld [vmem:[%s10838_s17 + $0x2e4] ss:$24 sps:$4 sm:$0xff]   ;;  %v5247_v30 = vld [vmem:[%s10851_s18 + $0x380] sm:$0xff] }
 0x22f   : > { %4467 = vmatpush1.bf16.msra.mxu0 %v10041_v36  ;;  %v5175_v36 = vld [vmem:[%s10851_s18 + $0x140] sm:$0xff] }
 0x230   : > { %4768 = vmatpush1.bf16.msra.mxu1 %v10044_v37  ;;  %4468 = vmatprep.subr.bf16.mxu0 %v10049_v38  ;;  %v5179_v37 = vld [vmem:[%s10851_s18 + $0x160] sm:$0xff] }
 0x231   : > { %4769 = vmatprep.subr.bf16.mxu1 %v10052_v39  ;;  %v8878_v38 = vcombine.high %v5175_v36, %v5179_v37  ;;  %v10105_v39 = vld [vmem:[%s10838_s17 + $0x2e0] ss:$24 sps:$4 sm:$0xff]  }
 0x233   : > { %4469 = vmatpush1.bf16.msra.mxu0 %v10047_v40  ;;  %v8877_v40 = vcombine.low %v5175_v36, %v5179_v37  ;;  %v5255_v36 = vld [vmem:[%s10851_s18 + $0x3c0] sm:$0xff] }
 0x234   : > { %4770 = vmatpush1.bf16.msra.mxu1 %v10050_v41  ;;  %4470 = vmatprep.subr.bf16.mxu0 %v10055_v42  ;;  %v10110_v41 = vld [vmem:[%s10838_s17 + $0x314] ss:$24 sps:$4 sm:$0xff]  }
 0x235   : > { %4771 = vmatprep.subr.bf16.mxu1 %v10058_v43  ;;  %v5183_v42 = vld [vmem:[%s10851_s18 + $0x180] sm:$0xff] }
 0x236   : > { %v5187_v43 = vld [vmem:[%s10851_s18 + $0x1a0] sm:$0xff] }
 0x237   : > { %4471 = vmatpush1.bf16.msra.mxu0 %v10053_v44  ;;  %v8886_v44 = vcombine.high %v5183_v42, %v5187_v43  ;;  %v5259_v37 = vld [vmem:[%s10851_s18 + $0x3e0] sm:$0xff] }
 0x238   : > { %4772 = vmatpush1.bf16.msra.mxu1 %v10056_v45  ;;  %4800 = vmatprep.subr.bf16.mxu0 %v10062_v46  ;;  %v10108_v45 = vld [vmem:[%s10838_s17 + $0x310] ss:$24 sps:$4 sm:$0xff]   ;;  %v8885_v46 = vcombine.low %v5183_v42, %v5187_v43  ;;  %v10143_v42 = vld [vmem:[%s10838_s17 + $0x524] ss:$24 sps:$4 sm:$0xff]  }
 0x239   : > { %7439 = vmatprep.subr.bf16.mxu1 %v8838_v7  ;;  %v10120_v7 = vld [vmem:[%s10838_s17 + $0x3d0] ss:$24 sps:$4 sm:$0xff]  }
 0x23a   : > { %4489 = vmatmul.mubr.bf16.vlgmr.msra.gmra.mrb[0].mxu0 %v10059_v47  ;;  %v11461_v43 = vld [vmem:[%s10851_s18 + $0x400] sm:$0xff] }
 0x23b   : > { %4790 = vmatmul.mubr.bf16.vlgmr.msra.gmra.mrb[0].mxu1 %v10059_v47  ;;  %4801 = vmatpush1.bf16.msra.mxu0 %v10060_v48  ;;  %v10113_v47 = vld [vmem:[%s10838_s17 + $0x344] ss:$24 sps:$4 sm:$0xff]   ;;  %v5191_v48 = vld [vmem:[%s10851_s18 + $0x1c0] sm:$0xff] }
 0x23c   : > { %4832 = vmatprep.mubr.bf16.mxu0 %v10396_v51  ;;  %4802 = vmatprep.subr.bf16.mxu0 %v10065_v49  ;;  %v5195_v49 = vld [vmem:[%s10851_s18 + $0x1e0] sm:$0xff] }
 0x23d   : > { %7440 = vmatpush1.bf16.msra.mxu1 %v8837_v9  ;;  %v8894_v51 = vcombine.high %v5191_v48, %v5195_v49  ;;  %v10125_v9 = vld [vmem:[%s10838_s17 + $0x404] ss:$24 sps:$4 sm:$0xff]  }
 0x23e   : > { %7441 = vmatprep.subr.bf16.mxu1 %v8846_v13  ;;  %v10123_v13 = vld [vmem:[%s10838_s17 + $0x400] ss:$24 sps:$4 sm:$0xff]  }
 0x23f   : > { %4803 = vmatpush1.bf16.msra.mxu0 %v10063_v50  ;;  %v10397_v50 = vld [vmem:[%s12296_s0] ss:$52 sps:$4 sm:$0x1f]  }
 0x240   : > { %4804 = vmatprep.subr.bf16.mxu0 %v10068_v52  ;;  %v10111_v52 = vld [vmem:[%s10838_s17 + $0x340] ss:$24 sps:$4 sm:$0xff]  }
 0x241   : > { %7442 = vmatpush1.bf16.msra.mxu1 %v8845_v15  ;;  %v10128_v15 = vld [vmem:[%s10838_s17 + $0x434] ss:$24 sps:$4 sm:$0xff]  }
 0x242   : > { %7443 = vmatprep.subr.bf16.mxu1 %v8854_v19  ;;  %v5235_v19 = vld [vmem:[%s10851_s18 + $0x320] sm:$0xff] }
 0x243   : > { %4805 = vmatpush1.bf16.msra.mxu0 %v10066_v53  ;;  %v10398_v53 = vld [vmem:[%s12296_s0 + $0xc] ss:$52 sps:$4 sm:$0x1f]  }
 0x244   : > { %4806 = vmatprep.subr.bf16.mxu0 %v10071_v54  ;;  %v8893_v54 = vcombine.low %v5191_v48, %v5195_v49  ;;  %v10146_v48 = vld [vmem:[%s10838_s17 + $0x554] ss:$24 sps:$4 sm:$0xff]   ;;  %v10144_v49 = vld [vmem:[%s10838_s17 + $0x550] ss:$24 sps:$4 sm:$0xff]  }
 0x245   : > { %7444 = vmatpush1.bf16.msra.mxu1 %v8853_v21  ;;  %v10129_v21 = vld [vmem:[%s10838_s17 + $0x460] ss:$24 sps:$4 sm:$0xff]  }
 0x246   : > { %7445 = vmatprep.subr.bf16.mxu1 %v8862_v26  ;;  %v5243_v26 = vld [vmem:[%s10851_s18 + $0x360] sm:$0xff] }
 0x247   : > { %4807 = vmatpush1.bf16.msra.mxu0 %v10069_v55  ;;  %v10116_v55 = vld [vmem:[%s10838_s17 + $0x374] ss:$24 sps:$4 sm:$0xff]  }
 0x248   : > { %4808 = vmatprep.subr.bf16.mxu0 %v10074_v56  ;;  %v5199_v56 = vld [vmem:[%s10851_s18 + $0x200] sm:$0xff] }
 0x249   : > { %7446 = vmatpush1.bf16.msra.mxu1 %v8861_v28  ;;  %v10132_v28 = vld [vmem:[%s10838_s17 + $0x490] ss:$24 sps:$4 sm:$0xff]  }
 0x24a   : > { %7447 = vmatprep.subr.bf16.mxu1 %v8870_v32  ;;  %v5251_v32 = vld [vmem:[%s10851_s18 + $0x3a0] sm:$0xff] }
 0x24b   : > { %4809 = vmatpush1.bf16.msra.mxu0 %v10072_v57  ;;  %v5203_v57 = vld [vmem:[%s10851_s18 + $0x220] sm:$0xff] }
 0x24c   : > { %4810 = vmatprep.subr.bf16.mxu0 %v10077_v58  ;;  %v8902_v58 = vcombine.high %v5199_v56, %v5203_v57 }
 0x24d   : > { %7448 = vmatpush1.bf16.msra.mxu1 %v8869_v34  ;;  %v8950_v34 = vcombine.high %v5247_v30, %v5251_v32 }
 0x24e   : > { %7449 = vmatprep.subr.bf16.mxu1 %v8878_v38  ;;  %v10140_v38 = vld [vmem:[%s10838_s17 + $0x4f4] ss:$24 sps:$4 sm:$0xff]  }
 0x24f   : > { %4811 = vmatpush1.bf16.msra.mxu0 %v10075_v59  ;;  %v10114_v59 = vld [vmem:[%s10838_s17 + $0x370] ss:$24 sps:$4 sm:$0xff]  }
 0x250   : > { %4812 = vmatprep.subr.bf16.mxu0 %v10080_v60  ;;  %v8901_v60 = vcombine.low %v5199_v56, %v5203_v57  ;;  %v10158_v56 = vld [vmem:[%s10838_s17 + $0x614] ss:$24 sps:$4 sm:$0xff]   ;;  %v10156_v57 = vld [vmem:[%s10838_s17 + $0x610] ss:$24 sps:$4 sm:$0xff]  }
 0x251   : > { %7450 = vmatpush1.bf16.msra.mxu1 %v8877_v40  ;;  %v8957_v40 = vcombine.low %v5255_v36, %v5259_v37 }
 0x252   : > { %7451 = vmatprep.subr.bf16.mxu1 %v8886_v44  ;;  %v11464_v44 = vld [vmem:[%s10851_s18 + $0x420] sm:$0xff] }
 0x253   : > { %4813 = vmatpush1.bf16.msra.mxu0 %v10078_v61  ;;  %v10119_v61 = vld [vmem:[%s10838_s17 + $0x3a4] ss:$24 sps:$4 sm:$0xff]  }
 0x254   : > { %4814 = vmatprep.subr.bf16.mxu0 %v10083_v62  ;;  %v5207_v62 = vld [vmem:[%s10851_s18 + $0x240] sm:$0xff] }
 0x255   : > { %7452 = vmatpush1.bf16.msra.mxu1 %v8885_v46  ;;  %v10141_v46 = vld [vmem:[%s10838_s17 + $0x520] ss:$24 sps:$4 sm:$0xff]  }
 0x256   : > { %7453 = vmatprep.subr.bf16.mxu1 %v8894_v51  ;;  %v10147_v51 = vld [vmem:[%s10838_s17 + $0x580] ss:$24 sps:$4 sm:$0xff]  }
 0x257   : > { %4815 = vmatpush1.bf16.msra.mxu0 %v10081_v63  ;;  %v5211_v63 = vld [vmem:[%s10851_s18 + $0x260] sm:$0xff] }
 0x258   : > { %4816 = vmatprep.subr.bf16.mxu0 %v10086_v0  ;;  %v8910_v0 = vcombine.high %v5207_v62, %v5211_v63 }
 0x259   : > { %7454 = vmatpush1.bf16.msra.mxu1 %v8893_v54  ;;  %v10155_v54 = vld [vmem:[%s10838_s17 + $0x5e4] ss:$24 sps:$4 sm:$0xff]  }
 0x25a   : > { %7455 = vmatprep.subr.bf16.mxu1 %v8902_v58  ;;  %v10161_v58 = vld [vmem:[%s10838_s17 + $0x644] ss:$24 sps:$4 sm:$0xff]  }
 0x25b   : > { %4817 = vmatpush1.bf16.msra.mxu0 %v10084_v1  ;;  %v10117_v1 = vld [vmem:[%s10838_s17 + $0x3a0] ss:$24 sps:$4 sm:$0xff]  }
 0x25c   : > { %4818 = vmatprep.subr.bf16.mxu0 %v10089_v2  ;;  %v8909_v2 = vcombine.low %v5207_v62, %v5211_v63  ;;  %v10164_v62 = vld [vmem:[%s10838_s17 + $0x674] ss:$24 sps:$4 sm:$0xff]   ;;  %v10162_v63 = vld [vmem:[%s10838_s17 + $0x670] ss:$24 sps:$4 sm:$0xff]  }
 0x25d   : > { %7456 = vmatpush1.bf16.msra.mxu1 %v8901_v60  ;;  %v10159_v60 = vld [vmem:[%s10838_s17 + $0x640] ss:$24 sps:$4 sm:$0xff]  }
 0x25e   : > { %7457 = vmatprep.subr.bf16.mxu1 %v8910_v0  ;;  %v10167_v0 = vld [vmem:[%s10838_s17 + $0x6a4] ss:$24 sps:$4 sm:$0xff]  }
 0x25f   : > { %4819 = vmatpush1.bf16.msra.mxu0 %v10087_v3  ;;  %v10122_v3 = vld [vmem:[%s10838_s17 + $0x3d4] ss:$24 sps:$4 sm:$0xff]  }
 0x260   : > { %4820 = vmatprep.subr.bf16.mxu0 %v10092_v4  ;;  %v5215_v4 = vld [vmem:[%s10851_s18 + $0x280] sm:$0xff] }
 0x261   : > { %7458 = vmatpush1.bf16.msra.mxu1 %v8909_v2  ;;  %v8918_v6 = vcombine.high %v5215_v4, %v5219_v5  ;;  %v10170_v2 = vld [vmem:[%s10838_s17 + $0x6d4] ss:$24 sps:$4 sm:$0xff]  }
 0x263   : > { %4821 = vmatpush1.bf16.msra.mxu0 %v10090_v8  ;;  %v8917_v8 = vcombine.low %v5215_v4, %v5219_v5  ;;  %7459 = vmatprep.subr.bf16.mxu1 %v8918_v6  ;;  %v10173_v4 = vld [vmem:[%s10838_s17 + $0x704] ss:$24 sps:$4 sm:$0xff]   ;;  %v10171_v5 = vld [vmem:[%s10838_s17 + $0x700] ss:$24 sps:$4 sm:$0xff]   ;;  %v10176_v6 = vld [vmem:[%s10838_s17 + $0x734] ss:$24 sps:$4 sm:$0xff]  }
 0x264   : > { %4822 = vmatprep.subr.bf16.mxu0 %v10095_v10  ;;  %v5223_v10 = vld [vmem:[%s10851_s18 + $0x2c0] sm:$0xff] }
 0x265   : > { %7460 = vmatpush1.bf16.msra.mxu1 %v8917_v8  ;;  %v8926_v12 = vcombine.high %v5223_v10, %v5227_v11  ;;  %v10179_v8 = vld [vmem:[%s10838_s17 + $0x764] ss:$24 sps:$4 sm:$0xff]  }
 0x267   : > { %4823 = vmatpush1.bf16.msra.mxu0 %v10093_v14  ;;  %v8925_v14 = vcombine.low %v5223_v10, %v5227_v11  ;;  %7461 = vmatprep.subr.bf16.mxu1 %v8926_v12  ;;  %v10182_v10 = vld [vmem:[%s10838_s17 + $0x794] ss:$24 sps:$4 sm:$0xff]   ;;  %v10180_v11 = vld [vmem:[%s10838_s17 + $0x790] ss:$24 sps:$4 sm:$0xff]   ;;  %v10185_v12 = vld [vmem:[%s10838_s17 + $0x7c4] ss:$24 sps:$4 sm:$0xff]  }
 0x268   : > { %4824 = vmatprep.subr.bf16.mxu0 %v10098_v16  ;;  %v10126_v16 = vld [vmem:[%s10838_s17 + $0x430] ss:$24 sps:$4 sm:$0xff]  }
 0x269   : > { %7462 = vmatpush1.bf16.msra.mxu1 %v8925_v14  ;;  %v10188_v14 = vld [vmem:[%s10838_s17 + $0x7f4] ss:$24 sps:$4 sm:$0xff]  }
 0x26b   : > { %4825 = vmatpush1.bf16.msra.mxu0 %v10096_v20  ;;  %v8934_v20 = vcombine.high %v5231_v18, %v5235_v19 }
 0x26c   : > { %4826 = vmatprep.subr.bf16.mxu0 %v10101_v22  ;;  %v8933_v22 = vcombine.low %v5231_v18, %v5235_v19  ;;  %v10194_v18 = vld [vmem:[%s10838_s17 + $0x854] ss:$24 sps:$4 sm:$0xff]   ;;  %v10192_v19 = vld [vmem:[%s10838_s17 + $0x850] ss:$24 sps:$4 sm:$0xff]  }
 0x26d   : > { %7463 = vmatprep.subr.bf16.mxu1 %v8934_v20  ;;  %v10197_v20 = vld [vmem:[%s10838_s17 + $0x884] ss:$24 sps:$4 sm:$0xff]  }
 0x26e   : > { %7464 = vmatpush1.bf16.msra.mxu1 %v8933_v22  ;;  %v10200_v22 = vld [vmem:[%s10838_s17 + $0x8b4] ss:$24 sps:$4 sm:$0xff]  }
 0x26f   : > { %4827 = vmatpush1.bf16.msra.mxu0 %v10099_v27  ;;  %v8942_v27 = vcombine.high %v5239_v25, %v5243_v26 }
 0x270   : > { %4828 = vmatprep.subr.bf16.mxu0 %v10104_v29  ;;  %v8941_v29 = vcombine.low %v5239_v25, %v5243_v26  ;;  %v10203_v25 = vld [vmem:[%s10838_s17 + $0x8e4] ss:$24 sps:$4 sm:$0xff]   ;;  %v10201_v26 = vld [vmem:[%s10838_s17 + $0x8e0] ss:$24 sps:$4 sm:$0xff]  }
 0x271   : > { %7465 = vmatprep.subr.bf16.mxu1 %v8942_v27  ;;  %v10206_v27 = vld [vmem:[%s10838_s17 + $0x914] ss:$24 sps:$4 sm:$0xff]  }
 0x272   : > { %7466 = vmatpush1.bf16.msra.mxu1 %v8941_v29  ;;  %v10209_v29 = vld [vmem:[%s10838_s17 + $0x944] ss:$24 sps:$4 sm:$0xff]  }
 0x273   : > { %4829 = vmatpush1.bf16.msra.mxu0 %v10102_v33  ;;  %v8949_v33 = vcombine.low %v5247_v30, %v5251_v32  ;;  %7467 = vmatprep.subr.bf16.mxu1 %v8950_v34  ;;  %v10401_v30 = vld [vmem:[%s12296_s0 + $0x10] ss:$52 sps:$4 sm:$0x1f]   ;;  %v982_v34 = vlaneseq }
 0x274   : > { %4830 = vmatprep.subr.bf16.mxu0 %v10107_v35  ;;  %v10135_v35 = vld [vmem:[%s10838_s17 + $0x4c0] ss:$24 sps:$4 sm:$0xff]   ;;  %v10402_v32 = vld [vmem:[%s12296_s0 + $0x1c] ss:$52 sps:$4 sm:$0x1f]  }
 0x276   : > { %7468 = vmatpush1.bf16.msra.mxu1 %v8949_v33  ;;  %v10212_v33 = vld [vmem:[%s10838_s17 + $0x974] ss:$24 sps:$4 sm:$0xff]  }
 0x277   : > { %4831 = vmatpush1.bf16.msra.mxu0 %v10105_v39  ;;  %v8958_v39 = vcombine.high %v5255_v36, %v5259_v37  ;;  %v10215_v36 = vld [vmem:[%s10838_s17 + $0x9a4] ss:$24 sps:$4 sm:$0xff]   ;;  %v11530_v37 = vshrl.u32 %v982_v34, 7  ;;  %v10237_v34 = vld [vmem:[%s10838_s17 + $0xb20] ss:$24 sps:$4 sm:$0xff]  }
 0x278   : > { %4843 = vmatprep.subr.bf16.mxu0 %v10110_v41  ;;  %v10138_v41 = vld [vmem:[%s10838_s17 + $0x4f0] ss:$24 sps:$4 sm:$0xff]  }
 0x279   : > { %7469 = vmatprep.subr.bf16.mxu1 %v8958_v39  ;;  %v10218_v39 = vld [vmem:[%s10838_s17 + $0x9d4] ss:$24 sps:$4 sm:$0xff]  }
 0x27a   : > { %4833 = vmatmul.mubr.bf16.vlgmr.msra.gmra.mrb[4].mxu0 %v10397_v50  ;;  %7470 = vmatpush1.bf16.msra.mxu1 %v8957_v40  ;;  %v10149_v50 = vld [vmem:[%s10838_s17 + $0x584] ss:$24 sps:$4 sm:$0xff]   ;;  %v984_v40 = vsub.s32 0, %v11530_v37 }
 0x27b   : > { %4844 = vmatpush1.bf16.msra.mxu0 %v10108_v45  ;;  %4875 = vmatprep.mubr.bf16.mxu0 %v10398_v53  ;;  %v8966_v45 = vcombine.high %v11461_v43, %v11464_v44  ;;  %v10150_v53 = vld [vmem:[%s10838_s17 + $0x5b0] ss:$24 sps:$4 sm:$0xff]  }
 0x27c   : > { %4845 = vmatprep.subr.bf16.mxu0 %v10113_v47  ;;  %v8965_v47 = vcombine.low %v11461_v43, %v11464_v44 }
 0x27d   : > { %7482 = vmatprep.subr.bf16.mxu1 %v8966_v45  ;;  %v980_v45 = vld [vmem:[%s10845_s15] sm:$0x3f] }
 0x27f   : > { %4846 = vmatpush1.bf16.msra.mxu0 %v10111_v52  ;;  %v10152_v52 = vld [vmem:[%s10838_s17 + $0x5b4] ss:$24 sps:$4 sm:$0xff]  }
 0x280   : > { %4847 = vmatprep.subr.bf16.mxu0 %v10116_v55  ;;  %v10153_v55 = vld [vmem:[%s10838_s17 + $0x5e0] ss:$24 sps:$4 sm:$0xff]  }
 0x283   : > { %4848 = vmatpush1.bf16.msra.mxu0 %v10114_v59  ;;  %v10399_v59 = vld [vmem:[%s12296_s0 + $0x8] ss:$52 sps:$4 sm:$0x1f]  }
 0x284   : > { %4849 = vmatprep.subr.bf16.mxu0 %v10119_v61  ;;  %v10400_v61 = vld [vmem:[%s12296_s0 + $0x14] ss:$52 sps:$4 sm:$0x1f]  }
 0x287   : > { %4850 = vmatpush1.bf16.msra.mxu0 %v10117_v1  ;;  %v10165_v1 = vld [vmem:[%s10838_s17 + $0x6a0] ss:$24 sps:$4 sm:$0xff]  }
 0x288   : > { %4851 = vmatprep.subr.bf16.mxu0 %v10122_v3  ;;  %v10168_v3 = vld [vmem:[%s10838_s17 + $0x6d0] ss:$24 sps:$4 sm:$0xff]  }
 0x28b   : > { %4852 = vmatpush1.bf16.msra.mxu0 %v10120_v7  ;;  %v10174_v7 = vld [vmem:[%s10838_s17 + $0x730] ss:$24 sps:$4 sm:$0xff]  }
 0x28c   : > { %4853 = vmatprep.subr.bf16.mxu0 %v10125_v9  ;;  %v10177_v9 = vld [vmem:[%s10838_s17 + $0x760] ss:$24 sps:$4 sm:$0xff]  }
 0x28f   : > { %4854 = vmatpush1.bf16.msra.mxu0 %v10123_v13  ;;  %v10183_v13 = vld [vmem:[%s10838_s17 + $0x7c0] ss:$24 sps:$4 sm:$0xff]  }
 0x290   : > { %4855 = vmatprep.subr.bf16.mxu0 %v10128_v15  ;;  %v10186_v15 = vld [vmem:[%s10838_s17 + $0x7f0] ss:$24 sps:$4 sm:$0xff]  }
 0x293   : > { %4856 = vmatpush1.bf16.msra.mxu0 %v10126_v16  ;;  %v10191_v16 = vld [vmem:[%s10838_s17 + $0x824] ss:$24 sps:$4 sm:$0xff]  }
 0x294   : > { %4857 = vmatprep.subr.bf16.mxu0 %v10131_v17  ;;  %v10189_v17 = vld [vmem:[%s10838_s17 + $0x820] ss:$24 sps:$4 sm:$0xff]  }
 0x297   : > { %4858 = vmatpush1.bf16.msra.mxu0 %v10129_v21  ;;  %v10195_v21 = vld [vmem:[%s10838_s17 + $0x880] ss:$24 sps:$4 sm:$0xff]  }
 0x298   : > { %4859 = vmatprep.subr.bf16.mxu0 %v10134_v24  ;;  %v10198_v24 = vld [vmem:[%s10838_s17 + $0x8b0] ss:$24 sps:$4 sm:$0xff]  }
 0x29b   : > { %4860 = vmatpush1.bf16.msra.mxu0 %v10132_v28  ;;  %v10204_v28 = vld [vmem:[%s10838_s17 + $0x910] ss:$24 sps:$4 sm:$0xff]  }
 0x29c   : > { %4861 = vmatprep.subr.bf16.mxu0 %v10137_v31  ;;  %v10207_v31 = vld [vmem:[%s10838_s17 + $0x940] ss:$24 sps:$4 sm:$0xff]  }
 0x29f   : > { %4862 = vmatpush1.bf16.msra.mxu0 %v10135_v35  ;;  %v10210_v35 = vld [vmem:[%s10838_s17 + $0x970] ss:$24 sps:$4 sm:$0xff]  }
 0x2a0   : > { %4863 = vmatprep.subr.bf16.mxu0 %v10140_v38  ;;  %v10213_v38 = vld [vmem:[%s10838_s17 + $0x9a0] ss:$24 sps:$4 sm:$0xff]  }
 0x2a3   : > { %4864 = vmatpush1.bf16.msra.mxu0 %v10138_v41  ;;  %v992_v41 = vsub.s32 2, %v11530_v37 }
 0x2a4   : > { %4865 = vmatprep.subr.bf16.mxu0 %v10143_v42  ;;  %v10216_v42 = vld [vmem:[%s10838_s17 + $0x9d0] ss:$24 sps:$4 sm:$0xff]  }
 0x2a7   : > { %4866 = vmatpush1.bf16.msra.mxu0 %v10141_v46  ;;  %v988_v46 = vsub.s32 1, %v11530_v37 }
 0x2a8   : > { %4867 = vmatprep.subr.bf16.mxu0 %v10146_v48  ;;  %v996_v48 = vsub.s32 3, %v11530_v37 }
 0x2ab   : > { %4868 = vmatpush1.bf16.msra.mxu0 %v10144_v49  ;;  %v10221_v49 = vld [vmem:[%s10838_s17 + $0xa04] ss:$24 sps:$4 sm:$0xff]  }
 0x2ac   : > { %4869 = vmatprep.subr.bf16.mxu0 %v10149_v50  ;;  %v985_v50 = vrot.slane %v980_v45, %v984_v40 }
 0x2af   : > { %4870 = vmatpush1.bf16.msra.mxu0 %v10147_v51  ;;  %v993_v51 = vrot.slane %v980_v45, %v992_v41 }
 0x2b0   : > { %4871 = vmatprep.subr.bf16.mxu0 %v10152_v52  ;;  %v989_v52 = vrot.slane %v980_v45, %v988_v46 }
 0x2b3   : > { %4872 = vmatpush1.bf16.msra.mxu0 %v10150_v53  ;;  %v997_v53 = vrot.slane %v980_v45, %v996_v48  ;;  %v10240_v45 = vld [vmem:[%s10838_s17 + $0xb50] ss:$24 sps:$4 sm:$0xff]  }
 0x2b4   : > { %4873 = vmatprep.subr.bf16.mxu0 %v10155_v54  ;;  %v10219_v54 = vld [vmem:[%s10838_s17 + $0xa00] ss:$24 sps:$4 sm:$0xff]  }
 0x2b7   : > { %4874 = vmatpush1.bf16.msra.mxu0 %v10153_v55  ;;  %v10224_v55 = vld [vmem:[%s10838_s17 + $0xa34] ss:$24 sps:$4 sm:$0xff]  }
 0x2b8   : > { %4886 = vmatprep.subr.bf16.mxu0 %v10158_v56 }
 0x2ba   : > { %4876 = vmatmul.mubr.bf16.vlgmr.msra.gmra.mrb[4].mxu0 %v10399_v59 }
 0x2bb   : > { %4887 = vmatpush1.bf16.msra.mxu0 %v10156_v57  ;;  %4918 = vmatprep.mubr.bf16.mxu0 %v10400_v61 }
 0x2bc   : > { %4888 = vmatprep.subr.bf16.mxu0 %v10161_v58 }
 0x2bf   : > { %4889 = vmatpush1.bf16.msra.mxu0 %v10159_v60 }
 0x2c0   : > { %4890 = vmatprep.subr.bf16.mxu0 %v10164_v62 }
 0x2c3   : > { %4891 = vmatpush1.bf16.msra.mxu0 %v10162_v63 }
 0x2c4   : > { %4892 = vmatprep.subr.bf16.mxu0 %v10167_v0 }
 0x2c7   : > { %4893 = vmatpush1.bf16.msra.mxu0 %v10165_v1 }
 0x2c8   : > { %4894 = vmatprep.subr.bf16.mxu0 %v10170_v2  ;;  %v10222_v2 = vld [vmem:[%s10838_s17 + $0xa30] ss:$24 sps:$4 sm:$0xff]  }
 0x2cb   : > { %4895 = vmatpush1.bf16.msra.mxu0 %v10168_v3 }
 0x2cc   : > { %4896 = vmatprep.subr.bf16.mxu0 %v10173_v4 }
 0x2cf   : > { %4897 = vmatpush1.bf16.msra.mxu0 %v10171_v5 }
 0x2d0   : > { %4898 = vmatprep.subr.bf16.mxu0 %v10176_v6  ;;  %v10227_v6 = vld [vmem:[%s10838_s17 + $0xa64] ss:$24 sps:$4 sm:$0xff]  }
 0x2d3   : > { %4899 = vmatpush1.bf16.msra.mxu0 %v10174_v7 }
 0x2d4   : > { %4900 = vmatprep.subr.bf16.mxu0 %v10179_v8 }
 0x2d7   : > { %4901 = vmatpush1.bf16.msra.mxu0 %v10177_v9 }
 0x2d8   : > { %4902 = vmatprep.subr.bf16.mxu0 %v10182_v10  ;;  %v10225_v10 = vld [vmem:[%s10838_s17 + $0xa60] ss:$24 sps:$4 sm:$0xff]  }
 0x2db   : > { %4903 = vmatpush1.bf16.msra.mxu0 %v10180_v11  ;;  %v10230_v11 = vld [vmem:[%s10838_s17 + $0xa94] ss:$24 sps:$4 sm:$0xff]  }
 0x2dc   : > { %4904 = vmatprep.subr.bf16.mxu0 %v10185_v12  ;;  %v10228_v12 = vld [vmem:[%s10838_s17 + $0xa90] ss:$24 sps:$4 sm:$0xff]  }
 0x2df   : > { %4905 = vmatpush1.bf16.msra.mxu0 %v10183_v13  ;;  %v10233_v13 = vld [vmem:[%s10838_s17 + $0xac4] ss:$24 sps:$4 sm:$0xff]  }
 0x2e0   : > { %4906 = vmatprep.subr.bf16.mxu0 %v10188_v14 }
 0x2e3   : > { %4907 = vmatpush1.bf16.msra.mxu0 %v10186_v15 }
 0x2e4   : > { %4908 = vmatprep.subr.bf16.mxu0 %v10191_v16  ;;  %v10231_v16 = vld [vmem:[%s10838_s17 + $0xac0] ss:$24 sps:$4 sm:$0xff]  }
 0x2e7   : > { %4909 = vmatpush1.bf16.msra.mxu0 %v10189_v17 }
 0x2e8   : > { %4910 = vmatprep.subr.bf16.mxu0 %v10194_v18  ;;  %v10236_v18 = vld [vmem:[%s10838_s17 + $0xaf4] ss:$24 sps:$4 sm:$0xff]  }
 0x2eb   : > { %4911 = vmatpush1.bf16.msra.mxu0 %v10192_v19 }
 0x2ec   : > { %4912 = vmatprep.subr.bf16.mxu0 %v10197_v20 }
 0x2ef   : > { %4913 = vmatpush1.bf16.msra.mxu0 %v10195_v21 }
 0x2f0   : > { %4914 = vmatprep.subr.bf16.mxu0 %v10200_v22 }
 0x2f3   : > { %4915 = vmatpush1.bf16.msra.mxu0 %v10198_v24  ;;  %v10234_v24 = vld [vmem:[%s10838_s17 + $0xaf0] ss:$24 sps:$4 sm:$0xff]  }
 0x2f4   : > { %4916 = vmatprep.subr.bf16.mxu0 %v10203_v25  ;;  %v5271_v25 = vld [vmem:[%s10851_s18 + $0x440] sm:$0xff] }
 0x2f7   : > { %4917 = vmatpush1.bf16.msra.mxu0 %v10201_v26  ;;  %v5275_v26 = vld [vmem:[%s10851_s18 + $0x460] sm:$0xff] }
 0x2f8   : > { %4929 = vmatprep.subr.bf16.mxu0 %v10206_v27 }
 0x2fa   : > { %4919 = vmatmul.mubr.bf16.vlgmr.msra.gmra.mrb[4].mxu0 %v10401_v30 }
 0x2fb   : > { %4930 = vmatpush1.bf16.msra.mxu0 %v10204_v28  ;;  %4961 = vmatprep.mubr.bf16.mxu0 %v10402_v32  ;;  %v10239_v28 = vld [vmem:[%s10838_s17 + $0xb24] ss:$24 sps:$4 sm:$0xff]  }
 0x2fc   : > { %4931 = vmatprep.subr.bf16.mxu0 %v10209_v29 }
 0x2ff   : > { %4932 = vmatpush1.bf16.msra.mxu0 %v10207_v31 }
 0x300   : > { %4933 = vmatprep.subr.bf16.mxu0 %v10212_v33  ;;  %v8974_v33 = vcombine.high %v5271_v25, %v5275_v26 }
 0x303   : > { %4934 = vmatpush1.bf16.msra.mxu0 %v10210_v35  ;;  %v5279_v35 = vld [vmem:[%s10851_s18 + $0x480] sm:$0xff] }
 0x304   : > { %4935 = vmatprep.subr.bf16.mxu0 %v10215_v36  ;;  %v5283_v36 = vld [vmem:[%s10851_s18 + $0x4a0] sm:$0xff] }
 0x305   : > { %v8981_v43 = vcombine.low %v5279_v35, %v5283_v36 }
 0x307   : > { %4936 = vmatpush1.bf16.msra.mxu0 %v10213_v38  ;;  %v10242_v38 = vld [vmem:[%s10838_s17 + $0xb54] ss:$24 sps:$4 sm:$0xff]  }
 0x308   : > { %4937 = vmatprep.subr.bf16.mxu0 %v10218_v39  ;;  %v8973_v39 = vcombine.low %v5271_v25, %v5275_v26 }
 0x30b   : > { %4938 = vmatpush1.bf16.msra.mxu0 %v10216_v42  ;;  %v8982_v42 = vcombine.high %v5279_v35, %v5283_v36  ;;  %v10264_v36 = vld [vmem:[%s10838_s17 + $0xcd0] ss:$24 sps:$4 sm:$0xff]  }
 0x30c   : > { %4939 = vmatprep.subr.bf16.mxu0 %v10221_v49  ;;  %v5287_v49 = vld [vmem:[%s10851_s18 + $0x4c0] sm:$0xff] }
 0x30d   : > { %v4490_v56 = vpop.f32.mrb[0].mxu0 }
 0x30e   : > { %v4791_v57 = vpop.f32.mrb[0].mxu1  ;;  %v9228_v58 = vadd.f32 %v4490_v56, %v985_v50  ;;  %v4492_v60 = vpop.f32.mrb[1].mxu0 }
 0x30f   : > { %v9232_v59 = vadd.f32 %v4791_v57, %v993_v51  ;;  %v4793_v61 = vpop.f32.mrb[1].mxu1  ;;  %v9229_v62 = vadd.f32 %v4492_v60, %v989_v52  ;;  %v4494_v0 = vpop.f32.mrb[2].mxu0  ;;  %4940 = vmatpush1.bf16.msra.mxu0 %v10219_v54  ;;  %v10248_v54 = vld [vmem:[%s10838_s17 + $0xbb4] ss:$24 sps:$4 sm:$0xff]   ;;  %v10246_v57 = vld [vmem:[%s10838_s17 + $0xbb0] ss:$24 sps:$4 sm:$0xff]  }
 0x310   : > { %v9233_v63 = vadd.f32 %v4793_v61, %v997_v53  ;;  %v4795_v1 = vpop.f32.mrb[2].mxu1  ;;  %10372 = vtanh.f32 %v9228_v58  ;;  %v9230_v3 = vadd.f32 %v4494_v0, %v985_v50  ;;  %v4496_v4 = vpop.f32.mrb[3].mxu0  ;;  %4941 = vmatprep.subr.bf16.mxu0 %v10224_v55  ;;  %v5291_v50 = vld [vmem:[%s10851_s18 + $0x4e0] sm:$0xff]  ;;  %v10251_v60 = vld [vmem:[%s10838_s17 + $0xbe4] ss:$24 sps:$4 sm:$0xff]  }
 0x311   : > { %v4797_v5 = vpop.f32.mrb[3].mxu1  ;;  %10374 = vtanh.f32 %v9232_v59  ;;  %v9234_v7 = vadd.f32 %v4795_v1, %v993_v51  ;;  %v9231_v8 = vadd.f32 %v4496_v4, %v989_v52  ;;  %v10245_v51 = vld [vmem:[%s10838_s17 + $0xb84] ss:$24 sps:$4 sm:$0xff]   ;;  %v8990_v44 = vcombine.high %v5287_v49, %v5291_v50  ;;  %v5295_v52 = vld [vmem:[%s10851_s18 + $0x500] sm:$0xff] }
 0x312   : > { %10376 = vtanh.f32 %v9229_v62  ;;  %v9235_v9 = vadd.f32 %v4797_v5, %v997_v53  ;;  %v5299_v53 = vld [vmem:[%s10851_s18 + $0x520] sm:$0xff]  ;;  %v8989_v55 = vcombine.low %v5287_v49, %v5291_v50  ;;  %v10267_v50 = vld [vmem:[%s10838_s17 + $0xd00] ss:$24 sps:$4 sm:$0xff]  }
 0x313   : > { %10378 = vtanh.f32 %v9233_v63  ;;  %4942 = vmatpush1.bf16.msra.mxu0 %v10222_v2  ;;  %v8998_v56 = vcombine.high %v5295_v52, %v5299_v53  ;;  %v5303_v58 = vld [vmem:[%s10851_s18 + $0x540] sm:$0xff]  ;;  %v8997_v61 = vcombine.low %v5295_v52, %v5299_v53  ;;  %v10249_v63 = vld [vmem:[%s10838_s17 + $0xbe0] ss:$24 sps:$4 sm:$0xff]  }
 0x314   : > { %10380 = vtanh.f32 %v9230_v3  ;;  %4943 = vmatprep.subr.bf16.mxu0 %v10227_v6  ;;  %v5307_v59 = vld [vmem:[%s10851_s18 + $0x560] sm:$0xff] }
 0x315   : > { %10382 = vtanh.f32 %v9234_v7  ;;  %v9006_v62 = vcombine.high %v5303_v58, %v5307_v59  ;;  %v5311_v0 = vld [vmem:[%s10851_s18 + $0x580] sm:$0xff]  ;;  %v9005_v3 = vcombine.low %v5303_v58, %v5307_v59  ;;  %v10273_v59 = vld [vmem:[%s10838_s17 + $0xd60] ss:$24 sps:$4 sm:$0xff]  }
 0x316   : > { %10384 = vtanh.f32 %v9231_v8  ;;  %v5315_v1 = vld [vmem:[%s10851_s18 + $0x5a0] sm:$0xff]  ;;  %v10257_v8 = vld [vmem:[%s10838_s17 + $0xc44] ss:$24 sps:$4 sm:$0xff]  }
 0x317   : > { %10386 = vtanh.f32 %v9235_v9  ;;  %4944 = vmatpush1.bf16.msra.mxu0 %v10225_v10  ;;  %v10254_v2 = vld [vmem:[%s10838_s17 + $0xc14] ss:$24 sps:$4 sm:$0xff]   ;;  %v9014_v4 = vcombine.high %v5311_v0, %v5315_v1  ;;  %v10252_v5 = vld [vmem:[%s10838_s17 + $0xc10] ss:$24 sps:$4 sm:$0xff]   ;;  %v9013_v9 = vcombine.low %v5311_v0, %v5315_v1 }
 0x318   : > { %4945 = vmatprep.subr.bf16.mxu0 %v10230_v11  ;;  %v5319_v6 = vld [vmem:[%s10851_s18 + $0x5c0] sm:$0xff] }
 0x319   : > { %v5323_v7 = vld [vmem:[%s10851_s18 + $0x5e0] sm:$0xff] }
 0x31a   : > { %v10373_v14 = vpop.eup %10372  ;;  %v10403_v10 = vld [vmem:[%s12296_s0 + $0x18] ss:$52 sps:$4 sm:$0x1f]   ;;  %v9022_v11 = vcombine.high %v5319_v6, %v5323_v7  ;;  %v10270_v53 = vld [vmem:[%s10838_s17 + $0xd30] ss:$24 sps:$4 sm:$0xff]  }
 0x31b   : > { %v10375_v15 = vpop.eup %10374  ;;  %4946 = vmatpush1.bf16.msra.mxu0 %v10228_v12  ;;  %v10255_v12 = vld [vmem:[%s10838_s17 + $0xc40] ss:$24 sps:$4 sm:$0xff]   ;;  %v10276_v1 = vld [vmem:[%s10838_s17 + $0xd90] ss:$24 sps:$4 sm:$0xff]  }
 0x31c   : > { %v10377_v17 = vpop.eup %10376  ;;  %4947 = vmatprep.subr.bf16.mxu0 %v10233_v13  ;;  %v5327_v13 = vld [vmem:[%s10851_s18 + $0x600] sm:$0xff] }
 0x31d   : > { %v10379_v19 = vpop.eup %10378 }
 0x31e   : > { %v10381_v20 = vpop.eup %10380 }
 0x31f   : > { %v10383_v21 = vpop.eup %10382  ;;  %4948 = vmatpush1.bf16.msra.mxu0 %v10231_v16  ;;  %v11559_v22 = vpack.c.bf16 %v10381_v20, %v10373_v14  ;;  %v5331_v14 = vld [vmem:[%s10851_s18 + $0x620] sm:$0xff] }
 0x320   : > { %v10385_v27 = vpop.eup %10384  ;;  %4949 = vmatprep.subr.bf16.mxu0 %v10236_v18  ;;  %v11565_v29 = vpack.c.bf16 %v10383_v21, %v10375_v15  ;;  %v10404_v15 = vld [vmem:[%s12296_s0 + $0x24] ss:$52 sps:$4 sm:$0x1f]   ;;  %v10260_v16 = vld [vmem:[%s10838_s17 + $0xc74] ss:$24 sps:$4 sm:$0xff]   ;;  %v9030_v18 = vcombine.high %v5327_v13, %v5331_v14  ;;  %v9029_v25 = vcombine.low %v5327_v13, %v5331_v14 }
 0x321   : > { %v10387_v30 = vpop.eup %10386  ;;  %v11567_v31 = vpack.c.bf16 %v10385_v27, %v10377_v17  ;;  %v9021_v17 = vcombine.low %v5319_v6, %v5323_v7  ;;  %v5335_v20 = vld [vmem:[%s10851_s18 + $0x640] sm:$0xff]  ;;  %v10261_v27 = vld [vmem:[%s10838_s17 + $0xca0] ss:$24 sps:$4 sm:$0xff]  }
 0x322   : > { %v11569_v32 = vpack.c.bf16 %v10387_v30, %v10379_v19  ;;  %v10258_v19 = vld [vmem:[%s10838_s17 + $0xc70] ss:$24 sps:$4 sm:$0xff]   ;;  %v10279_v7 = vld [vmem:[%s10838_s17 + $0xdc0] ss:$24 sps:$4 sm:$0xff]   ;;  %v10290_v13 = vld [vmem:[%s10838_s17 + $0xe54] ss:$24 sps:$4 sm:$0xff]  }
 0x323   : > { %7471 = vmatprep.mubr.bf16.mxu1 %v11567_v31  ;;  %4950 = vmatpush1.bf16.msra.mxu0 %v10234_v24  ;;  %v5339_v21 = vld [vmem:[%s10851_s18 + $0x660] sm:$0xff]  ;;  %v10263_v24 = vld [vmem:[%s10838_s17 + $0xca4] ss:$24 sps:$4 sm:$0xff]  }
 0x324   : > { %7472 = vmatmul.mubr.bf16.vlgmr.msra.gmra.mrb[4].mxu1 %v11559_v22  ;;  %4951 = vmatprep.subr.bf16.mxu0 %v10239_v28  ;;  %v9038_v26 = vcombine.high %v5335_v20, %v5339_v21  ;;  %v5343_v28 = vld [vmem:[%s10851_s18 + $0x680] sm:$0xff] }
 0x325   : > { %7483 = vmatpush1.bf16.msra.mxu1 %v8965_v47  ;;  %7514 = vmatprep.mubr.bf16.mxu1 %v11569_v32  ;;  %v10243_v47 = vld [vmem:[%s10838_s17 + $0xb80] ss:$24 sps:$4 sm:$0xff]   ;;  %v5347_v30 = vld [vmem:[%s10851_s18 + $0x6a0] sm:$0xff] }
 0x326   : > { %7484 = vmatprep.subr.bf16.mxu1 %v8974_v33  ;;  %v10266_v33 = vld [vmem:[%s10838_s17 + $0xcd4] ss:$24 sps:$4 sm:$0xff]   ;;  %v9046_v35 = vcombine.high %v5343_v28, %v5347_v30  ;;  %v10288_v14 = vld [vmem:[%s10838_s17 + $0xe50] ss:$24 sps:$4 sm:$0xff]  }
 0x327   : > { %4952 = vmatpush1.bf16.msra.mxu0 %v10237_v34  ;;  %v9037_v34 = vcombine.low %v5335_v20, %v5339_v21  ;;  %v10297_v20 = vld [vmem:[%s10838_s17 + $0xee0] ss:$24 sps:$4 sm:$0xff]   ;;  %v10302_v21 = vld [vmem:[%s10838_s17 + $0xf14] ss:$24 sps:$4 sm:$0xff]  }
 0x328   : > { %4953 = vmatprep.subr.bf16.mxu0 %v10242_v38  ;;  %v5351_v38 = vld [vmem:[%s10851_s18 + $0x6c0] sm:$0xff] }
 0x329   : > { %7485 = vmatpush1.bf16.msra.mxu1 %v8973_v39  ;;  %v5355_v39 = vld [vmem:[%s10851_s18 + $0x6e0] sm:$0xff] }
 0x32a   : > { %7486 = vmatprep.subr.bf16.mxu1 %v8982_v42  ;;  %v10269_v42 = vld [vmem:[%s10838_s17 + $0xd04] ss:$24 sps:$4 sm:$0xff]   ;;  %v9054_v49 = vcombine.high %v5351_v38, %v5355_v39 }
 0x32b   : > { %4954 = vmatpush1.bf16.msra.mxu0 %v10240_v45  ;;  %v9045_v45 = vcombine.low %v5343_v28, %v5347_v30  ;;  %v10406_v28 = vld [vmem:[%s12296_s0 + $0x2c] ss:$52 sps:$4 sm:$0x1f]  }
 0x32c   : > { %4955 = vmatprep.subr.bf16.mxu0 %v10245_v51  ;;  %v5359_v51 = vld [vmem:[%s10851_s18 + $0x700] sm:$0xff] }
 0x32d   : > { %7487 = vmatpush1.bf16.msra.mxu1 %v8981_v43  ;;  %v5363_v43 = vld [vmem:[%s10851_s18 + $0x720] sm:$0xff] }
 0x32e   : > { %7488 = vmatprep.subr.bf16.mxu1 %v8990_v44  ;;  %v10272_v44 = vld [vmem:[%s10838_s17 + $0xd34] ss:$24 sps:$4 sm:$0xff]   ;;  %v9062_v52 = vcombine.high %v5359_v51, %v5363_v43 }
 0x32f   : > { %4956 = vmatpush1.bf16.msra.mxu0 %v10243_v47  ;;  %v9053_v47 = vcombine.low %v5351_v38, %v5355_v39  ;;  %v10308_v30 = vld [vmem:[%s10838_s17 + $0xf74] ss:$24 sps:$4 sm:$0xff]   ;;  %v10312_v38 = vld [vmem:[%s10838_s17 + $0xfd0] ss:$24 sps:$4 sm:$0xff]   ;;  %v10317_v39 = vld [vmem:[%s10838_s17 + $0x1004] ss:$24 sps:$4 sm:$0xff]  }
 0x330   : > { %4957 = vmatprep.subr.bf16.mxu0 %v10248_v54  ;;  %v5367_v54 = vld [vmem:[%s10851_s18 + $0x740] sm:$0xff] }
 0x331   : > { %7489 = vmatpush1.bf16.msra.mxu1 %v8989_v55  ;;  %v5371_v55 = vld [vmem:[%s10851_s18 + $0x760] sm:$0xff] }
 0x332   : > { %7490 = vmatprep.subr.bf16.mxu1 %v8998_v56  ;;  %v10275_v56 = vld [vmem:[%s10838_s17 + $0xd64] ss:$24 sps:$4 sm:$0xff]   ;;  %v9070_v58 = vcombine.high %v5367_v54, %v5371_v55 }
 0x333   : > { %4958 = vmatpush1.bf16.msra.mxu0 %v10246_v57  ;;  %v9061_v57 = vcombine.low %v5359_v51, %v5363_v43  ;;  %v10321_v51 = vld [vmem:[%s10838_s17 + $0x1060] ss:$24 sps:$4 sm:$0xff]   ;;  %v10326_v43 = vld [vmem:[%s10838_s17 + $0x1094] ss:$24 sps:$4 sm:$0xff]  }
 0x334   : > { %4959 = vmatprep.subr.bf16.mxu0 %v10251_v60  ;;  %v5375_v60 = vld [vmem:[%s10851_s18 + $0x780] sm:$0xff] }
 0x335   : > { %7491 = vmatpush1.bf16.msra.mxu1 %v8997_v61  ;;  %v5379_v61 = vld [vmem:[%s10851_s18 + $0x7a0] sm:$0xff] }
 0x336   : > { %7492 = vmatprep.subr.bf16.mxu1 %v9006_v62  ;;  %v10278_v62 = vld [vmem:[%s10838_s17 + $0xd94] ss:$24 sps:$4 sm:$0xff]   ;;  %v9078_v0 = vcombine.high %v5375_v60, %v5379_v61 }
 0x337   : > { %4960 = vmatpush1.bf16.msra.mxu0 %v10249_v63  ;;  %v9069_v63 = vcombine.low %v5367_v54, %v5371_v55  ;;  %v10330_v54 = vld [vmem:[%s10838_s17 + $0x10f0] ss:$24 sps:$4 sm:$0xff]   ;;  %v10335_v55 = vld [vmem:[%s10838_s17 + $0x1124] ss:$24 sps:$4 sm:$0xff]  }
 0x338   : > { %4972 = vmatprep.subr.bf16.mxu0 %v10254_v2  ;;  %v5383_v2 = vld [vmem:[%s10851_s18 + $0x7c0] sm:$0xff] }
 0x339   : > { %7493 = vmatpush1.bf16.msra.mxu1 %v9005_v3  ;;  %v5387_v3 = vld [vmem:[%s10851_s18 + $0x7e0] sm:$0xff] }
 0x33a   : > { %7494 = vmatprep.subr.bf16.mxu1 %v9014_v4  ;;  %4962 = vmatmul.mubr.bf16.vlgmr.msra.gmra.mrb[4].mxu0 %v10403_v10  ;;  %v10281_v4 = vld [vmem:[%s10838_s17 + $0xdc4] ss:$24 sps:$4 sm:$0xff]   ;;  %v9086_v6 = vcombine.high %v5383_v2, %v5387_v3  ;;  %v10282_v10 = vld [vmem:[%s10838_s17 + $0xdf0] ss:$24 sps:$4 sm:$0xff]  }
 0x33b   : > { %4973 = vmatpush1.bf16.msra.mxu0 %v10252_v5  ;;  %5004 = vmatprep.mubr.bf16.mxu0 %v10404_v15  ;;  %v9077_v5 = vcombine.low %v5375_v60, %v5379_v61  ;;  %v10293_v15 = vld [vmem:[%s10838_s17 + $0xe84] ss:$24 sps:$4 sm:$0xff]   ;;  %v10339_v60 = vld [vmem:[%s10838_s17 + $0x1180] ss:$24 sps:$4 sm:$0xff]   ;;  %v10344_v61 = vld [vmem:[%s10838_s17 + $0x11b4] ss:$24 sps:$4 sm:$0xff]  }
 0x33c   : > { %4974 = vmatprep.subr.bf16.mxu0 %v10257_v8  ;;  %v10284_v8 = vld [vmem:[%s10838_s17 + $0xdf4] ss:$24 sps:$4 sm:$0xff]  }
 0x33d   : > { %7495 = vmatpush1.bf16.msra.mxu1 %v9013_v9  ;;  %v9085_v9 = vcombine.low %v5383_v2, %v5387_v3  ;;  %v10348_v2 = vld [vmem:[%s10838_s17 + $0x1210] ss:$24 sps:$4 sm:$0xff]   ;;  %v10353_v3 = vld [vmem:[%s10838_s17 + $0x1244] ss:$24 sps:$4 sm:$0xff]  }
 0x33e   : > { %7496 = vmatprep.subr.bf16.mxu1 %v9022_v11  ;;  %v10287_v11 = vld [vmem:[%s10838_s17 + $0xe24] ss:$24 sps:$4 sm:$0xff]  }
 0x33f   : > { %4975 = vmatpush1.bf16.msra.mxu0 %v10255_v12  ;;  %v10285_v12 = vld [vmem:[%s10838_s17 + $0xe20] ss:$24 sps:$4 sm:$0xff]  }
 0x340   : > { %4976 = vmatprep.subr.bf16.mxu0 %v10260_v16  ;;  %v10291_v16 = vld [vmem:[%s10838_s17 + $0xe80] ss:$24 sps:$4 sm:$0xff]  }
 0x341   : > { %7497 = vmatpush1.bf16.msra.mxu1 %v9021_v17  ;;  %v10296_v17 = vld [vmem:[%s10838_s17 + $0xeb4] ss:$24 sps:$4 sm:$0xff]  }
 0x342   : > { %7498 = vmatprep.subr.bf16.mxu1 %v9030_v18  ;;  %v10294_v18 = vld [vmem:[%s10838_s17 + $0xeb0] ss:$24 sps:$4 sm:$0xff]  }
 0x343   : > { %4977 = vmatpush1.bf16.msra.mxu0 %v10258_v19  ;;  %v10299_v19 = vld [vmem:[%s10838_s17 + $0xee4] ss:$24 sps:$4 sm:$0xff]  }
 0x344   : > { %4978 = vmatprep.subr.bf16.mxu0 %v10263_v24  ;;  %v10300_v24 = vld [vmem:[%s10838_s17 + $0xf10] ss:$24 sps:$4 sm:$0xff]  }
 0x345   : > { %7499 = vmatpush1.bf16.msra.mxu1 %v9029_v25  ;;  %v10305_v25 = vld [vmem:[%s10838_s17 + $0xf44] ss:$24 sps:$4 sm:$0xff]  }
 0x346   : > { %7500 = vmatprep.subr.bf16.mxu1 %v9038_v26  ;;  %v10405_v26 = vld [vmem:[%s12296_s0 + $0x20] ss:$52 sps:$4 sm:$0x1f]  }
 0x347   : > { %4979 = vmatpush1.bf16.msra.mxu0 %v10261_v27  ;;  %v10303_v27 = vld [vmem:[%s10838_s17 + $0xf40] ss:$24 sps:$4 sm:$0xff]  }
 0x348   : > { %4980 = vmatprep.subr.bf16.mxu0 %v10266_v33  ;;  %v10306_v33 = vld [vmem:[%s10838_s17 + $0xf70] ss:$24 sps:$4 sm:$0xff]  }
 0x349   : > { %7501 = vmatpush1.bf16.msra.mxu1 %v9037_v34  ;;  %v10311_v34 = vld [vmem:[%s10838_s17 + $0xfa4] ss:$24 sps:$4 sm:$0xff]  }
 0x34a   : > { %7502 = vmatprep.subr.bf16.mxu1 %v9046_v35  ;;  %v10309_v35 = vld [vmem:[%s10838_s17 + $0xfa0] ss:$24 sps:$4 sm:$0xff]  }
 0x34b   : > { %4981 = vmatpush1.bf16.msra.mxu0 %v10264_v36  ;;  %v10314_v36 = vld [vmem:[%s10838_s17 + $0xfd4] ss:$24 sps:$4 sm:$0xff]  }
 0x34c   : > { %4982 = vmatprep.subr.bf16.mxu0 %v10269_v42  ;;  %v10315_v42 = vld [vmem:[%s10838_s17 + $0x1000] ss:$24 sps:$4 sm:$0xff]  }
 0x34d   : > { %7503 = vmatpush1.bf16.msra.mxu1 %v9045_v45  ;;  %v10320_v45 = vld [vmem:[%s10838_s17 + $0x1034] ss:$24 sps:$4 sm:$0xff]  }
 0x34e   : > { %7504 = vmatprep.subr.bf16.mxu1 %v9054_v49  ;;  %v10318_v49 = vld [vmem:[%s10838_s17 + $0x1030] ss:$24 sps:$4 sm:$0xff]  }
 0x34f   : > { %4983 = vmatpush1.bf16.msra.mxu0 %v10267_v50  ;;  %v10323_v50 = vld [vmem:[%s10838_s17 + $0x1064] ss:$24 sps:$4 sm:$0xff]  }
 0x350   : > { %4984 = vmatprep.subr.bf16.mxu0 %v10272_v44  ;;  %v10324_v44 = vld [vmem:[%s10838_s17 + $0x1090] ss:$24 sps:$4 sm:$0xff]  }
 0x351   : > { %7505 = vmatpush1.bf16.msra.mxu1 %v9053_v47  ;;  %v10329_v47 = vld [vmem:[%s10838_s17 + $0x10c4] ss:$24 sps:$4 sm:$0xff]  }
 0x352   : > { %7506 = vmatprep.subr.bf16.mxu1 %v9062_v52  ;;  %v10327_v52 = vld [vmem:[%s10838_s17 + $0x10c0] ss:$24 sps:$4 sm:$0xff]  }
 0x353   : > { %4985 = vmatpush1.bf16.msra.mxu0 %v10270_v53  ;;  %v10332_v53 = vld [vmem:[%s10838_s17 + $0x10f4] ss:$24 sps:$4 sm:$0xff]  }
 0x354   : > { %4986 = vmatprep.subr.bf16.mxu0 %v10275_v56  ;;  %v10333_v56 = vld [vmem:[%s10838_s17 + $0x1120] ss:$24 sps:$4 sm:$0xff]  }
 0x355   : > { %7507 = vmatpush1.bf16.msra.mxu1 %v9061_v57  ;;  %v10338_v57 = vld [vmem:[%s10838_s17 + $0x1154] ss:$24 sps:$4 sm:$0xff]  }
 0x356   : > { %7508 = vmatprep.subr.bf16.mxu1 %v9070_v58  ;;  %v10336_v58 = vld [vmem:[%s10838_s17 + $0x1150] ss:$24 sps:$4 sm:$0xff]  }
 0x357   : > { %4987 = vmatpush1.bf16.msra.mxu0 %v10273_v59  ;;  %v10341_v59 = vld [vmem:[%s10838_s17 + $0x1184] ss:$24 sps:$4 sm:$0xff]  }
 0x358   : > { %4988 = vmatprep.subr.bf16.mxu0 %v10278_v62  ;;  %v10342_v62 = vld [vmem:[%s10838_s17 + $0x11b0] ss:$24 sps:$4 sm:$0xff]  }
 0x359   : > { %7509 = vmatpush1.bf16.msra.mxu1 %v9069_v63  ;;  %v10347_v63 = vld [vmem:[%s10838_s17 + $0x11e4] ss:$24 sps:$4 sm:$0xff]  }
 0x35a   : > { %7510 = vmatprep.subr.bf16.mxu1 %v9078_v0  ;;  %v10345_v0 = vld [vmem:[%s10838_s17 + $0x11e0] ss:$24 sps:$4 sm:$0xff]  }
 0x35b   : > { %4989 = vmatpush1.bf16.msra.mxu0 %v10276_v1  ;;  %v10350_v1 = vld [vmem:[%s10838_s17 + $0x1214] ss:$24 sps:$4 sm:$0xff]  }
 0x35c   : > { %4990 = vmatprep.subr.bf16.mxu0 %v10281_v4  ;;  %v10407_v4 = vld [vmem:[%s12296_s0 + $0x28] ss:$52 sps:$4 sm:$0x1f]  }
 0x35d   : > { %7511 = vmatpush1.bf16.msra.mxu1 %v9077_v5  ;;  %v10351_v5 = vld [vmem:[%s10838_s17 + $0x1240] ss:$24 sps:$4 sm:$0xff]  }
 0x35e   : > { %7512 = vmatprep.subr.bf16.mxu1 %v9086_v6  ;;  %v10356_v6 = vld [vmem:[%s10838_s17 + $0x1274] ss:$24 sps:$4 sm:$0xff]  }
 0x35f   : > { %4991 = vmatpush1.bf16.msra.mxu0 %v10279_v7  ;;  %v10354_v7 = vld [vmem:[%s10838_s17 + $0x1270] ss:$24 sps:$4 sm:$0xff]  }
 0x360   : > { %4992 = vmatprep.subr.bf16.mxu0 %v10284_v8  ;;  %v10359_v8 = vld [vmem:[%s10838_s17 + $0x12a4] ss:$24 sps:$4 sm:$0xff]  }
 0x361   : > { %7513 = vmatpush1.bf16.msra.mxu1 %v9085_v9  ;;  %v10357_v9 = vld [vmem:[%s10838_s17 + $0x12a0] ss:$24 sps:$4 sm:$0xff]  }
 0x363   : > { %4993 = vmatpush1.bf16.msra.mxu0 %v10282_v10  ;;  %v10362_v10 = vld [vmem:[%s10838_s17 + $0x12d4] ss:$24 sps:$4 sm:$0xff]  }
 0x364   : > { %7515 = vmatmul.mubr.bf16.vlgmr.msra.gmra.mrb[4].mxu1 %v11565_v29  ;;  %4994 = vmatprep.subr.bf16.mxu0 %v10287_v11  ;;  %v10360_v11 = vld [vmem:[%s10838_s17 + $0x12d0] ss:$24 sps:$4 sm:$0xff]  }
 0x367   : > { %4995 = vmatpush1.bf16.msra.mxu0 %v10285_v12  ;;  %v10363_v12 = vld [vmem:[%s10838_s17 + $0x1300] ss:$24 sps:$4 sm:$0xff]  }
 0x368   : > { %4996 = vmatprep.subr.bf16.mxu0 %v10290_v13  ;;  %v10368_v13 = vld [vmem:[%s10838_s17 + $0x1334] ss:$24 sps:$4 sm:$0xff]  }
 0x36b   : > { %4997 = vmatpush1.bf16.msra.mxu0 %v10288_v14  ;;  %v10366_v14 = vld [vmem:[%s10838_s17 + $0x1330] ss:$24 sps:$4 sm:$0xff]  }
 0x36c   : > { %4998 = vmatprep.subr.bf16.mxu0 %v10293_v15  ;;  %v10371_v15 = vld [vmem:[%s10838_s17 + $0x1364] ss:$24 sps:$4 sm:$0xff]  }
 0x36f   : > { %4999 = vmatpush1.bf16.msra.mxu0 %v10291_v16  ;;  %v5138_v16 = vld [vmem:[%s10851_s18 + $0x18] sm:$0xff] }
 0x370   : > { %5000 = vmatprep.subr.bf16.mxu0 %v10296_v17  ;;  %v5142_v17 = vld [vmem:[%s10851_s18 + $0x38] sm:$0xff] }
 0x373   : > { %5001 = vmatpush1.bf16.msra.mxu0 %v10294_v18  ;;  %v10369_v18 = vld [vmem:[%s10838_s17 + $0x1360] ss:$24 sps:$4 sm:$0xff]  }
 0x374   : > { %5002 = vmatprep.subr.bf16.mxu0 %v10299_v19  ;;  %v8844_v19 = vcombine.high %v5138_v16, %v5142_v17 }
 0x377   : > { %5003 = vmatpush1.bf16.msra.mxu0 %v10297_v20  ;;  %v5146_v20 = vld [vmem:[%s10851_s18 + $0x58] sm:$0xff] }
 0x378   : > { %5015 = vmatprep.subr.bf16.mxu0 %v10302_v21  ;;  %v5150_v21 = vld [vmem:[%s10851_s18 + $0x78] sm:$0xff] }
 0x37a   : > { %5005 = vmatmul.mubr.bf16.vlgmr.msra.gmra.mrb[4].mxu0 %v10405_v26  ;;  %v5154_v26 = vld [vmem:[%s10851_s18 + $0x98] sm:$0xff] }
 0x37b   : > { %5016 = vmatpush1.bf16.msra.mxu0 %v10300_v24  ;;  %5047 = vmatprep.mubr.bf16.mxu0 %v10406_v28  ;;  %v8843_v24 = vcombine.low %v5138_v16, %v5142_v17  ;;  %v10408_v28 = vld [vmem:[%s12296_s0 + $0x30] ss:$52 sps:$4 sm:$0x1f]  }
 0x37c   : > { %5017 = vmatprep.subr.bf16.mxu0 %v10305_v25  ;;  %v8852_v25 = vcombine.high %v5146_v20, %v5150_v21  ;;  %v5439_v17 = vld [vmem:[%s10851_s18 + $0x980] sm:$0xff] }
 0x37f   : > { %5018 = vmatpush1.bf16.msra.mxu0 %v10303_v27  ;;  %v5158_v27 = vld [vmem:[%s10851_s18 + $0xb8] sm:$0xff] }
 0x380   : > { %5019 = vmatprep.subr.bf16.mxu0 %v10308_v30  ;;  %v5391_v30 = vld [vmem:[%s10851_s18 + $0x800] sm:$0xff] }
 0x383   : > { %5020 = vmatpush1.bf16.msra.mxu0 %v10306_v33  ;;  %v5395_v33 = vld [vmem:[%s10851_s18 + $0x820] sm:$0xff] }
 0x384   : > { %5021 = vmatprep.subr.bf16.mxu0 %v10311_v34  ;;  %v8851_v34 = vcombine.low %v5146_v20, %v5150_v21  ;;  %v5202_v21 = vld [vmem:[%s10851_s18 + $0x218] sm:$0xff] }
 0x387   : > { %5022 = vmatpush1.bf16.msra.mxu0 %v10309_v35  ;;  %v9093_v35 = vcombine.low %v5391_v30, %v5395_v33 }
 0x388   : > { %5023 = vmatprep.subr.bf16.mxu0 %v10314_v36  ;;  %v9094_v36 = vcombine.high %v5391_v30, %v5395_v33 }
 0x38a   : > { %7525 = vmatprep.subr.bf16.mxu1 %v9094_v36 }
 0x38b   : > { %5024 = vmatpush1.bf16.msra.mxu0 %v10312_v38  ;;  %v5399_v38 = vld [vmem:[%s10851_s18 + $0x840] sm:$0xff]  ;;  %7526 = vmatpush1.bf16.msra.mxu1 %v9093_v35  ;;  %v5214_v35 = vld [vmem:[%s10851_s18 + $0x278] sm:$0xff] }
 0x38c   : > { %5025 = vmatprep.subr.bf16.mxu0 %v10317_v39  ;;  %v5403_v39 = vld [vmem:[%s10851_s18 + $0x860] sm:$0xff] }
 0x38f   : > { %5026 = vmatpush1.bf16.msra.mxu0 %v10315_v42  ;;  %v8860_v42 = vcombine.high %v5154_v26, %v5158_v27 }
 0x390   : > { %5027 = vmatprep.subr.bf16.mxu0 %v10320_v45  ;;  %v9102_v45 = vcombine.high %v5399_v38, %v5403_v39 }
 0x392   : > { %7527 = vmatprep.subr.bf16.mxu1 %v9102_v45 }
 0x393   : > { %5028 = vmatpush1.bf16.msra.mxu0 %v10318_v49  ;;  %v5162_v49 = vld [vmem:[%s10851_s18 + $0xd8] sm:$0xff] }
 0x394   : > { %5029 = vmatprep.subr.bf16.mxu0 %v10323_v50  ;;  %v5166_v50 = vld [vmem:[%s10851_s18 + $0xf8] sm:$0xff] }
 0x397   : > { %5030 = vmatpush1.bf16.msra.mxu0 %v10321_v51  ;;  %v9101_v51 = vcombine.low %v5399_v38, %v5403_v39  ;;  %v5455_v39 = vld [vmem:[%s10851_s18 + $0xa00] sm:$0xff] }
 0x398   : > { %5031 = vmatprep.subr.bf16.mxu0 %v10326_v43  ;;  %v8859_v43 = vcombine.low %v5154_v26, %v5158_v27  ;;  %v5447_v27 = vld [vmem:[%s10851_s18 + $0x9c0] sm:$0xff] }
 0x399   : > { %7528 = vmatpush1.bf16.msra.mxu1 %v9101_v51  ;;  %v5222_v51 = vld [vmem:[%s10851_s18 + $0x2b8] sm:$0xff] }
 0x39b   : > { %5032 = vmatpush1.bf16.msra.mxu0 %v10324_v44  ;;  %v5407_v44 = vld [vmem:[%s10851_s18 + $0x880] sm:$0xff] }
 0x39c   : > { %5033 = vmatprep.subr.bf16.mxu0 %v10329_v47  ;;  %v5411_v47 = vld [vmem:[%s10851_s18 + $0x8a0] sm:$0xff] }
 0x39f   : > { %5034 = vmatpush1.bf16.msra.mxu0 %v10327_v52  ;;  %v8868_v52 = vcombine.high %v5162_v49, %v5166_v50 }
 0x3a0   : > { %5035 = vmatprep.subr.bf16.mxu0 %v10332_v53  ;;  %v9110_v53 = vcombine.high %v5407_v44, %v5411_v47 }
 0x3a2   : > { %7529 = vmatprep.subr.bf16.mxu1 %v9110_v53 }
 0x3a3   : > { %5036 = vmatpush1.bf16.msra.mxu0 %v10330_v54  ;;  %v5170_v54 = vld [vmem:[%s10851_s18 + $0x118] sm:$0xff] }
 0x3a4   : > { %5037 = vmatprep.subr.bf16.mxu0 %v10335_v55  ;;  %v5174_v55 = vld [vmem:[%s10851_s18 + $0x138] sm:$0xff] }
 0x3a7   : > { %5038 = vmatpush1.bf16.msra.mxu0 %v10333_v56  ;;  %v9109_v56 = vcombine.low %v5407_v44, %v5411_v47  ;;  %v5463_v47 = vld [vmem:[%s10851_s18 + $0xa40] sm:$0xff] }
 0x3a8   : > { %5039 = vmatprep.subr.bf16.mxu0 %v10338_v57  ;;  %v8867_v57 = vcombine.low %v5162_v49, %v5166_v50  ;;  %v5218_v50 = vld [vmem:[%s10851_s18 + $0x298] sm:$0xff] }
 0x3a9   : > { %7530 = vmatpush1.bf16.msra.mxu1 %v9109_v56  ;;  %v8924_v53 = vcombine.high %v5218_v50, %v5222_v51  ;;  %v5230_v56 = vld [vmem:[%s10851_s18 + $0x2f8] sm:$0xff] }
 0x3ab   : > { %5040 = vmatpush1.bf16.msra.mxu0 %v10336_v58  ;;  %v5415_v58 = vld [vmem:[%s10851_s18 + $0x8c0] sm:$0xff] }
 0x3ac   : > { %5041 = vmatprep.subr.bf16.mxu0 %v10341_v59  ;;  %v5419_v59 = vld [vmem:[%s10851_s18 + $0x8e0] sm:$0xff] }
 0x3af   : > { %5042 = vmatpush1.bf16.msra.mxu0 %v10339_v60  ;;  %v8876_v60 = vcombine.high %v5170_v54, %v5174_v55 }
 0x3b0   : > { %5043 = vmatprep.subr.bf16.mxu0 %v10344_v61  ;;  %v9118_v61 = vcombine.high %v5415_v58, %v5419_v59 }
 0x3b2   : > { %7531 = vmatprep.subr.bf16.mxu1 %v9118_v61 }
 0x3b3   : > { %5044 = vmatpush1.bf16.msra.mxu0 %v10342_v62  ;;  %v5178_v62 = vld [vmem:[%s10851_s18 + $0x158] sm:$0xff] }
 0x3b4   : > { %5045 = vmatprep.subr.bf16.mxu0 %v10347_v63  ;;  %v5182_v63 = vld [vmem:[%s10851_s18 + $0x178] sm:$0xff] }
 0x3b7   : > { %5046 = vmatpush1.bf16.msra.mxu0 %v10345_v0  ;;  %v9117_v0 = vcombine.low %v5415_v58, %v5419_v59  ;;  %v8923_v58 = vcombine.low %v5218_v50, %v5222_v51  ;;  %v5471_v59 = vld [vmem:[%s10851_s18 + $0xa80] sm:$0xff] }
 0x3b8   : > { %5058 = vmatprep.subr.bf16.mxu0 %v10350_v1  ;;  %v8875_v1 = vcombine.low %v5170_v54, %v5174_v55  ;;  %v5226_v55 = vld [vmem:[%s10851_s18 + $0x2d8] sm:$0xff] }
 0x3b9   : > { %7532 = vmatpush1.bf16.msra.mxu1 %v9117_v0  ;;  %v8932_v61 = vcombine.high %v5226_v55, %v5230_v56  ;;  %v5238_v0 = vld [vmem:[%s10851_s18 + $0x338] sm:$0xff] }
 0x3ba   : > { %5048 = vmatmul.mubr.bf16.vlgmr.msra.gmra.mrb[4].mxu0 %v10407_v4  ;;  %v8884_v4 = vcombine.high %v5178_v62, %v5182_v63 }
 0x3bb   : > { %5059 = vmatpush1.bf16.msra.mxu0 %v10348_v2  ;;  %5090 = vmatprep.mubr.bf16.mxu0 %v10613_v23  ;;  %v10365_v23 = vld [vmem:[%s10838_s17 + $0x1304] ss:$24 sps:$4 sm:$0xff]   ;;  %v5423_v2 = vld [vmem:[%s10851_s18 + $0x900] sm:$0xff] }
 0x3bc   : > { %5060 = vmatprep.subr.bf16.mxu0 %v10353_v3  ;;  %v5427_v3 = vld [vmem:[%s10851_s18 + $0x920] sm:$0xff] }
 0x3bf   : > { %5061 = vmatpush1.bf16.msra.mxu0 %v10351_v5  ;;  %v9126_v5 = vcombine.high %v5423_v2, %v5427_v3 }
 0x3c0   : > { %5062 = vmatprep.subr.bf16.mxu0 %v10356_v6  ;;  %v5186_v6 = vld [vmem:[%s10851_s18 + $0x198] sm:$0xff] }
 0x3c1   : > { %7533 = vmatprep.subr.bf16.mxu1 %v9126_v5 }
 0x3c3   : > { %5063 = vmatpush1.bf16.msra.mxu0 %v10354_v7  ;;  %v5190_v7 = vld [vmem:[%s10851_s18 + $0x1b8] sm:$0xff] }
 0x3c4   : > { %5064 = vmatprep.subr.bf16.mxu0 %v10359_v8  ;;  %v9125_v8 = vcombine.low %v5423_v2, %v5427_v3  ;;  %v8891_v16 = vcombine.low %v5186_v6, %v5190_v7  ;;  %v8931_v2 = vcombine.low %v5226_v55, %v5230_v56  ;;  %v5479_v3 = vld [vmem:[%s10851_s18 + $0xac0] sm:$0xff] }
 0x3c6   : > { %7534 = vmatpush1.bf16.msra.mxu1 %v9125_v8  ;;  %v5246_v8 = vld [vmem:[%s10851_s18 + $0x378] sm:$0xff] }
 0x3c7   : > { %5065 = vmatpush1.bf16.msra.mxu0 %v10357_v9  ;;  %v8883_v9 = vcombine.low %v5178_v62, %v5182_v63  ;;  %v5234_v63 = vld [vmem:[%s10851_s18 + $0x318] sm:$0xff] }
 0x3c8   : > { %5066 = vmatprep.subr.bf16.mxu0 %v10362_v10  ;;  %v5431_v10 = vld [vmem:[%s10851_s18 + $0x940] sm:$0xff]  ;;  %v8940_v5 = vcombine.high %v5234_v63, %v5238_v0 }
 0x3cb   : > { %5067 = vmatpush1.bf16.msra.mxu0 %v10360_v11  ;;  %v5435_v11 = vld [vmem:[%s10851_s18 + $0x960] sm:$0xff] }
 0x3cc   : > { %5068 = vmatprep.subr.bf16.mxu0 %v10365_v23  ;;  %v8892_v23 = vcombine.high %v5186_v6, %v5190_v7  ;;  %v5242_v7 = vld [vmem:[%s10851_s18 + $0x358] sm:$0xff] }
 0x3cf   : > { %5069 = vmatpush1.bf16.msra.mxu0 %v10363_v12  ;;  %v9134_v12 = vcombine.high %v5431_v10, %v5435_v11 }
 0x3d0   : > { %5070 = vmatprep.subr.bf16.mxu0 %v10368_v13  ;;  %v5194_v13 = vld [vmem:[%s10851_s18 + $0x1d8] sm:$0xff] }
 0x3d1   : > { %7535 = vmatprep.subr.bf16.mxu1 %v9134_v12  ;;  %v5254_v12 = vld [vmem:[%s10851_s18 + $0x3b8] sm:$0xff] }
 0x3d3   : > { %5071 = vmatpush1.bf16.msra.mxu0 %v10366_v14  ;;  %v5198_v14 = vld [vmem:[%s10851_s18 + $0x1f8] sm:$0xff] }
 0x3d4   : > { %5072 = vmatprep.subr.bf16.mxu0 %v10371_v15  ;;  %v9133_v15 = vcombine.low %v5431_v10, %v5435_v11  ;;  %v8899_v26 = vcombine.low %v5194_v13, %v5198_v14  ;;  %v8939_v10 = vcombine.low %v5234_v63, %v5238_v0  ;;  %v8948_v11 = vcombine.high %v5242_v7, %v5246_v8  ;;  %v5487_v63 = vld [vmem:[%s10851_s18 + $0xb00] sm:$0xff] }
 0x3d5   : > { %v5491_v0 = vld [vmem:[%s10851_s18 + $0xb20] sm:$0xff] }
 0x3d6   : > { %7536 = vmatpush1.bf16.msra.mxu1 %v9133_v15  ;;  %v5258_v15 = vld [vmem:[%s10851_s18 + $0x3d8] sm:$0xff] }
 0x3d7   : > { %5073 = vmatpush1.bf16.msra.mxu0 %v10369_v18  ;;  %v5443_v18 = vld [vmem:[%s10851_s18 + $0x9a0] sm:$0xff] }
 0x3d8   : > { %7826 = vmatprep.subr.bf16.mxu0 %v8844_v19  ;;  %v8900_v19 = vcombine.high %v5194_v13, %v5198_v14  ;;  %v9142_v20 = vcombine.high %v5439_v17, %v5443_v18  ;;  %v8947_v13 = vcombine.low %v5242_v7, %v5246_v8  ;;  %v5503_v8 = vld [vmem:[%s10851_s18 + $0xb80] sm:$0xff] }
 0x3da   : > { %5091 = vmatmul.mubr.bf16.vlgmr.msra.gmra.mrb[4].mxu0 %v10408_v28  ;;  %7537 = vmatprep.subr.bf16.mxu1 %v9142_v20  ;;  %v5451_v28 = vld [vmem:[%s10851_s18 + $0x9e0] sm:$0xff]  ;;  %v5270_v20 = vld [vmem:[%s10851_s18 + $0x438] sm:$0xff] }
 0x3db   : > { %7827 = vmatpush1.bf16.msra.mxu0 %v8843_v24  ;;  %7858 = vmatprep.mubr.bf16.mxu0 %v11567_v31  ;;  %v5206_v24 = vld [vmem:[%s10851_s18 + $0x238] sm:$0xff]  ;;  %v9150_v33 = vcombine.high %v5447_v27, %v5451_v28  ;;  %v9149_v36 = vcombine.low %v5447_v27, %v5451_v28 }
 0x3dc   : > { %7828 = vmatprep.subr.bf16.mxu0 %v8852_v25  ;;  %v9141_v25 = vcombine.low %v5439_v17, %v5443_v18  ;;  %v8908_v30 = vcombine.high %v5202_v21, %v5206_v24  ;;  %v8907_v38 = vcombine.low %v5202_v21, %v5206_v24 }
 0x3de   : > { %7538 = vmatpush1.bf16.msra.mxu1 %v9141_v25  ;;  %v5274_v25 = vld [vmem:[%s10851_s18 + $0x458] sm:$0xff] }
 0x3df   : > { %7829 = vmatpush1.bf16.msra.mxu0 %v8851_v34  ;;  %v5210_v34 = vld [vmem:[%s10851_s18 + $0x258] sm:$0xff]  ;;  %7539 = vmatprep.subr.bf16.mxu1 %v9150_v33 }
 0x3e0   : > { %7830 = vmatprep.subr.bf16.mxu0 %v8860_v42  ;;  %v5459_v42 = vld [vmem:[%s10851_s18 + $0xa20] sm:$0xff]  ;;  %v8916_v45 = vcombine.high %v5210_v34, %v5214_v35  ;;  %v8915_v44 = vcombine.low %v5210_v34, %v5214_v35  ;;  %v5286_v33 = vld [vmem:[%s10851_s18 + $0x4b8] sm:$0xff] }
 0x3e1   : > { %v9158_v49 = vcombine.high %v5455_v39, %v5459_v42 }
 0x3e2   : > { %7540 = vmatpush1.bf16.msra.mxu1 %v9149_v36  ;;  %v5290_v36 = vld [vmem:[%s10851_s18 + $0x4d8] sm:$0xff] }
 0x3e3   : > { %7831 = vmatpush1.bf16.msra.mxu0 %v8859_v43  ;;  %v9157_v43 = vcombine.low %v5455_v39, %v5459_v42  ;;  %7541 = vmatprep.subr.bf16.mxu1 %v9158_v49  ;;  %v5302_v49 = vld [vmem:[%s10851_s18 + $0x538] sm:$0xff] }
 0x3e4   : > { %7832 = vmatprep.subr.bf16.mxu0 %v8868_v52  ;;  %v5467_v52 = vld [vmem:[%s10851_s18 + $0xa60] sm:$0xff] }
 0x3e5   : > { %v9166_v54 = vcombine.high %v5463_v47, %v5467_v52 }
 0x3e6   : > { %7542 = vmatpush1.bf16.msra.mxu1 %v9157_v43  ;;  %v5306_v43 = vld [vmem:[%s10851_s18 + $0x558] sm:$0xff] }
 0x3e7   : > { %7833 = vmatpush1.bf16.msra.mxu0 %v8867_v57  ;;  %v9165_v57 = vcombine.low %v5463_v47, %v5467_v52  ;;  %7543 = vmatprep.subr.bf16.mxu1 %v9166_v54  ;;  %v5318_v54 = vld [vmem:[%s10851_s18 + $0x5b8] sm:$0xff] }
 0x3e8   : > { %7834 = vmatprep.subr.bf16.mxu0 %v8876_v60  ;;  %v5475_v60 = vld [vmem:[%s10851_s18 + $0xaa0] sm:$0xff] }
 0x3e9   : > { %v9174_v62 = vcombine.high %v5471_v59, %v5475_v60 }
 0x3ea   : > { %7544 = vmatpush1.bf16.msra.mxu1 %v9165_v57  ;;  %v5322_v57 = vld [vmem:[%s10851_s18 + $0x5d8] sm:$0xff] }
 0x3eb   : > { %7835 = vmatpush1.bf16.msra.mxu0 %v8875_v1  ;;  %v9173_v1 = vcombine.low %v5471_v59, %v5475_v60  ;;  %7545 = vmatprep.subr.bf16.mxu1 %v9174_v62  ;;  %v5334_v62 = vld [vmem:[%s10851_s18 + $0x638] sm:$0xff] }
 0x3ec   : > { %7836 = vmatprep.subr.bf16.mxu0 %v8884_v4  ;;  %v5483_v4 = vld [vmem:[%s10851_s18 + $0xae0] sm:$0xff] }
 0x3ed   : > { %v9182_v6 = vcombine.high %v5479_v3, %v5483_v4 }
 0x3ee   : > { %7546 = vmatpush1.bf16.msra.mxu1 %v9173_v1  ;;  %v9190_v1 = vcombine.high %v5487_v63, %v5491_v0 }
 0x3ef   : > { %7837 = vmatpush1.bf16.msra.mxu0 %v8883_v9  ;;  %v9181_v9 = vcombine.low %v5479_v3, %v5483_v4  ;;  %7547 = vmatprep.subr.bf16.mxu1 %v9182_v6  ;;  %v9189_v3 = vcombine.low %v5487_v63, %v5491_v0  ;;  %v5495_v4 = vld [vmem:[%s10851_s18 + $0xb40] sm:$0xff]  ;;  %v5406_v63 = vld [vmem:[%s10851_s18 + $0x878] sm:$0xff] }
 0x3f0   : > { %7838 = vmatprep.subr.bf16.mxu0 %v8892_v23  ;;  %v5250_v23 = vld [vmem:[%s10851_s18 + $0x398] sm:$0xff] }
 0x3f1   : > { %v8956_v14 = vcombine.high %v5250_v23, %v5254_v12  ;;  %v8955_v17 = vcombine.low %v5250_v23, %v5254_v12 }
 0x3f2   : > { %7548 = vmatpush1.bf16.msra.mxu1 %v9181_v9  ;;  %v5507_v9 = vld [vmem:[%s10851_s18 + $0xba0] sm:$0xff] }
 0x3f3   : > { %7839 = vmatpush1.bf16.msra.mxu0 %v8891_v16  ;;  %v5262_v16 = vld [vmem:[%s10851_s18 + $0x3f8] sm:$0xff]  ;;  %7549 = vmatprep.subr.bf16.mxu1 %v9190_v1  ;;  %v9206_v12 = vcombine.high %v5503_v8, %v5507_v9 }
 0x3f4   : > { %7840 = vmatprep.subr.bf16.mxu0 %v8900_v19  ;;  %v8964_v18 = vcombine.high %v5258_v15, %v5262_v16  ;;  %v5266_v19 = vld [vmem:[%s10851_s18 + $0x418] sm:$0xff]  ;;  %v8963_v21 = vcombine.low %v5258_v15, %v5262_v16  ;;  %v5515_v15 = vld [vmem:[%s10851_s18 + $0xbe0] sm:$0xff] }
 0x3f5   : > { %v8972_v24 = vcombine.high %v5266_v19, %v5270_v20  ;;  %v8971_v27 = vcombine.low %v5266_v19, %v5270_v20  ;;  %v9205_v19 = vcombine.low %v5503_v8, %v5507_v9 }
 0x3f6   : > { %7550 = vmatpush1.bf16.msra.mxu1 %v9189_v3  ;;  %v5414_v3 = vld [vmem:[%s10851_s18 + $0x8b8] sm:$0xff] }
 0x3f7   : > { %7841 = vmatpush1.bf16.msra.mxu0 %v8899_v26  ;;  %v5278_v26 = vld [vmem:[%s10851_s18 + $0x478] sm:$0xff] }
 0x3f8   : > { %7842 = vmatprep.subr.bf16.mxu0 %v8908_v30  ;;  %v8980_v28 = vcombine.high %v5274_v25, %v5278_v26  ;;  %v5282_v30 = vld [vmem:[%s10851_s18 + $0x498] sm:$0xff]  ;;  %v8979_v34 = vcombine.low %v5274_v25, %v5278_v26 }
 0x3f9   : > { %v8988_v35 = vcombine.high %v5282_v30, %v5286_v33  ;;  %v8987_v39 = vcombine.low %v5282_v30, %v5286_v33  ;;  %v5354_v25 = vld [vmem:[%s10851_s18 + $0x6d8] sm:$0xff]  ;;  %v11806_v33 = vld [vmem:[%s10851_s18 + $0x8] sm:$0xff] }
 0x3fa   : > { %v5358_v26 = vld [vmem:[%s10851_s18 + $0x6f8] sm:$0xff] }
 0x3fb   : > { %7843 = vmatpush1.bf16.msra.mxu0 %v8907_v38  ;;  %v5294_v38 = vld [vmem:[%s10851_s18 + $0x4f8] sm:$0xff]  ;;  %v9060_v30 = vcombine.high %v5354_v25, %v5358_v26 }
 0x3fc   : > { %7844 = vmatprep.subr.bf16.mxu0 %v8916_v45  ;;  %v8996_v42 = vcombine.high %v5290_v36, %v5294_v38  ;;  %v5298_v45 = vld [vmem:[%s10851_s18 + $0x518] sm:$0xff]  ;;  %v8995_v50 = vcombine.low %v5290_v36, %v5294_v38 }
 0x3fd   : > { %v9004_v51 = vcombine.high %v5298_v45, %v5302_v49  ;;  %v9003_v47 = vcombine.low %v5298_v45, %v5302_v49  ;;  %v5366_v36 = vld [vmem:[%s10851_s18 + $0x738] sm:$0xff] }
 0x3fe   : > { %v5370_v49 = vld [vmem:[%s10851_s18 + $0x758] sm:$0xff] }
 0x3ff   : > { %7845 = vmatpush1.bf16.msra.mxu0 %v8915_v44  ;;  %v5310_v44 = vld [vmem:[%s10851_s18 + $0x578] sm:$0xff] }
 0x400   : > { %7846 = vmatprep.subr.bf16.mxu0 %v8924_v53  ;;  %v9012_v52 = vcombine.high %v5306_v43, %v5310_v44  ;;  %v5314_v53 = vld [vmem:[%s10851_s18 + $0x598] sm:$0xff]  ;;  %v9011_v55 = vcombine.low %v5306_v43, %v5310_v44 }
 0x401   : > { %v9020_v56 = vcombine.high %v5314_v53, %v5318_v54  ;;  %v9019_v59 = vcombine.low %v5314_v53, %v5318_v54  ;;  %v5378_v44 = vld [vmem:[%s10851_s18 + $0x798] sm:$0xff] }
 0x402   : > { %v5386_v54 = vld [vmem:[%s10851_s18 + $0x7d8] sm:$0xff] }
 0x403   : > { %7847 = vmatpush1.bf16.msra.mxu0 %v8923_v58  ;;  %v5326_v58 = vld [vmem:[%s10851_s18 + $0x5f8] sm:$0xff] }
 0x404   : > { %7848 = vmatprep.subr.bf16.mxu0 %v8932_v61  ;;  %v9028_v60 = vcombine.high %v5322_v57, %v5326_v58  ;;  %v5330_v61 = vld [vmem:[%s10851_s18 + $0x618] sm:$0xff] }
 0x405   : > { %v9036_v6 = vcombine.high %v5330_v61, %v5334_v62 }
 0x407   : > { %7849 = vmatpush1.bf16.msra.mxu0 %v8931_v2  ;;  %v9027_v2 = vcombine.low %v5322_v57, %v5326_v58  ;;  %v5394_v58 = vld [vmem:[%s10851_s18 + $0x818] sm:$0xff] }
 0x408   : > { %7850 = vmatprep.subr.bf16.mxu0 %v8940_v5  ;;  %v5499_v5 = vld [vmem:[%s10851_s18 + $0xb60] sm:$0xff] }
 0x409   : > { %v9198_v7 = vcombine.high %v5495_v4, %v5499_v5  ;;  %v9197_v23 = vcombine.low %v5495_v4, %v5499_v5 }
 0x40b   : > { %7851 = vmatpush1.bf16.msra.mxu0 %v8939_v10  ;;  %v5338_v10 = vld [vmem:[%s10851_s18 + $0x658] sm:$0xff]  ;;  %7551 = vmatprep.subr.bf16.mxu1 %v9198_v7 }
 0x40c   : > { %7852 = vmatprep.subr.bf16.mxu0 %v8948_v11  ;;  %v5342_v11 = vld [vmem:[%s10851_s18 + $0x678] sm:$0xff]  ;;  %7552 = vmatpush1.bf16.msra.mxu1 %v9197_v23 }
 0x40d   : > { %v9044_v16 = vcombine.high %v5338_v10, %v5342_v11  ;;  %7553 = vmatprep.subr.bf16.mxu1 %v9206_v12  ;;  %v5422_v7 = vld [vmem:[%s10851_s18 + $0x8f8] sm:$0xff] }
 0x40f   : > { %7853 = vmatpush1.bf16.msra.mxu0 %v8947_v13  ;;  %v9035_v13 = vcombine.low %v5330_v61, %v5334_v62  ;;  %v5402_v62 = vld [vmem:[%s10851_s18 + $0x858] sm:$0xff] }
 0x410   : > { %7854 = vmatprep.subr.bf16.mxu0 %v8956_v14  ;;  %v5511_v14 = vld [vmem:[%s10851_s18 + $0xbc0] sm:$0xff]  ;;  %7554 = vmatpush1.bf16.msra.mxu1 %v9205_v19  ;;  %v9108_v1 = vcombine.high %v5402_v62, %v5406_v63  ;;  %v9107_v4 = vcombine.low %v5402_v62, %v5406_v63  ;;  %v5506_v62 = vld [vmem:[%s10851_s18 + $0xb98] sm:$0xff] }
 0x411   : > { %v9214_v20 = vcombine.high %v5511_v14, %v5515_v15  ;;  %v5510_v63 = vld [vmem:[%s10851_s18 + $0xbb8] sm:$0xff] }
 0x413   : > { %7855 = vmatpush1.bf16.msra.mxu0 %v8955_v17  ;;  %v5346_v17 = vld [vmem:[%s10851_s18 + $0x698] sm:$0xff]  ;;  %7555 = vmatprep.subr.bf16.mxu1 %v9214_v20 }
 0x414   : > { %7856 = vmatprep.subr.bf16.mxu0 %v8964_v18  ;;  %v5350_v18 = vld [vmem:[%s10851_s18 + $0x6b8] sm:$0xff] }
 0x417   : > { %7857 = vmatpush1.bf16.msra.mxu0 %v8963_v21  ;;  %v9043_v21 = vcombine.low %v5338_v10, %v5342_v11  ;;  %v5426_v10 = vld [vmem:[%s10851_s18 + $0x918] sm:$0xff] }
 0x418   : > { %7869 = vmatprep.subr.bf16.mxu0 %v8972_v24  ;;  %v9052_v24 = vcombine.high %v5346_v17, %v5350_v18  ;;  %v5430_v11 = vld [vmem:[%s10851_s18 + $0x938] sm:$0xff] }
 0x419   : > { %v9132_v12 = vcombine.high %v5426_v10, %v5430_v11 }
 0x41a   : > { %7859 = vmatmul.mubr.bf16.vlgmr.msra.gmra.mrb[8].mxu0 %v11559_v22 }
 0x41b   : > { %7870 = vmatpush1.bf16.msra.mxu0 %v8971_v27  ;;  %7901 = vmatprep.mubr.bf16.mxu0 %v11569_v32  ;;  %v9213_v27 = vcombine.low %v5511_v14, %v5515_v15  ;;  %v5438_v14 = vld [vmem:[%s10851_s18 + $0x978] sm:$0xff]  ;;  %v9131_v15 = vcombine.low %v5426_v10, %v5430_v11 }
 0x41c   : > { %7871 = vmatprep.subr.bf16.mxu0 %v8980_v28  ;;  %v9051_v28 = vcombine.low %v5346_v17, %v5350_v18  ;;  %v5442_v17 = vld [vmem:[%s10851_s18 + $0x998] sm:$0xff] }
 0x41d   : > { %7556 = vmatpush1.bf16.msra.mxu1 %v9213_v27  ;;  %v5446_v18 = vld [vmem:[%s10851_s18 + $0x9b8] sm:$0xff] }
 0x41e   : > { %v9148_v20 = vcombine.high %v5442_v17, %v5446_v18  ;;  %v5458_v27 = vld [vmem:[%s10851_s18 + $0xa18] sm:$0xff] }
 0x41f   : > { %7872 = vmatpush1.bf16.msra.mxu0 %v8979_v34  ;;  %v11809_v34 = vld [vmem:[%s10851_s18 + $0x28] sm:$0xff] }
 0x420   : > { %7873 = vmatprep.subr.bf16.mxu0 %v8988_v35  ;;  %v5362_v35 = vld [vmem:[%s10851_s18 + $0x718] sm:$0xff]  ;;  %v8839_v38 = vcombine.low %v11806_v33, %v11809_v34 }
 0x421   : > { %v9068_v45 = vcombine.high %v5362_v35, %v5366_v36 }
 0x423   : > { %7874 = vmatpush1.bf16.msra.mxu0 %v8987_v39  ;;  %v8840_v39 = vcombine.high %v11806_v33, %v11809_v34 }
 0x424   : > { %7875 = vmatprep.subr.bf16.mxu0 %v8996_v42  ;;  %v9059_v42 = vcombine.low %v5354_v25, %v5358_v26  ;;  %v9147_v25 = vcombine.low %v5442_v17, %v5446_v18 }
 0x425   : > { %7568 = vmatprep.subr.bf16.mxu1 %v8840_v39  ;;  %v5470_v39 = vld [vmem:[%s10851_s18 + $0xa78] sm:$0xff] }
 0x427   : > { %7876 = vmatpush1.bf16.msra.mxu0 %v8995_v50  ;;  %v5374_v50 = vld [vmem:[%s10851_s18 + $0x778] sm:$0xff] }
 0x428   : > { %7877 = vmatprep.subr.bf16.mxu0 %v9004_v51  ;;  %v9067_v51 = vcombine.low %v5362_v35, %v5366_v36  ;;  %v9076_v43 = vcombine.high %v5370_v49, %v5374_v50  ;;  %v5466_v36 = vld [vmem:[%s10851_s18 + $0xa58] sm:$0xff] }
 0x42b   : > { %7878 = vmatpush1.bf16.msra.mxu0 %v9003_v47  ;;  %v5382_v47 = vld [vmem:[%s10851_s18 + $0x7b8] sm:$0xff] }
 0x42c   : > { %7879 = vmatprep.subr.bf16.mxu0 %v9012_v52  ;;  %v9075_v52 = vcombine.low %v5370_v49, %v5374_v50  ;;  %v9084_v53 = vcombine.high %v5378_v44, %v5382_v47  ;;  %v5474_v49 = vld [vmem:[%s10851_s18 + $0xa98] sm:$0xff] }
 0x42d   : > { %v5478_v50 = vld [vmem:[%s10851_s18 + $0xab8] sm:$0xff] }
 0x42f   : > { %7880 = vmatpush1.bf16.msra.mxu0 %v9011_v55  ;;  %v5390_v55 = vld [vmem:[%s10851_s18 + $0x7f8] sm:$0xff] }
 0x430   : > { %7881 = vmatprep.subr.bf16.mxu0 %v9020_v56  ;;  %v9083_v56 = vcombine.low %v5378_v44, %v5382_v47  ;;  %v9092_v57 = vcombine.high %v5386_v54, %v5390_v55  ;;  %v5482_v44 = vld [vmem:[%s10851_s18 + $0xad8] sm:$0xff] }
 0x431   : > { %v5486_v47 = vld [vmem:[%s10851_s18 + $0xaf8] sm:$0xff] }
 0x433   : > { %7882 = vmatpush1.bf16.msra.mxu0 %v9019_v59  ;;  %v5398_v59 = vld [vmem:[%s10851_s18 + $0x838] sm:$0xff] }
 0x434   : > { %7883 = vmatprep.subr.bf16.mxu0 %v9028_v60  ;;  %v9091_v60 = vcombine.low %v5386_v54, %v5390_v55  ;;  %v9100_v61 = vcombine.high %v5394_v58, %v5398_v59  ;;  %v9099_v0 = vcombine.low %v5394_v58, %v5398_v59  ;;  %v5490_v54 = vld [vmem:[%s10851_s18 + $0xb18] sm:$0xff] }
 0x435   : > { %v5494_v55 = vld [vmem:[%s10851_s18 + $0xb38] sm:$0xff] }
 0x436   : > { %v5498_v58 = vld [vmem:[%s10851_s18 + $0xb58] sm:$0xff] }
 0x437   : > { %7884 = vmatpush1.bf16.msra.mxu0 %v9027_v2  ;;  %v5410_v2 = vld [vmem:[%s10851_s18 + $0x898] sm:$0xff] }
 0x438   : > { %7885 = vmatprep.subr.bf16.mxu0 %v9036_v6  ;;  %v9116_v5 = vcombine.high %v5410_v2, %v5414_v3  ;;  %v5418_v6 = vld [vmem:[%s10851_s18 + $0x8d8] sm:$0xff]  ;;  %v9115_v8 = vcombine.low %v5410_v2, %v5414_v3 }
 0x439   : > { %v9124_v9 = vcombine.high %v5418_v6, %v5422_v7  ;;  %v9123_v23 = vcombine.low %v5418_v6, %v5422_v7  ;;  %v5502_v59 = vld [vmem:[%s10851_s18 + $0xb78] sm:$0xff]  ;;  %v1000_v7 = vsub.s32 4, %v11530_v37 }
 0x43a   : > { %v5514_v2 = vld [vmem:[%s10851_s18 + $0xbd8] sm:$0xff] }
 0x43b   : > { %7886 = vmatpush1.bf16.msra.mxu0 %v9035_v13  ;;  %v5434_v13 = vld [vmem:[%s10851_s18 + $0x958] sm:$0xff] }
 0x43c   : > { %7887 = vmatprep.subr.bf16.mxu0 %v9044_v16  ;;  %v9140_v16 = vcombine.high %v5434_v13, %v5438_v14  ;;  %v9139_v19 = vcombine.low %v5434_v13, %v5438_v14  ;;  %v5518_v3 = vld [vmem:[%s10851_s18 + $0xbf8] sm:$0xff] }
 0x43d   : > { %v9219_v6 = vcombine.low %v5514_v2, %v5518_v3 }
 0x43f   : > { %7888 = vmatpush1.bf16.msra.mxu0 %v9043_v21  ;;  %v5450_v21 = vld [vmem:[%s10851_s18 + $0x9d8] sm:$0xff] }
 0x440   : > { %7889 = vmatprep.subr.bf16.mxu0 %v9052_v24  ;;  %v5454_v24 = vld [vmem:[%s10851_s18 + $0x9f8] sm:$0xff] }
 0x441   : > { %v9156_v26 = vcombine.high %v5450_v21, %v5454_v24 }
 0x443   : > { %7890 = vmatpush1.bf16.msra.mxu0 %v9051_v28  ;;  %v5462_v28 = vld [vmem:[%s10851_s18 + $0xa38] sm:$0xff] }
 0x444   : > { %7891 = vmatprep.subr.bf16.mxu0 %v9060_v30  ;;  %v9155_v30 = vcombine.low %v5450_v21, %v5454_v24  ;;  %v9164_v35 = vcombine.high %v5458_v27, %v5462_v28  ;;  %v5144_v24 = vld [vmem:[%s10851_s18 + $0x48] sm:$0xff] }
 0x447   : > { %7892 = vmatpush1.bf16.msra.mxu0 %v9059_v42  ;;  %v9163_v42 = vcombine.low %v5458_v27, %v5462_v28 }
 0x448   : > { %7893 = vmatprep.subr.bf16.mxu0 %v9068_v45  ;;  %v9172_v45 = vcombine.high %v5466_v36, %v5470_v39 }
 0x44b   : > { %7894 = vmatpush1.bf16.msra.mxu0 %v9067_v51  ;;  %v9171_v51 = vcombine.low %v5466_v36, %v5470_v39  ;;  %v5156_v36 = vld [vmem:[%s10851_s18 + $0xa8] sm:$0xff] }
 0x44c   : > { %7895 = vmatprep.subr.bf16.mxu0 %v9076_v43  ;;  %v9180_v43 = vcombine.high %v5474_v49, %v5478_v50 }
 0x44f   : > { %7896 = vmatpush1.bf16.msra.mxu0 %v9075_v52  ;;  %v9179_v52 = vcombine.low %v5474_v49, %v5478_v50  ;;  %v5164_v49 = vld [vmem:[%s10851_s18 + $0xe8] sm:$0xff] }
 0x450   : > { %7897 = vmatprep.subr.bf16.mxu0 %v9084_v53  ;;  %v9188_v53 = vcombine.high %v5482_v44, %v5486_v47 }
 0x453   : > { %7898 = vmatpush1.bf16.msra.mxu0 %v9083_v56  ;;  %v9187_v56 = vcombine.low %v5482_v44, %v5486_v47  ;;  %v5172_v44 = vld [vmem:[%s10851_s18 + $0x128] sm:$0xff] }
 0x454   : > { %7899 = vmatprep.subr.bf16.mxu0 %v9092_v57  ;;  %v9196_v57 = vcombine.high %v5490_v54, %v5494_v55  ;;  %v5180_v47 = vld [vmem:[%s10851_s18 + $0x168] sm:$0xff] }
 0x457   : > { %7900 = vmatpush1.bf16.msra.mxu0 %v9091_v60  ;;  %v9195_v60 = vcombine.low %v5490_v54, %v5494_v55  ;;  %v5184_v54 = vld [vmem:[%s10851_s18 + $0x188] sm:$0xff] }
 0x458   : > { %7912 = vmatprep.subr.bf16.mxu0 %v9100_v61  ;;  %v9204_v61 = vcombine.high %v5498_v58, %v5502_v59  ;;  %v5188_v55 = vld [vmem:[%s10851_s18 + $0x1a8] sm:$0xff] }
 0x45a   : > { %7902 = vmatmul.mubr.bf16.vlgmr.msra.gmra.mrb[8].mxu0 %v11565_v29 }
 0x45b   : > { %7913 = vmatpush1.bf16.msra.mxu0 %v9099_v0  ;;  %v9203_v0 = vcombine.low %v5498_v58, %v5502_v59  ;;  %v5192_v58 = vld [vmem:[%s10851_s18 + $0x1c8] sm:$0xff] }
 0x45c   : > { %7914 = vmatprep.subr.bf16.mxu0 %v9108_v1  ;;  %v9212_v1 = vcombine.high %v5506_v62, %v5510_v63  ;;  %v5196_v59 = vld [vmem:[%s10851_s18 + $0x1e8] sm:$0xff] }
 0x45f   : > { %7915 = vmatpush1.bf16.msra.mxu0 %v9107_v4  ;;  %v9211_v4 = vcombine.low %v5506_v62, %v5510_v63  ;;  %v5200_v62 = vld [vmem:[%s10851_s18 + $0x208] sm:$0xff] }
 0x460   : > { %7916 = vmatprep.subr.bf16.mxu0 %v9116_v5  ;;  %v9220_v5 = vcombine.high %v5514_v2, %v5518_v3  ;;  %v5204_v63 = vld [vmem:[%s10851_s18 + $0x228] sm:$0xff] }
 0x461   : > { %v5208_v2 = vld [vmem:[%s10851_s18 + $0x248] sm:$0xff] }
 0x462   : > { %v5212_v3 = vld [vmem:[%s10851_s18 + $0x268] sm:$0xff] }
 0x463   : > { %7917 = vmatpush1.bf16.msra.mxu0 %v9115_v8  ;;  %v1004_v8 = vsub.s32 5, %v11530_v37 }
 0x464   : > { %7918 = vmatprep.subr.bf16.mxu0 %v9124_v9  ;;  %v10409_v9 = vld [vmem:[%s10845_s15] sm:$0x3f] }
 0x465   : > { %v1001_v10 = vrot.slane %v10409_v9, %v1000_v7  ;;  %v1005_v11 = vrot.slane %v10409_v9, %v1004_v8  ;;  %v5220_v9 = vld [vmem:[%s10851_s18 + $0x2a8] sm:$0xff] }
 0x467   : > { %7919 = vmatpush1.bf16.msra.mxu0 %v9123_v23 }
 0x468   : > { %7920 = vmatprep.subr.bf16.mxu0 %v9132_v12 }
 0x46b   : > { %7921 = vmatpush1.bf16.msra.mxu0 %v9131_v15 }
 0x46c   : > { %7922 = vmatprep.subr.bf16.mxu0 %v9140_v16 }
 0x46f   : > { %7923 = vmatpush1.bf16.msra.mxu0 %v9139_v19 }
 0x470   : > { %7924 = vmatprep.subr.bf16.mxu0 %v9148_v20 }
 0x473   : > { %7925 = vmatpush1.bf16.msra.mxu0 %v9147_v25  ;;  %v5148_v25 = vld [vmem:[%s10851_s18 + $0x68] sm:$0xff] }
 0x474   : > { %7926 = vmatprep.subr.bf16.mxu0 %v9156_v26  ;;  %v8847_v39 = vcombine.low %v5144_v24, %v5148_v25 }
 0x477   : > { %7927 = vmatpush1.bf16.msra.mxu0 %v9155_v30  ;;  %v8848_v30 = vcombine.high %v5144_v24, %v5148_v25  ;;  %v5248_v25 = vld [vmem:[%s10851_s18 + $0x388] sm:$0xff] }
 0x478   : > { %7928 = vmatprep.subr.bf16.mxu0 %v9164_v35  ;;  %v5152_v35 = vld [vmem:[%s10851_s18 + $0x88] sm:$0xff] }
 0x479   : > { %v8855_v50 = vcombine.low %v5152_v35, %v5156_v36 }
 0x47b   : > { %7929 = vmatpush1.bf16.msra.mxu0 %v9163_v42  ;;  %v8856_v42 = vcombine.high %v5152_v35, %v5156_v36  ;;  %v5256_v36 = vld [vmem:[%s10851_s18 + $0x3c8] sm:$0xff] }
 0x47c   : > { %7930 = vmatprep.subr.bf16.mxu0 %v9172_v45  ;;  %v5160_v45 = vld [vmem:[%s10851_s18 + $0xc8] sm:$0xff] }
 0x47d   : > { %v8863_v33 = vcombine.low %v5160_v45, %v5164_v49 }
 0x47f   : > { %7931 = vmatpush1.bf16.msra.mxu0 %v9171_v51  ;;  %v8864_v51 = vcombine.high %v5160_v45, %v5164_v49  ;;  %v5264_v49 = vld [vmem:[%s10851_s18 + $0x408] sm:$0xff] }
 0x480   : > { %7932 = vmatprep.subr.bf16.mxu0 %v9180_v43  ;;  %v5168_v43 = vld [vmem:[%s10851_s18 + $0x108] sm:$0xff] }
 0x481   : > { %v8872_v34 = vcombine.high %v5168_v43, %v5172_v44 }
 0x483   : > { %7933 = vmatpush1.bf16.msra.mxu0 %v9179_v52  ;;  %v8871_v52 = vcombine.low %v5168_v43, %v5172_v44  ;;  %v5272_v44 = vld [vmem:[%s10851_s18 + $0x448] sm:$0xff] }
 0x484   : > { %7934 = vmatprep.subr.bf16.mxu0 %v9188_v53 }
 0x487   : > { %7935 = vmatpush1.bf16.msra.mxu0 %v9187_v56 }
 0x488   : > { %7936 = vmatprep.subr.bf16.mxu0 %v9196_v57  ;;  %v8888_v57 = vcombine.high %v5184_v54, %v5188_v55 }
 0x48b   : > { %7937 = vmatpush1.bf16.msra.mxu0 %v9195_v60  ;;  %v8887_v60 = vcombine.low %v5184_v54, %v5188_v55  ;;  %v5288_v55 = vld [vmem:[%s10851_s18 + $0x4c8] sm:$0xff] }
 0x48c   : > { %7938 = vmatprep.subr.bf16.mxu0 %v9204_v61  ;;  %v8896_v61 = vcombine.high %v5192_v58, %v5196_v59 }
 0x48f   : > { %7939 = vmatpush1.bf16.msra.mxu0 %v9203_v0  ;;  %v8895_v0 = vcombine.low %v5192_v58, %v5196_v59  ;;  %v5296_v59 = vld [vmem:[%s10851_s18 + $0x508] sm:$0xff] }
 0x490   : > { %7940 = vmatprep.subr.bf16.mxu0 %v9212_v1  ;;  %v8904_v1 = vcombine.high %v5200_v62, %v5204_v63 }
 0x493   : > { %7941 = vmatpush1.bf16.msra.mxu0 %v9211_v4  ;;  %v8903_v4 = vcombine.low %v5200_v62, %v5204_v63  ;;  %v5304_v63 = vld [vmem:[%s10851_s18 + $0x548] sm:$0xff] }
 0x494   : > { %7942 = vmatprep.subr.bf16.mxu0 %v9220_v5  ;;  %v8912_v5 = vcombine.high %v5208_v2, %v5212_v3 }
 0x497   : > { %7943 = vmatpush1.bf16.msra.mxu0 %v9219_v6  ;;  %v5216_v6 = vld [vmem:[%s10851_s18 + $0x288] sm:$0xff] }
 0x4ad   : > { %v5092_v23 = vpop.f32.mrb[4].mxu0 }
 0x4ae   : > { %v9236_v12 = vadd.f32 %v5092_v23, %v1001_v10  ;;  %v5094_v13 = vpop.f32.mrb[5].mxu0  ;;  %v5224_v23 = vld [vmem:[%s10851_s18 + $0x2c8] sm:$0xff] }
 0x4af   : > { %v9237_v14 = vadd.f32 %v5094_v13, %v1005_v11  ;;  %v5096_v15 = vpop.f32.mrb[6].mxu0  ;;  %v8919_v13 = vcombine.low %v5216_v6, %v5220_v9 }
 0x4b0   : > { %10388 = vtanh.f32 %v9236_v12  ;;  %v9238_v16 = vadd.f32 %v5096_v15, %v1001_v10  ;;  %v5098_v17 = vpop.f32.mrb[7].mxu0  ;;  %v8911_v10 = vcombine.low %v5208_v2, %v5212_v3  ;;  %v5228_v12 = vld [vmem:[%s10851_s18 + $0x2e8] sm:$0xff] }
 0x4b1   : > { %10390 = vtanh.f32 %v9237_v14  ;;  %v9239_v18 = vadd.f32 %v5098_v17, %v1005_v11  ;;  %v8920_v11 = vcombine.high %v5216_v6, %v5220_v9  ;;  %v8928_v14 = vcombine.high %v5224_v23, %v5228_v12  ;;  %v5232_v15 = vld [vmem:[%s10851_s18 + $0x308] sm:$0xff] }
 0x4b2   : > { %10392 = vtanh.f32 %v9238_v16  ;;  %v5236_v16 = vld [vmem:[%s10851_s18 + $0x328] sm:$0xff]  ;;  %v8927_v17 = vcombine.low %v5224_v23, %v5228_v12 }
 0x4b3   : > { %10394 = vtanh.f32 %v9239_v18  ;;  %v8936_v18 = vcombine.high %v5232_v15, %v5236_v16  ;;  %v5312_v3 = vld [vmem:[%s10851_s18 + $0x588] sm:$0xff] }
 0x4b4   : > { %v5320_v9 = vld [vmem:[%s10851_s18 + $0x5c8] sm:$0xff] }
 0x4b5   : > { %v5328_v12 = vld [vmem:[%s10851_s18 + $0x608] sm:$0xff] }
 0x4ba   : > { %v10389_v19 = vpop.eup %10388 }
 0x4bb   : > { %v10391_v20 = vpop.eup %10390 }
 0x4bc   : > { %v10393_v21 = vpop.eup %10392 }
 0x4bd   : > { %v10395_v26 = vpop.eup %10394  ;;  %v11865_v27 = vpack.c.bf16 %v10393_v21, %v10389_v19  ;;  %v5240_v19 = vld [vmem:[%s10851_s18 + $0x348] sm:$0xff]  ;;  %v8935_v21 = vcombine.low %v5232_v15, %v5236_v16 }
 0x4be   : > { %v11867_v28 = vpack.c.bf16 %v10395_v26, %v10391_v20  ;;  %v5244_v20 = vld [vmem:[%s10851_s18 + $0x368] sm:$0xff] }
 0x4bf   : > { %v8944_v24 = vcombine.high %v5240_v19, %v5244_v20  ;;  %v5252_v26 = vld [vmem:[%s10851_s18 + $0x3a8] sm:$0xff] }
 0x4c0   : > { %7557 = vmatprep.mubr.bf16.mxu1 %v11867_v28  ;;  %7944 = vmatprep.mubr.bf16.mxu0 %v11867_v28  ;;  %v8952_v35 = vcombine.high %v5248_v25, %v5252_v26  ;;  %v5336_v16 = vld [vmem:[%s10851_s18 + $0x648] sm:$0xff] }
 0x4c1   : > { %7558 = vmatmul.mubr.bf16.vlgmr.msra.gmra.mrb[4].mxu1 %v11865_v27  ;;  %7945 = vmatmul.mubr.bf16.vlgmr.msra.gmra.mrb[8].mxu0 %v11865_v27 }
 0x4c2   : > { %7569 = vmatpush1.bf16.msra.mxu1 %v8839_v38  ;;  %7600 = vmatprep.mubr.bf16.mxu1 %v11567_v31  ;;  %v5176_v38 = vld [vmem:[%s10851_s18 + $0x148] sm:$0xff] }
 0x4c3   : > { %7570 = vmatprep.subr.bf16.mxu1 %v8848_v30  ;;  %v8880_v53 = vcombine.high %v5176_v38, %v5180_v47  ;;  %v8879_v56 = vcombine.low %v5176_v38, %v5180_v47  ;;  %v8943_v30 = vcombine.low %v5240_v19, %v5244_v20  ;;  %v5280_v47 = vld [vmem:[%s10851_s18 + $0x488] sm:$0xff] }
 0x4c4   : > { %v5344_v20 = vld [vmem:[%s10851_s18 + $0x688] sm:$0xff] }
 0x4c6   : > { %7571 = vmatpush1.bf16.msra.mxu1 %v8847_v39  ;;  %v5260_v39 = vld [vmem:[%s10851_s18 + $0x3e8] sm:$0xff] }
 0x4c7   : > { %7572 = vmatprep.subr.bf16.mxu1 %v8856_v42  ;;  %v8951_v42 = vcombine.low %v5248_v25, %v5252_v26  ;;  %v8960_v45 = vcombine.high %v5256_v36, %v5260_v39  ;;  %v5352_v26 = vld [vmem:[%s10851_s18 + $0x6c8] sm:$0xff] }
 0x4ca   : > { %7573 = vmatpush1.bf16.msra.mxu1 %v8855_v50  ;;  %v5268_v50 = vld [vmem:[%s10851_s18 + $0x428] sm:$0xff] }
 0x4cb   : > { %7574 = vmatprep.subr.bf16.mxu1 %v8864_v51  ;;  %v8959_v51 = vcombine.low %v5256_v36, %v5260_v39  ;;  %v8968_v43 = vcombine.high %v5264_v49, %v5268_v50  ;;  %v5360_v39 = vld [vmem:[%s10851_s18 + $0x708] sm:$0xff] }
 0x4ce   : > { %7575 = vmatpush1.bf16.msra.mxu1 %v8863_v33  ;;  %v5276_v33 = vld [vmem:[%s10851_s18 + $0x468] sm:$0xff] }
 0x4cf   : > { %7576 = vmatprep.subr.bf16.mxu1 %v8872_v34  ;;  %v8967_v34 = vcombine.low %v5264_v49, %v5268_v50  ;;  %v8976_v38 = vcombine.high %v5272_v44, %v5276_v33  ;;  %v5368_v50 = vld [vmem:[%s10851_s18 + $0x748] sm:$0xff] }
 0x4d2   : > { %7577 = vmatpush1.bf16.msra.mxu1 %v8871_v52  ;;  %v5284_v52 = vld [vmem:[%s10851_s18 + $0x4a8] sm:$0xff] }
 0x4d3   : > { %7578 = vmatprep.subr.bf16.mxu1 %v8880_v53  ;;  %v8975_v53 = vcombine.low %v5272_v44, %v5276_v33  ;;  %v8984_v54 = vcombine.high %v5280_v47, %v5284_v52  ;;  %v5376_v33 = vld [vmem:[%s10851_s18 + $0x788] sm:$0xff] }
 0x4d6   : > { %7579 = vmatpush1.bf16.msra.mxu1 %v8879_v56  ;;  %v5292_v56 = vld [vmem:[%s10851_s18 + $0x4e8] sm:$0xff] }
 0x4d7   : > { %7580 = vmatprep.subr.bf16.mxu1 %v8888_v57  ;;  %v8983_v57 = vcombine.low %v5280_v47, %v5284_v52  ;;  %v8992_v58 = vcombine.high %v5288_v55, %v5292_v56  ;;  %v5384_v52 = vld [vmem:[%s10851_s18 + $0x7c8] sm:$0xff] }
 0x4da   : > { %7581 = vmatpush1.bf16.msra.mxu1 %v8887_v60  ;;  %v5300_v60 = vld [vmem:[%s10851_s18 + $0x528] sm:$0xff] }
 0x4db   : > { %7582 = vmatprep.subr.bf16.mxu1 %v8896_v61  ;;  %v8991_v61 = vcombine.low %v5288_v55, %v5292_v56  ;;  %v9000_v62 = vcombine.high %v5296_v59, %v5300_v60  ;;  %v5392_v56 = vld [vmem:[%s10851_s18 + $0x808] sm:$0xff] }
 0x4de   : > { %7583 = vmatpush1.bf16.msra.mxu1 %v8895_v0  ;;  %v5308_v0 = vld [vmem:[%s10851_s18 + $0x568] sm:$0xff] }
 0x4df   : > { %7584 = vmatprep.subr.bf16.mxu1 %v8904_v1  ;;  %v8999_v1 = vcombine.low %v5296_v59, %v5300_v60  ;;  %v9008_v2 = vcombine.high %v5304_v63, %v5308_v0  ;;  %v5400_v60 = vld [vmem:[%s10851_s18 + $0x848] sm:$0xff] }
 0x4e2   : > { %7585 = vmatpush1.bf16.msra.mxu1 %v8903_v4  ;;  %v5316_v4 = vld [vmem:[%s10851_s18 + $0x5a8] sm:$0xff] }
 0x4e3   : > { %7586 = vmatprep.subr.bf16.mxu1 %v8912_v5  ;;  %v9007_v5 = vcombine.low %v5304_v63, %v5308_v0  ;;  %v9016_v6 = vcombine.high %v5312_v3, %v5316_v4  ;;  %v5408_v0 = vld [vmem:[%s10851_s18 + $0x888] sm:$0xff] }
 0x4e6   : > { %7587 = vmatpush1.bf16.msra.mxu1 %v8911_v10  ;;  %v5324_v10 = vld [vmem:[%s10851_s18 + $0x5e8] sm:$0xff] }
 0x4e7   : > { %7588 = vmatprep.subr.bf16.mxu1 %v8920_v11  ;;  %v9015_v11 = vcombine.low %v5312_v3, %v5316_v4  ;;  %v9024_v23 = vcombine.high %v5320_v9, %v5324_v10  ;;  %v5416_v4 = vld [vmem:[%s10851_s18 + $0x8c8] sm:$0xff] }
 0x4ea   : > { %7589 = vmatpush1.bf16.msra.mxu1 %v8919_v13  ;;  %v5332_v13 = vld [vmem:[%s10851_s18 + $0x628] sm:$0xff] }
 0x4eb   : > { %7590 = vmatprep.subr.bf16.mxu1 %v8928_v14  ;;  %v9023_v14 = vcombine.low %v5320_v9, %v5324_v10  ;;  %v9032_v15 = vcombine.high %v5328_v12, %v5332_v13  ;;  %v5424_v10 = vld [vmem:[%s10851_s18 + $0x908] sm:$0xff] }
 0x4ee   : > { %7591 = vmatpush1.bf16.msra.mxu1 %v8927_v17  ;;  %v5340_v17 = vld [vmem:[%s10851_s18 + $0x668] sm:$0xff] }
 0x4ef   : > { %7592 = vmatprep.subr.bf16.mxu1 %v8936_v18  ;;  %v9031_v18 = vcombine.low %v5328_v12, %v5332_v13  ;;  %v9040_v19 = vcombine.high %v5336_v16, %v5340_v17  ;;  %v5432_v13 = vld [vmem:[%s10851_s18 + $0x948] sm:$0xff] }
 0x4f2   : > { %7593 = vmatpush1.bf16.msra.mxu1 %v8935_v21  ;;  %v5348_v21 = vld [vmem:[%s10851_s18 + $0x6a8] sm:$0xff] }
 0x4f3   : > { %7594 = vmatprep.subr.bf16.mxu1 %v8944_v24  ;;  %v9039_v24 = vcombine.low %v5336_v16, %v5340_v17  ;;  %v9048_v25 = vcombine.high %v5344_v20, %v5348_v21  ;;  %v5440_v17 = vld [vmem:[%s10851_s18 + $0x988] sm:$0xff] }
 0x4f6   : > { %7595 = vmatpush1.bf16.msra.mxu1 %v8943_v30  ;;  %v5356_v30 = vld [vmem:[%s10851_s18 + $0x6e8] sm:$0xff] }
 0x4f7   : > { %7596 = vmatprep.subr.bf16.mxu1 %v8952_v35  ;;  %v9047_v35 = vcombine.low %v5344_v20, %v5348_v21  ;;  %v9056_v36 = vcombine.high %v5352_v26, %v5356_v30  ;;  %v5448_v21 = vld [vmem:[%s10851_s18 + $0x9c8] sm:$0xff] }
 0x4fa   : > { %7597 = vmatpush1.bf16.msra.mxu1 %v8951_v42  ;;  %v5364_v42 = vld [vmem:[%s10851_s18 + $0x728] sm:$0xff] }
 0x4fb   : > { %7598 = vmatprep.subr.bf16.mxu1 %v8960_v45  ;;  %v9055_v45 = vcombine.low %v5352_v26, %v5356_v30  ;;  %v9064_v49 = vcombine.high %v5360_v39, %v5364_v42  ;;  %v5456_v30 = vld [vmem:[%s10851_s18 + $0xa08] sm:$0xff] }
 0x4fe   : > { %7599 = vmatpush1.bf16.msra.mxu1 %v8959_v51  ;;  %v5372_v51 = vld [vmem:[%s10851_s18 + $0x768] sm:$0xff] }
 0x4ff   : > { %7611 = vmatprep.subr.bf16.mxu1 %v8968_v43  ;;  %v9063_v43 = vcombine.low %v5360_v39, %v5364_v42  ;;  %v9072_v44 = vcombine.high %v5368_v50, %v5372_v51  ;;  %v5464_v42 = vld [vmem:[%s10851_s18 + $0xa48] sm:$0xff] }
 0x501   : > { %7601 = vmatmul.mubr.bf16.vlgmr.msra.gmra.mrb[8].mxu1 %v11559_v22 }
 0x502   : > { %7612 = vmatpush1.bf16.msra.mxu1 %v8967_v34  ;;  %7643 = vmatprep.mubr.bf16.mxu1 %v11569_v32  ;;  %v5380_v34 = vld [vmem:[%s10851_s18 + $0x7a8] sm:$0xff] }
 0x503   : > { %7613 = vmatprep.subr.bf16.mxu1 %v8976_v38  ;;  %v9071_v38 = vcombine.low %v5368_v50, %v5372_v51  ;;  %v9080_v47 = vcombine.high %v5376_v33, %v5380_v34  ;;  %v5472_v51 = vld [vmem:[%s10851_s18 + $0xa88] sm:$0xff] }
 0x506   : > { %7614 = vmatpush1.bf16.msra.mxu1 %v8975_v53  ;;  %v5388_v53 = vld [vmem:[%s10851_s18 + $0x7e8] sm:$0xff] }
 0x507   : > { %7615 = vmatprep.subr.bf16.mxu1 %v8984_v54  ;;  %v9079_v54 = vcombine.low %v5376_v33, %v5380_v34  ;;  %v9088_v55 = vcombine.high %v5384_v52, %v5388_v53  ;;  %v5480_v34 = vld [vmem:[%s10851_s18 + $0xac8] sm:$0xff] }
 0x50a   : > { %7616 = vmatpush1.bf16.msra.mxu1 %v8983_v57  ;;  %v5396_v57 = vld [vmem:[%s10851_s18 + $0x828] sm:$0xff] }
 0x50b   : > { %7617 = vmatprep.subr.bf16.mxu1 %v8992_v58  ;;  %v9087_v58 = vcombine.low %v5384_v52, %v5388_v53  ;;  %v9096_v59 = vcombine.high %v5392_v56, %v5396_v57  ;;  %v5488_v53 = vld [vmem:[%s10851_s18 + $0xb08] sm:$0xff] }
 0x50e   : > { %7618 = vmatpush1.bf16.msra.mxu1 %v8991_v61  ;;  %v5404_v61 = vld [vmem:[%s10851_s18 + $0x868] sm:$0xff] }
 0x50f   : > { %7619 = vmatprep.subr.bf16.mxu1 %v9000_v62  ;;  %v9095_v62 = vcombine.low %v5392_v56, %v5396_v57  ;;  %v9104_v63 = vcombine.high %v5400_v60, %v5404_v61  ;;  %v5496_v57 = vld [vmem:[%s10851_s18 + $0xb48] sm:$0xff] }
 0x512   : > { %7620 = vmatpush1.bf16.msra.mxu1 %v8999_v1  ;;  %v5412_v1 = vld [vmem:[%s10851_s18 + $0x8a8] sm:$0xff] }
 0x513   : > { %7621 = vmatprep.subr.bf16.mxu1 %v9008_v2  ;;  %v9103_v2 = vcombine.low %v5400_v60, %v5404_v61  ;;  %v9112_v3 = vcombine.high %v5408_v0, %v5412_v1  ;;  %v5504_v61 = vld [vmem:[%s10851_s18 + $0xb88] sm:$0xff] }
 0x516   : > { %7622 = vmatpush1.bf16.msra.mxu1 %v9007_v5  ;;  %v5420_v5 = vld [vmem:[%s10851_s18 + $0x8e8] sm:$0xff] }
 0x517   : > { %7623 = vmatprep.subr.bf16.mxu1 %v9016_v6  ;;  %v9111_v6 = vcombine.low %v5408_v0, %v5412_v1  ;;  %v9120_v9 = vcombine.high %v5416_v4, %v5420_v5  ;;  %v5512_v1 = vld [vmem:[%s10851_s18 + $0xbc8] sm:$0xff] }
 0x51a   : > { %7624 = vmatpush1.bf16.msra.mxu1 %v9015_v11  ;;  %v5428_v11 = vld [vmem:[%s10851_s18 + $0x928] sm:$0xff] }
 0x51b   : > { %7625 = vmatprep.subr.bf16.mxu1 %v9024_v23  ;;  %v9119_v23 = vcombine.low %v5416_v4, %v5420_v5  ;;  %v9128_v12 = vcombine.high %v5424_v10, %v5428_v11  ;;  %v5137_v5 = vld [vmem:[%s10851_s18 + $0x10] sm:$0xff] }
 0x51e   : > { %7626 = vmatpush1.bf16.msra.mxu1 %v9023_v14  ;;  %v5436_v14 = vld [vmem:[%s10851_s18 + $0x968] sm:$0xff] }
 0x51f   : > { %7627 = vmatprep.subr.bf16.mxu1 %v9032_v15  ;;  %v9127_v15 = vcombine.low %v5424_v10, %v5428_v11  ;;  %v9136_v16 = vcombine.high %v5432_v13, %v5436_v14  ;;  %v5145_v11 = vld [vmem:[%s10851_s18 + $0x50] sm:$0xff] }
 0x522   : > { %7628 = vmatpush1.bf16.msra.mxu1 %v9031_v18  ;;  %v5444_v18 = vld [vmem:[%s10851_s18 + $0x9a8] sm:$0xff] }
 0x523   : > { %7629 = vmatprep.subr.bf16.mxu1 %v9040_v19  ;;  %v9135_v19 = vcombine.low %v5432_v13, %v5436_v14  ;;  %v9144_v20 = vcombine.high %v5440_v17, %v5444_v18  ;;  %v5153_v14 = vld [vmem:[%s10851_s18 + $0x90] sm:$0xff] }
 0x526   : > { %7630 = vmatpush1.bf16.msra.mxu1 %v9039_v24  ;;  %v5452_v24 = vld [vmem:[%s10851_s18 + $0x9e8] sm:$0xff] }
 0x527   : > { %7631 = vmatprep.subr.bf16.mxu1 %v9048_v25  ;;  %v9143_v25 = vcombine.low %v5440_v17, %v5444_v18  ;;  %v9152_v26 = vcombine.high %v5448_v21, %v5452_v24  ;;  %v5161_v18 = vld [vmem:[%s10851_s18 + $0xd0] sm:$0xff] }
 0x52a   : > { %7632 = vmatpush1.bf16.msra.mxu1 %v9047_v35  ;;  %v5460_v35 = vld [vmem:[%s10851_s18 + $0xa28] sm:$0xff] }
 0x52b   : > { %7633 = vmatprep.subr.bf16.mxu1 %v9056_v36  ;;  %v9151_v36 = vcombine.low %v5448_v21, %v5452_v24  ;;  %v9160_v39 = vcombine.high %v5456_v30, %v5460_v35  ;;  %v5169_v24 = vld [vmem:[%s10851_s18 + $0x110] sm:$0xff] }
 0x52e   : > { %7634 = vmatpush1.bf16.msra.mxu1 %v9055_v45  ;;  %v5468_v45 = vld [vmem:[%s10851_s18 + $0xa68] sm:$0xff] }
 0x52f   : > { %7635 = vmatprep.subr.bf16.mxu1 %v9064_v49  ;;  %v9159_v49 = vcombine.low %v5456_v30, %v5460_v35  ;;  %v9168_v50 = vcombine.high %v5464_v42, %v5468_v45  ;;  %v5181_v35 = vld [vmem:[%s10851_s18 + $0x170] sm:$0xff] }
 0x532   : > { %7636 = vmatpush1.bf16.msra.mxu1 %v9063_v43  ;;  %v5476_v43 = vld [vmem:[%s10851_s18 + $0xaa8] sm:$0xff] }
 0x533   : > { %7637 = vmatprep.subr.bf16.mxu1 %v9072_v44  ;;  %v9167_v44 = vcombine.low %v5464_v42, %v5468_v45  ;;  %v9176_v33 = vcombine.high %v5472_v51, %v5476_v43  ;;  %v5185_v42 = vld [vmem:[%s10851_s18 + $0x190] sm:$0xff] }
 0x534   : > { %v5189_v45 = vld [vmem:[%s10851_s18 + $0x1b0] sm:$0xff] }
 0x536   : > { %7638 = vmatpush1.bf16.msra.mxu1 %v9071_v38  ;;  %v5484_v38 = vld [vmem:[%s10851_s18 + $0xae8] sm:$0xff] }
 0x537   : > { %7639 = vmatprep.subr.bf16.mxu1 %v9080_v47  ;;  %v9175_v47 = vcombine.low %v5472_v51, %v5476_v43  ;;  %v9184_v52 = vcombine.high %v5480_v34, %v5484_v38  ;;  %v5119_v51 = vld [vmem:[%s12301_s5 + $0x30] sm:$0xff]  ;;  %v5114_v43 = vld [vmem:[%s12301_s5 + $0x8] sm:$0xff] }
 0x53a   : > { %7640 = vmatpush1.bf16.msra.mxu1 %v9079_v54  ;;  %v5492_v54 = vld [vmem:[%s10851_s18 + $0xb28] sm:$0xff] }
 0x53b   : > { %7641 = vmatprep.subr.bf16.mxu1 %v9088_v55  ;;  %v9183_v55 = vcombine.low %v5480_v34, %v5484_v38  ;;  %v9192_v56 = vcombine.high %v5488_v53, %v5492_v54  ;;  %v8890_v34 = vcombine.high %v5185_v42, %v5189_v45 }
 0x53e   : > { %7642 = vmatpush1.bf16.msra.mxu1 %v9087_v58  ;;  %v5500_v58 = vld [vmem:[%s10851_s18 + $0xb68] sm:$0xff] }
 0x53f   : > { %7654 = vmatprep.subr.bf16.mxu1 %v9096_v59  ;;  %v9191_v59 = vcombine.low %v5488_v53, %v5492_v54  ;;  %v9200_v60 = vcombine.high %v5496_v57, %v5500_v58  ;;  %v5193_v53 = vld [vmem:[%s10851_s18 + $0x1d0] sm:$0xff] }
 0x540   : > { %v5197_v54 = vld [vmem:[%s10851_s18 + $0x1f0] sm:$0xff] }
 0x541   : > { %7644 = vmatmul.mubr.bf16.vlgmr.msra.gmra.mrb[8].mxu1 %v11565_v29 }
 0x542   : > { %7655 = vmatpush1.bf16.msra.mxu1 %v9095_v62  ;;  %7686 = vmatprep.mubr.bf16.mxu1 %v11867_v28  ;;  %v5508_v62 = vld [vmem:[%s10851_s18 + $0xba8] sm:$0xff] }
 0x543   : > { %7656 = vmatprep.subr.bf16.mxu1 %v9104_v63  ;;  %v9199_v63 = vcombine.low %v5496_v57, %v5500_v58  ;;  %v9208_v0 = vcombine.high %v5504_v61, %v5508_v62 }
 0x546   : > { %7657 = vmatpush1.bf16.msra.mxu1 %v9103_v2  ;;  %v5516_v2 = vld [vmem:[%s10851_s18 + $0xbe8] sm:$0xff] }
 0x547   : > { %7658 = vmatprep.subr.bf16.mxu1 %v9112_v3  ;;  %v9207_v3 = vcombine.low %v5504_v61, %v5508_v62  ;;  %v9216_v4 = vcombine.high %v5512_v1, %v5516_v2 }
 0x54a   : > { %7659 = vmatpush1.bf16.msra.mxu1 %v9111_v6  ;;  %v5141_v6 = vld [vmem:[%s10851_s18 + $0x30] sm:$0xff] }
 0x54b   : > { %7660 = vmatprep.subr.bf16.mxu1 %v9120_v9  ;;  %v9215_v9 = vcombine.low %v5512_v1, %v5516_v2  ;;  %v8842_v10 = vcombine.high %v5137_v5, %v5141_v6  ;;  %v8889_v1 = vcombine.low %v5185_v42, %v5189_v45  ;;  %v5241_v42 = vld [vmem:[%s10851_s18 + $0x350] sm:$0xff] }
 0x54c   : > { %v5245_v45 = vld [vmem:[%s10851_s18 + $0x370] sm:$0xff] }
 0x54e   : > { %7661 = vmatpush1.bf16.msra.mxu1 %v9119_v23  ;;  %v5149_v23 = vld [vmem:[%s10851_s18 + $0x70] sm:$0xff] }
 0x54f   : > { %7662 = vmatprep.subr.bf16.mxu1 %v9128_v12  ;;  %v8841_v12 = vcombine.low %v5137_v5, %v5141_v6  ;;  %v8850_v13 = vcombine.high %v5145_v11, %v5149_v23  ;;  %v8898_v6 = vcombine.high %v5193_v53, %v5197_v54 }
 0x552   : > { %7663 = vmatpush1.bf16.msra.mxu1 %v9127_v15  ;;  %v5157_v15 = vld [vmem:[%s10851_s18 + $0xb0] sm:$0xff] }
 0x553   : > { %7664 = vmatprep.subr.bf16.mxu1 %v9136_v16  ;;  %v8849_v16 = vcombine.low %v5145_v11, %v5149_v23  ;;  %v8858_v17 = vcombine.high %v5153_v14, %v5157_v15  ;;  %v5201_v11 = vld [vmem:[%s10851_s18 + $0x210] sm:$0xff] }
 0x554   : > { %v5205_v23 = vld [vmem:[%s10851_s18 + $0x230] sm:$0xff] }
 0x556   : > { %7665 = vmatpush1.bf16.msra.mxu1 %v9135_v19  ;;  %v5165_v19 = vld [vmem:[%s10851_s18 + $0xf0] sm:$0xff] }
 0x557   : > { %7666 = vmatprep.subr.bf16.mxu1 %v9144_v20  ;;  %v8857_v20 = vcombine.low %v5153_v14, %v5157_v15  ;;  %v8866_v21 = vcombine.high %v5161_v18, %v5165_v19  ;;  %v5209_v14 = vld [vmem:[%s10851_s18 + $0x250] sm:$0xff] }
 0x558   : > { %v5213_v15 = vld [vmem:[%s10851_s18 + $0x270] sm:$0xff] }
 0x55a   : > { %7667 = vmatpush1.bf16.msra.mxu1 %v9143_v25  ;;  %v5173_v25 = vld [vmem:[%s10851_s18 + $0x130] sm:$0xff] }
 0x55b   : > { %7668 = vmatprep.subr.bf16.mxu1 %v9152_v26  ;;  %v8865_v26 = vcombine.low %v5161_v18, %v5165_v19  ;;  %v8874_v30 = vcombine.high %v5169_v24, %v5173_v25  ;;  %v5217_v18 = vld [vmem:[%s10851_s18 + $0x290] sm:$0xff] }
 0x55c   : > { %v5221_v19 = vld [vmem:[%s10851_s18 + $0x2b0] sm:$0xff] }
 0x55e   : > { %7669 = vmatpush1.bf16.msra.mxu1 %v9151_v36  ;;  %v8873_v36 = vcombine.low %v5169_v24, %v5173_v25  ;;  %v5225_v24 = vld [vmem:[%s10851_s18 + $0x2d0] sm:$0xff] }
 0x55f   : > { %7670 = vmatprep.subr.bf16.mxu1 %v9160_v39  ;;  %v5229_v25 = vld [vmem:[%s10851_s18 + $0x2f0] sm:$0xff] }
 0x562   : > { %7671 = vmatpush1.bf16.msra.mxu1 %v9159_v49  ;;  %v5113_v49 = vld [vmem:[%s12301_s5] sm:$0xff] }
 0x563   : > { %7672 = vmatprep.subr.bf16.mxu1 %v9168_v50 }
 0x566   : > { %7673 = vmatpush1.bf16.msra.mxu1 %v9167_v44  ;;  %v5120_v44 = vld [vmem:[%s12301_s5 + $0x38] sm:$0xff] }
 0x567   : > { %7674 = vmatprep.subr.bf16.mxu1 %v9176_v33  ;;  %v5121_v33 = vld [vmem:[%s12301_s5 + $0x40] sm:$0x1] }
 0x56a   : > { %7675 = vmatpush1.bf16.msra.mxu1 %v9175_v47 }
 0x56b   : > { %7676 = vmatprep.subr.bf16.mxu1 %v9184_v52  ;;  %v5127_v52 = vld [vmem:[%s12301_s5 + $0x70] sm:$0x1] }
 0x56e   : > { %7677 = vmatpush1.bf16.msra.mxu1 %v9183_v55 }
 0x56f   : > { %7678 = vmatprep.subr.bf16.mxu1 %v9192_v56 }
 0x572   : > { %7679 = vmatpush1.bf16.msra.mxu1 %v9191_v59  ;;  %v5122_v59 = vld [vmem:[%s12301_s5 + $0x48] sm:$0x1] }
 0x573   : > { %7680 = vmatprep.subr.bf16.mxu1 %v9200_v60  ;;  %v5128_v60 = vld [vmem:[%s12301_s5 + $0x78] sm:$0x1] }
 0x576   : > { %7681 = vmatpush1.bf16.msra.mxu1 %v9199_v63 }
 0x577   : > { %7682 = vmatprep.subr.bf16.mxu1 %v9208_v0 }
 0x57a   : > { %7683 = vmatpush1.bf16.msra.mxu1 %v9207_v3 }
 0x57b   : > { %7684 = vmatprep.subr.bf16.mxu1 %v9216_v4 }
 0x57e   : > { %7685 = vmatpush1.bf16.msra.mxu1 %v9215_v9 }
 0x57f   : > { %7697 = vmatprep.subr.bf16.mxu1 %v8842_v10 }
 0x581   : > { %7687 = vmatmul.mubr.bf16.vlgmr.msra.gmra.mrb[8].mxu1 %v11865_v27 }
 0x582   : > { %7698 = vmatpush1.bf16.msra.mxu1 %v8841_v12  ;;  %7729 = vmatprep.mubr.bf16.mxu1 %v11567_v31  ;;  %v5177_v31 = vld [vmem:[%s10851_s18 + $0x150] sm:$0xff]  ;;  %v8897_v12 = vcombine.low %v5193_v53, %v5197_v54 }
 0x583   : > { %7699 = vmatprep.subr.bf16.mxu1 %v8850_v13  ;;  %v8882_v39 = vcombine.high %v5177_v31, %v5181_v35  ;;  %v8881_v50 = vcombine.low %v5177_v31, %v5181_v35  ;;  %v8906_v13 = vcombine.high %v5201_v11, %v5205_v23  ;;  %v5233_v31 = vld [vmem:[%s10851_s18 + $0x310] sm:$0xff] }
 0x584   : > { %v5237_v35 = vld [vmem:[%s10851_s18 + $0x330] sm:$0xff] }
 0x585   : > { %v5265_v53 = vld [vmem:[%s10851_s18 + $0x410] sm:$0xff] }
 0x586   : > { %7700 = vmatpush1.bf16.msra.mxu1 %v8849_v16  ;;  %v8905_v16 = vcombine.low %v5201_v11, %v5205_v23  ;;  %v5269_v54 = vld [vmem:[%s10851_s18 + $0x430] sm:$0xff] }
 0x587   : > { %7701 = vmatprep.subr.bf16.mxu1 %v8858_v17  ;;  %v8914_v17 = vcombine.high %v5209_v14, %v5213_v15 }
 0x58a   : > { %7702 = vmatpush1.bf16.msra.mxu1 %v8857_v20  ;;  %v8913_v20 = vcombine.low %v5209_v14, %v5213_v15 }
 0x58b   : > { %7703 = vmatprep.subr.bf16.mxu1 %v8866_v21  ;;  %v8922_v21 = vcombine.high %v5217_v18, %v5221_v19 }
 0x58e   : > { %7704 = vmatpush1.bf16.msra.mxu1 %v8865_v26  ;;  %v8921_v26 = vcombine.low %v5217_v18, %v5221_v19 }
 0x58f   : > { %7705 = vmatprep.subr.bf16.mxu1 %v8874_v30  ;;  %v8930_v30 = vcombine.high %v5225_v24, %v5229_v25 }
 0x592   : > { %7706 = vmatpush1.bf16.msra.mxu1 %v8873_v36  ;;  %v8929_v36 = vcombine.low %v5225_v24, %v5229_v25 }
 0x593   : > { %7707 = vmatprep.subr.bf16.mxu1 %v8882_v39  ;;  %v8938_v39 = vcombine.high %v5233_v31, %v5237_v35 }
 0x594   : > { %v7559_v38 = vpop.f32.mrb[4].mxu1  ;;  %v7946_v47 = vpop.f32.mrb[8].mxu0 }
 0x595   : > { %v7955_v55 = vadd.f32 %v7559_v38, %v5113_v49  ;;  %v7961_v56 = vadd.f32 %v7946_v47, %v5119_v51  ;;  %v7561_v57 = vpop.f32.mrb[5].mxu1  ;;  %v7948_v58 = vpop.f32.mrb[9].mxu0  ;;  %v8937_v49 = vcombine.low %v5233_v31, %v5237_v35  ;;  %v5249_v51 = vld [vmem:[%s10851_s18 + $0x390] sm:$0xff] }
 0x596   : > { %v7956_v61 = vadd.f32 %v7561_v57, %v5114_v43  ;;  %7708 = vmatpush1.bf16.msra.mxu1 %v8881_v50  ;;  %v7962_v62 = vadd.f32 %v7948_v58, %v5120_v44  ;;  %v7563_v63 = vpop.f32.mrb[6].mxu1  ;;  %v7950_v0 = vpop.f32.mrb[10].mxu0  ;;  %v8946_v50 = vcombine.high %v5241_v42, %v5245_v45  ;;  %v5253_v43 = vld [vmem:[%s10851_s18 + $0x3b0] sm:$0xff]  ;;  %v8945_v44 = vcombine.low %v5241_v42, %v5245_v45 }
 0x597   : > { %7971 = vst [vmem:[%s12301_s5] sm:$0xff] %v7955_v55  ;;  %7977 = vst [vmem:[%s12301_s5 + $0x30] sm:$0xff] %v7961_v56  ;;  %v7963_v2 = vadd.f32 %v7563_v63, %v5121_v33  ;;  %v7969_v3 = vadd.f32 %v7950_v0, %v5127_v52  ;;  %v7565_v4 = vpop.f32.mrb[7].mxu1  ;;  %v7952_v5 = vpop.f32.mrb[11].mxu0  ;;  %7709 = vmatprep.subr.bf16.mxu1 %v8890_v34  ;;  %v8954_v33 = vcombine.high %v5249_v51, %v5253_v43  ;;  %v5257_v34 = vld [vmem:[%s10851_s18 + $0x3d0] sm:$0xff] }
 0x598   : > { %7972 = vst [vmem:[%s12301_s5 + $0x8] sm:$0xff] %v7956_v61  ;;  %7978 = vst [vmem:[%s12301_s5 + $0x38] sm:$0xff] %v7962_v62  ;;  %v7964_v9 = vadd.f32 %v7565_v4, %v5122_v59  ;;  %v7970_v10 = vadd.f32 %v7952_v5, %v5128_v60  ;;  %v5261_v38 = vld [vmem:[%s10851_s18 + $0x3f0] sm:$0xff]  ;;  %v8953_v47 = vcombine.low %v5249_v51, %v5253_v43 }
 0x599   : > { %7979 = vst [vmem:[%s12301_s5 + $0x40] sm:$0x1] %v7963_v2  ;;  %7985 = vst [vmem:[%s12301_s5 + $0x70] sm:$0x1] %v7969_v3  ;;  %v8962_v52 = vcombine.high %v5257_v34, %v5261_v38  ;;  %v8961_v55 = vcombine.low %v5257_v34, %v5261_v38  ;;  %v8970_v56 = vcombine.high %v5265_v53, %v5269_v54  ;;  %v5273_v57 = vld [vmem:[%s10851_s18 + $0x450] sm:$0xff] }
 0x59a   : > { %7980 = vst [vmem:[%s12301_s5 + $0x48] sm:$0x1] %v7964_v9  ;;  %7986 = vst [vmem:[%s12301_s5 + $0x78] sm:$0x1] %v7970_v10  ;;  %7710 = vmatpush1.bf16.msra.mxu1 %v8889_v1  ;;  %v5277_v58 = vld [vmem:[%s10851_s18 + $0x470] sm:$0xff]  ;;  %v8969_v59 = vcombine.low %v5265_v53, %v5269_v54 }
 0x59b   : > { %7711 = vmatprep.subr.bf16.mxu1 %v8898_v6  ;;  %v8978_v60 = vcombine.high %v5273_v57, %v5277_v58  ;;  %v5281_v61 = vld [vmem:[%s10851_s18 + $0x490] sm:$0xff]  ;;  %v8977_v63 = vcombine.low %v5273_v57, %v5277_v58 }
 0x59c   : > { %v5285_v62 = vld [vmem:[%s10851_s18 + $0x4b0] sm:$0xff] }
 0x59d   : > { %v8986_v0 = vcombine.high %v5281_v61, %v5285_v62  ;;  %v5289_v1 = vld [vmem:[%s10851_s18 + $0x4d0] sm:$0xff]  ;;  %v8985_v3 = vcombine.low %v5281_v61, %v5285_v62 }
 0x59e   : > { %7712 = vmatpush1.bf16.msra.mxu1 %v8897_v12  ;;  %v5293_v2 = vld [vmem:[%s10851_s18 + $0x4f0] sm:$0xff] }
 0x59f   : > { %7713 = vmatprep.subr.bf16.mxu1 %v8906_v13  ;;  %v8994_v4 = vcombine.high %v5289_v1, %v5293_v2  ;;  %v5297_v5 = vld [vmem:[%s10851_s18 + $0x510] sm:$0xff] }
 0x5a0   : > { %v5301_v6 = vld [vmem:[%s10851_s18 + $0x530] sm:$0xff] }
 0x5a1   : > { %v5305_v9 = vld [vmem:[%s10851_s18 + $0x550] sm:$0xff]  ;;  %v9001_v11 = vcombine.low %v5297_v5, %v5301_v6 }
 0x5a2   : > { %7714 = vmatpush1.bf16.msra.mxu1 %v8905_v16  ;;  %v5309_v10 = vld [vmem:[%s10851_s18 + $0x570] sm:$0xff] }
 0x5a3   : > { %7715 = vmatprep.subr.bf16.mxu1 %v8914_v17  ;;  %v9010_v23 = vcombine.high %v5305_v9, %v5309_v10  ;;  %v5313_v12 = vld [vmem:[%s10851_s18 + $0x590] sm:$0xff]  ;;  %v9009_v14 = vcombine.low %v5305_v9, %v5309_v10 }
 0x5a4   : > { %v5317_v13 = vld [vmem:[%s10851_s18 + $0x5b0] sm:$0xff] }
 0x5a5   : > { %v9018_v15 = vcombine.high %v5313_v12, %v5317_v13  ;;  %v5321_v16 = vld [vmem:[%s10851_s18 + $0x5d0] sm:$0xff]  ;;  %v9017_v18 = vcombine.low %v5313_v12, %v5317_v13 }
 0x5a6   : > { %7716 = vmatpush1.bf16.msra.mxu1 %v8913_v20  ;;  %v5325_v17 = vld [vmem:[%s10851_s18 + $0x5f0] sm:$0xff] }
 0x5a7   : > { %7717 = vmatprep.subr.bf16.mxu1 %v8922_v21  ;;  %v9026_v19 = vcombine.high %v5321_v16, %v5325_v17  ;;  %v5329_v20 = vld [vmem:[%s10851_s18 + $0x610] sm:$0xff]  ;;  %v9025_v24 = vcombine.low %v5321_v16, %v5325_v17 }
 0x5a8   : > { %v5333_v21 = vld [vmem:[%s10851_s18 + $0x630] sm:$0xff] }
 0x5a9   : > { %v9034_v25 = vcombine.high %v5329_v20, %v5333_v21  ;;  %v9033_v31 = vcombine.low %v5329_v20, %v5333_v21  ;;  %v5433_v16 = vld [vmem:[%s10851_s18 + $0x950] sm:$0xff] }
 0x5aa   : > { %7718 = vmatpush1.bf16.msra.mxu1 %v8921_v26  ;;  %v5337_v26 = vld [vmem:[%s10851_s18 + $0x650] sm:$0xff] }
 0x5ab   : > { %7719 = vmatprep.subr.bf16.mxu1 %v8930_v30  ;;  %v5341_v30 = vld [vmem:[%s10851_s18 + $0x670] sm:$0xff] }
 0x5ac   : > { %v9042_v35 = vcombine.high %v5337_v26, %v5341_v30  ;;  %v9041_v42 = vcombine.low %v5337_v26, %v5341_v30  ;;  %v5437_v17 = vld [vmem:[%s10851_s18 + $0x970] sm:$0xff] }
 0x5ad   : > { %v5441_v20 = vld [vmem:[%s10851_s18 + $0x990] sm:$0xff] }
 0x5ae   : > { %7720 = vmatpush1.bf16.msra.mxu1 %v8929_v36  ;;  %v5345_v36 = vld [vmem:[%s10851_s18 + $0x690] sm:$0xff] }
 0x5af   : > { %7721 = vmatprep.subr.bf16.mxu1 %v8938_v39  ;;  %v5349_v39 = vld [vmem:[%s10851_s18 + $0x6b0] sm:$0xff] }
 0x5b0   : > { %v9050_v45 = vcombine.high %v5345_v36, %v5349_v39  ;;  %v9049_v51 = vcombine.low %v5345_v36, %v5349_v39  ;;  %v5445_v21 = vld [vmem:[%s10851_s18 + $0x9b0] sm:$0xff] }
 0x5b1   : > { %v5449_v26 = vld [vmem:[%s10851_s18 + $0x9d0] sm:$0xff] }
 0x5b2   : > { %7722 = vmatpush1.bf16.msra.mxu1 %v8937_v49  ;;  %v5353_v49 = vld [vmem:[%s10851_s18 + $0x6d0] sm:$0xff] }
 0x5b3   : > { %7723 = vmatprep.subr.bf16.mxu1 %v8946_v50  ;;  %v5357_v50 = vld [vmem:[%s10851_s18 + $0x6f0] sm:$0xff] }
 0x5b4   : > { %v9058_v43 = vcombine.high %v5353_v49, %v5357_v50  ;;  %v9057_v34 = vcombine.low %v5353_v49, %v5357_v50  ;;  %v5453_v30 = vld [vmem:[%s10851_s18 + $0x9f0] sm:$0xff] }
 0x5b5   : > { %v5457_v36 = vld [vmem:[%s10851_s18 + $0xa10] sm:$0xff] }
 0x5b6   : > { %7724 = vmatpush1.bf16.msra.mxu1 %v8945_v44  ;;  %v5361_v44 = vld [vmem:[%s10851_s18 + $0x710] sm:$0xff] }
 0x5b7   : > { %7725 = vmatprep.subr.bf16.mxu1 %v8954_v33  ;;  %v5365_v33 = vld [vmem:[%s10851_s18 + $0x730] sm:$0xff] }
 0x5b8   : > { %v9066_v38 = vcombine.high %v5361_v44, %v5365_v33  ;;  %v9065_v53 = vcombine.low %v5361_v44, %v5365_v33  ;;  %v5461_v39 = vld [vmem:[%s10851_s18 + $0xa30] sm:$0xff] }
 0x5b9   : > { %v5465_v49 = vld [vmem:[%s10851_s18 + $0xa50] sm:$0xff] }
 0x5ba   : > { %7726 = vmatpush1.bf16.msra.mxu1 %v8953_v47  ;;  %v5369_v47 = vld [vmem:[%s10851_s18 + $0x750] sm:$0xff] }
 0x5bb   : > { %7727 = vmatprep.subr.bf16.mxu1 %v8962_v52  ;;  %v5373_v52 = vld [vmem:[%s10851_s18 + $0x770] sm:$0xff] }
 0x5bc   : > { %v9074_v54 = vcombine.high %v5369_v47, %v5373_v52  ;;  %v9073_v57 = vcombine.low %v5369_v47, %v5373_v52  ;;  %v5469_v50 = vld [vmem:[%s10851_s18 + $0xa70] sm:$0xff] }
 0x5bd   : > { %v5473_v44 = vld [vmem:[%s10851_s18 + $0xa90] sm:$0xff] }
 0x5be   : > { %7728 = vmatpush1.bf16.msra.mxu1 %v8961_v55  ;;  %v5377_v55 = vld [vmem:[%s10851_s18 + $0x790] sm:$0xff] }
 0x5bf   : > { %7740 = vmatprep.subr.bf16.mxu1 %v8970_v56  ;;  %v5381_v56 = vld [vmem:[%s10851_s18 + $0x7b0] sm:$0xff] }
 0x5c0   : > { %v9082_v58 = vcombine.high %v5377_v55, %v5381_v56  ;;  %v9081_v61 = vcombine.low %v5377_v55, %v5381_v56  ;;  %v5477_v33 = vld [vmem:[%s10851_s18 + $0xab0] sm:$0xff] }
 0x5c1   : > { %7730 = vmatmul.mubr.bf16.vlgmr.msra.gmra.mrb[12].mxu1 %v11559_v22  ;;  %v8993_v22 = vcombine.low %v5289_v1, %v5293_v2  ;;  %v5481_v47 = vld [vmem:[%s10851_s18 + $0xad0] sm:$0xff] }
 0x5c2   : > { %7741 = vmatpush1.bf16.msra.mxu1 %v8969_v59  ;;  %7772 = vmatprep.mubr.bf16.mxu1 %v11569_v32  ;;  %v9002_v32 = vcombine.high %v5297_v5, %v5301_v6  ;;  %v5385_v59 = vld [vmem:[%s10851_s18 + $0x7d0] sm:$0xff] }
 0x5c3   : > { %7742 = vmatprep.subr.bf16.mxu1 %v8978_v60  ;;  %v5389_v60 = vld [vmem:[%s10851_s18 + $0x7f0] sm:$0xff] }
 0x5c4   : > { %v9090_v62 = vcombine.high %v5385_v59, %v5389_v60  ;;  %v9089_v1 = vcombine.low %v5385_v59, %v5389_v60  ;;  %v5485_v52 = vld [vmem:[%s10851_s18 + $0xaf0] sm:$0xff] }
 0x5c5   : > { %v5489_v55 = vld [vmem:[%s10851_s18 + $0xb10] sm:$0xff] }
 0x5c6   : > { %7743 = vmatpush1.bf16.msra.mxu1 %v8977_v63  ;;  %v5393_v63 = vld [vmem:[%s10851_s18 + $0x810] sm:$0xff] }
 0x5c7   : > { %7744 = vmatprep.subr.bf16.mxu1 %v8986_v0  ;;  %v5397_v0 = vld [vmem:[%s10851_s18 + $0x830] sm:$0xff] }
 0x5c8   : > { %v9098_v2 = vcombine.high %v5393_v63, %v5397_v0  ;;  %v9097_v5 = vcombine.low %v5393_v63, %v5397_v0  ;;  %v5493_v56 = vld [vmem:[%s10851_s18 + $0xb30] sm:$0xff] }
 0x5c9   : > { %v5497_v59 = vld [vmem:[%s10851_s18 + $0xb50] sm:$0xff] }
 0x5ca   : > { %7745 = vmatpush1.bf16.msra.mxu1 %v8985_v3  ;;  %v5401_v3 = vld [vmem:[%s10851_s18 + $0x850] sm:$0xff] }
 0x5cb   : > { %7746 = vmatprep.subr.bf16.mxu1 %v8994_v4  ;;  %v5405_v4 = vld [vmem:[%s10851_s18 + $0x870] sm:$0xff] }
 0x5cc   : > { %v9106_v6 = vcombine.high %v5401_v3, %v5405_v4  ;;  %v9105_v9 = vcombine.low %v5401_v3, %v5405_v4  ;;  %v5501_v60 = vld [vmem:[%s10851_s18 + $0xb70] sm:$0xff] }
 0x5cd   : > { %v5505_v63 = vld [vmem:[%s10851_s18 + $0xb90] sm:$0xff] }
 0x5ce   : > { %7747 = vmatpush1.bf16.msra.mxu1 %v8993_v22  ;;  %v5409_v22 = vld [vmem:[%s10851_s18 + $0x890] sm:$0xff] }
 0x5cf   : > { %7748 = vmatprep.subr.bf16.mxu1 %v9002_v32  ;;  %v5413_v32 = vld [vmem:[%s10851_s18 + $0x8b0] sm:$0xff] }
 0x5d0   : > { %v9114_v10 = vcombine.high %v5409_v22, %v5413_v32  ;;  %v9113_v12 = vcombine.low %v5409_v22, %v5413_v32  ;;  %v5509_v0 = vld [vmem:[%s10851_s18 + $0xbb0] sm:$0xff]  ;;  %v5115_v32 = vld [vmem:[%s12301_s5 + $0x10] sm:$0xff] }
 0x5d1   : > { %v5513_v3 = vld [vmem:[%s10851_s18 + $0xbd0] sm:$0xff] }
 0x5d2   : > { %7749 = vmatpush1.bf16.msra.mxu1 %v9001_v11  ;;  %v5417_v11 = vld [vmem:[%s10851_s18 + $0x8d0] sm:$0xff] }
 0x5d3   : > { %7750 = vmatprep.subr.bf16.mxu1 %v9010_v23  ;;  %v5421_v23 = vld [vmem:[%s10851_s18 + $0x8f0] sm:$0xff] }
 0x5d4   : > { %v9122_v13 = vcombine.high %v5417_v11, %v5421_v23  ;;  %v5517_v4 = vld [vmem:[%s10851_s18 + $0xbf0] sm:$0xff] }
 0x5d5   : > { %v9217_v22 = vcombine.low %v5513_v3, %v5517_v4 }
 0x5d6   : > { %7751 = vmatpush1.bf16.msra.mxu1 %v9009_v14  ;;  %v5425_v14 = vld [vmem:[%s10851_s18 + $0x910] sm:$0xff] }
 0x5d7   : > { %7752 = vmatprep.subr.bf16.mxu1 %v9018_v15  ;;  %v5429_v15 = vld [vmem:[%s10851_s18 + $0x930] sm:$0xff] }
 0x5da   : > { %7753 = vmatpush1.bf16.msra.mxu1 %v9017_v18  ;;  %v9129_v18 = vcombine.low %v5425_v14, %v5429_v15 }
 0x5db   : > { %7754 = vmatprep.subr.bf16.mxu1 %v9026_v19  ;;  %v9138_v19 = vcombine.high %v5433_v16, %v5437_v17 }
 0x5de   : > { %7755 = vmatpush1.bf16.msra.mxu1 %v9025_v24  ;;  %v9137_v24 = vcombine.low %v5433_v16, %v5437_v17  ;;  %v5117_v16 = vld [vmem:[%s12301_s5 + $0x20] sm:$0xff]  ;;  %v5118_v17 = vld [vmem:[%s12301_s5 + $0x28] sm:$0xff] }
 0x5df   : > { %7756 = vmatprep.subr.bf16.mxu1 %v9034_v25  ;;  %v9146_v25 = vcombine.high %v5441_v20, %v5445_v21 }
 0x5e2   : > { %7757 = vmatpush1.bf16.msra.mxu1 %v9033_v31  ;;  %v9145_v31 = vcombine.low %v5441_v20, %v5445_v21 }
 0x5e3   : > { %7758 = vmatprep.subr.bf16.mxu1 %v9042_v35  ;;  %v9154_v35 = vcombine.high %v5449_v26, %v5453_v30 }
 0x5e6   : > { %7759 = vmatpush1.bf16.msra.mxu1 %v9041_v42  ;;  %v9153_v42 = vcombine.low %v5449_v26, %v5453_v30 }
 0x5e7   : > { %7760 = vmatprep.subr.bf16.mxu1 %v9050_v45  ;;  %v9162_v45 = vcombine.high %v5457_v36, %v5461_v39 }
 0x5ea   : > { %7761 = vmatpush1.bf16.msra.mxu1 %v9049_v51  ;;  %v9161_v51 = vcombine.low %v5457_v36, %v5461_v39  ;;  %v7991_v36 = vld [vmem:[%s12301_s5] sm:$0xff] (!%p9221_p0)  ;;  %v8007_v39 = vld [vmem:[#allocation7] sm:$0xff] (!%p9221_p0) }
 0x5eb   : > { %7762 = vmatprep.subr.bf16.mxu1 %v9058_v43  ;;  %v9170_v43 = vcombine.high %v5465_v49, %v5469_v50 }
 0x5ee   : > { %7763 = vmatpush1.bf16.msra.mxu1 %v9057_v34  ;;  %v9169_v34 = vcombine.low %v5465_v49, %v5469_v50  ;;  %v8039_v49 = vsub.s32 (!%p9221_p0), 7, %v11530_v37  ;;  %v8012_v50 = vrot.slane (!%p9221_p0), %v8007_v39, %v984_v40 }
 0x5ef   : > { %7764 = vmatprep.subr.bf16.mxu1 %v9066_v38  ;;  %v9178_v38 = vcombine.high %v5473_v44, %v5477_v33 }
 0x5f2   : > { %7765 = vmatpush1.bf16.msra.mxu1 %v9065_v53  ;;  %v9177_v53 = vcombine.low %v5473_v44, %v5477_v33  ;;  %v8020_v44 = vrot.slane (!%p9221_p0), %v8007_v39, %v992_v41 }
 0x5f3   : > { %7766 = vmatprep.subr.bf16.mxu1 %v9074_v54  ;;  %v9186_v54 = vcombine.high %v5481_v47, %v5485_v52 }
 0x5f6   : > { %7767 = vmatpush1.bf16.msra.mxu1 %v9073_v57  ;;  %v9185_v57 = vcombine.low %v5481_v47, %v5485_v52  ;;  %v8049_v47 = vadd.f32 (!%p9221_p0), %v8012_v50, %v7991_v36 }
 0x5f7   : > { %7768 = vmatprep.subr.bf16.mxu1 %v9082_v58  ;;  %v9194_v58 = vcombine.high %v5489_v55, %v5493_v56 }
 0x5f8   : > { %10410 = vtanh.f32 (!%p9221_p0), %v8049_v47 }
 0x5fa   : > { %7769 = vmatpush1.bf16.msra.mxu1 %v9081_v61  ;;  %v9193_v61 = vcombine.low %v5489_v55, %v5493_v56  ;;  %v8040_v56 = vrot.slane (!%p9221_p0), %v8007_v39, %v8039_v49 }
 0x5fb   : > { %7770 = vmatprep.subr.bf16.mxu1 %v9090_v62  ;;  %v9202_v62 = vcombine.high %v5497_v59, %v5501_v60 }
 0x5fe   : > { %7771 = vmatpush1.bf16.msra.mxu1 %v9089_v1  ;;  %v9201_v1 = vcombine.low %v5497_v59, %v5501_v60  ;;  %v8000_v59 = vld [vmem:[%s12301_s5 + $0x48] sm:$0x1] (!%p9221_p0) }
 0x5ff   : > { %7783 = vmatprep.subr.bf16.mxu1 %v9098_v2  ;;  %v9210_v2 = vcombine.high %v5505_v63, %v5509_v0 }
 0x601   : > { %7773 = vmatmul.mubr.bf16.vlgmr.msra.gmra.mrb[12].mxu1 %v11565_v29  ;;  %v9121_v29 = vcombine.low %v5417_v11, %v5421_v23  ;;  %v5123_v11 = vld [vmem:[%s12301_s5 + $0x50] sm:$0x1] }
 0x602   : > { %7784 = vmatpush1.bf16.msra.mxu1 %v9097_v5  ;;  %7815 = vmatprep.mubr.bf16.mxu1 %v11867_v28  ;;  %v9130_v28 = vcombine.high %v5425_v14, %v5429_v15  ;;  %v9209_v5 = vcombine.low %v5505_v63, %v5509_v0 }
 0x603   : > { %7785 = vmatprep.subr.bf16.mxu1 %v9106_v6  ;;  %v9218_v6 = vcombine.high %v5513_v3, %v5517_v4 }
 0x606   : > { %7786 = vmatpush1.bf16.msra.mxu1 %v9105_v9  ;;  %v5116_v9 = vld [vmem:[%s12301_s5 + $0x18] sm:$0xff] }
 0x607   : > { %7787 = vmatprep.subr.bf16.mxu1 %v9114_v10 }
 0x60a   : > { %7788 = vmatpush1.bf16.msra.mxu1 %v9113_v12 }
 0x60b   : > { %7789 = vmatprep.subr.bf16.mxu1 %v9122_v13  ;;  %v5124_v13 = vld [vmem:[%s12301_s5 + $0x58] sm:$0x1] }
 0x60e   : > { %7790 = vmatpush1.bf16.msra.mxu1 %v9121_v29 }
 0x60f   : > { %7791 = vmatprep.subr.bf16.mxu1 %v9130_v28 }
 0x612   : > { %7792 = vmatpush1.bf16.msra.mxu1 %v9129_v18 }
 0x613   : > { %7793 = vmatprep.subr.bf16.mxu1 %v9138_v19  ;;  %v5125_v19 = vld [vmem:[%s12301_s5 + $0x60] sm:$0x1] }
 0x616   : > { %7794 = vmatpush1.bf16.msra.mxu1 %v9137_v24  ;;  %v5126_v24 = vld [vmem:[%s12301_s5 + $0x68] sm:$0x1] }
 0x617   : > { %7795 = vmatprep.subr.bf16.mxu1 %v9146_v25 }
 0x61a   : > { %7796 = vmatpush1.bf16.msra.mxu1 %v9145_v31 }
 0x61b   : > { %7797 = vmatprep.subr.bf16.mxu1 %v9154_v35 }
 0x61e   : > { %7798 = vmatpush1.bf16.msra.mxu1 %v9153_v42  ;;  %v7992_v42 = vld [vmem:[%s12301_s5 + $0x8] sm:$0xff] (!%p9221_p0) }
 0x61f   : > { %7799 = vmatprep.subr.bf16.mxu1 %v9162_v45  ;;  %v8035_v45 = vsub.s32 (!%p9221_p0), 6, %v11530_v37  ;;  %v7998_v37 = vld [vmem:[%s12301_s5 + $0x38] sm:$0xff] (!%p9221_p0) }
 0x620   : > { %v8056_v60 = vadd.f32 (!%p9221_p0), %v8040_v56, %v7998_v37 }
 0x622   : > { %7800 = vmatpush1.bf16.msra.mxu1 %v9161_v51  ;;  %v8016_v51 = vrot.slane (!%p9221_p0), %v8007_v39, %v988_v46  ;;  %v8028_v46 = vrot.slane (!%p9221_p0), %v8007_v39, %v1000_v7 }
 0x623   : > { %7801 = vmatprep.subr.bf16.mxu1 %v9170_v43 }
 0x624   : > { %v8050_v52 = vadd.f32 (!%p9221_p0), %v8016_v51, %v7992_v42  ;;  %v8058_v0 = vadd.f32 (!%p9221_p0), %v8016_v51, %v8000_v59 }
 0x626   : > { %7802 = vmatpush1.bf16.msra.mxu1 %v9169_v34  ;;  %v8024_v34 = vrot.slane (!%p9221_p0), %v8007_v39, %v996_v48  ;;  %v7997_v48 = vld [vmem:[%s12301_s5 + $0x30] sm:$0xff] (!%p9221_p0)  ;;  %10412 = vtanh.f32 (!%p9221_p0), %v8050_v52 }
 0x627   : > { %7803 = vmatprep.subr.bf16.mxu1 %v9178_v38  ;;  %v8032_v38 = vrot.slane (!%p9221_p0), %v8007_v39, %v1004_v8  ;;  %v7999_v8 = vld [vmem:[%s12301_s5 + $0x40] sm:$0x1] (!%p9221_p0) }
 0x62a   : > { %7804 = vmatpush1.bf16.msra.mxu1 %v9177_v53 }
 0x62b   : > { %7805 = vmatprep.subr.bf16.mxu1 %v9186_v54  ;;  %v8036_v54 = vrot.slane (!%p9221_p0), %v8007_v39, %v8035_v45 }
 0x62e   : > { %7806 = vmatpush1.bf16.msra.mxu1 %v9185_v57 }
 0x62f   : > { %7807 = vmatprep.subr.bf16.mxu1 %v9194_v58  ;;  %v8055_v58 = vadd.f32 (!%p9221_p0), %v8036_v54, %v7997_v48 }
 0x632   : > { %7808 = vmatpush1.bf16.msra.mxu1 %v9193_v61 }
 0x633   : > { %7809 = vmatprep.subr.bf16.mxu1 %v9202_v62  ;;  %v8057_v62 = vadd.f32 (!%p9221_p0), %v8012_v50, %v7999_v8 }
 0x636   : > { %7810 = vmatpush1.bf16.msra.mxu1 %v9201_v1 }
 0x637   : > { %7811 = vmatprep.subr.bf16.mxu1 %v9210_v2 }
 0x63a   : > { %7812 = vmatpush1.bf16.msra.mxu1 %v9209_v5  ;;  %v8005_v5 = vld [vmem:[%s12301_s5 + $0x70] sm:$0x1] (!%p9221_p0) }
 0x63b   : > { %7813 = vmatprep.subr.bf16.mxu1 %v9218_v6 }
 0x63e   : > { %7814 = vmatpush1.bf16.msra.mxu1 %v9217_v22  ;;  %v8006_v22 = vld [vmem:[%s12301_s5 + $0x78] sm:$0x1] (!%p9221_p0) }
 0x641   : > { %7816 = vmatmul.mubr.bf16.vlgmr.msra.gmra.mrb[12].mxu1 %v11865_v27 }
 0x654   : > { %v7688_v10 = vpop.f32.mrb[8].mxu1 }
 0x655   : > { %v7957_v23 = vadd.f32 %v7688_v10, %v5115_v32  ;;  %v7690_v12 = vpop.f32.mrb[9].mxu1  ;;  %v8063_v10 = vadd.f32 (!%p9221_p0), %v8036_v54, %v8005_v5 }
 0x656   : > { %v7958_v27 = vadd.f32 %v7690_v12, %v5116_v9  ;;  %v7692_v14 = vpop.f32.mrb[10].mxu1  ;;  %v10411_v9 = vpop.eup (!%p9221_p0), %10410 }
 0x657   : > { %7973 = vst [vmem:[%s12301_s5 + $0x10] sm:$0xff] %v7957_v23  ;;  %v7965_v15 = vadd.f32 %v7692_v14, %v5123_v11  ;;  %v7694_v29 = vpop.f32.mrb[11].mxu1  ;;  %v10413_v11 = vpop.eup (!%p9221_p0), %10412  ;;  %8081 = vst [vmem:[%s12301_s5] sm:$0xff] (!%p9221_p0), %v10411_v9  ;;  %v8064_v23 = vadd.f32 (!%p9221_p0), %v8040_v56, %v8006_v22 }
 0x658   : > { %7974 = vst [vmem:[%s12301_s5 + $0x18] sm:$0xff] %v7958_v27  ;;  %v7966_v28 = vadd.f32 %v7694_v29, %v5124_v13  ;;  %8082 = vst [vmem:[%s12301_s5 + $0x8] sm:$0xff] (!%p9221_p0), %v10413_v11 }
 0x659   : > { %7981 = vst [vmem:[%s12301_s5 + $0x50] sm:$0x1] %v7965_v15 }
 0x65a   : > { %7982 = vst [vmem:[%s12301_s5 + $0x58] sm:$0x1] %v7966_v28 }
 0x65e   : > { %v7993_v43 = vld [vmem:[%s12301_s5 + $0x10] sm:$0xff] (!%p9221_p0) }
 0x65f   : > { %v7994_v33 = vld [vmem:[%s12301_s5 + $0x18] sm:$0xff] (!%p9221_p0)  ;;  %v8051_v41 = vadd.f32 (!%p9221_p0), %v8020_v44, %v7993_v43 }
 0x660   : > { %v8052_v55 = vadd.f32 (!%p9221_p0), %v8024_v34, %v7994_v33  ;;  %v8001_v61 = vld [vmem:[%s12301_s5 + $0x50] sm:$0x1] (!%p9221_p0) }
 0x661   : > { %10414 = vtanh.f32 (!%p9221_p0), %v8051_v41  ;;  %v8002_v63 = vld [vmem:[%s12301_s5 + $0x58] sm:$0x1] (!%p9221_p0)  ;;  %v8059_v2 = vadd.f32 (!%p9221_p0), %v8020_v44, %v8001_v61 }
 0x662   : > { %10416 = vtanh.f32 (!%p9221_p0), %v8052_v55  ;;  %v8060_v4 = vadd.f32 (!%p9221_p0), %v8024_v34, %v8002_v63 }
 0x66b   : > { %v10415_v12 = vpop.eup (!%p9221_p0), %10414 }
 0x66c   : > { %v10417_v13 = vpop.eup (!%p9221_p0), %10416  ;;  %8083 = vst [vmem:[%s12301_s5 + $0x10] sm:$0xff] (!%p9221_p0), %v10415_v12 }
 0x66d   : > { %8084 = vst [vmem:[%s12301_s5 + $0x18] sm:$0xff] (!%p9221_p0), %v10417_v13 }
 0x714   : > { %v7817_v18 = vpop.f32.mrb[12].mxu1  ;;  %7990 = sbr.rel (%p9221_p0) target bundleno = 1848 (0x738), region = 64 }
 0x715   : > { %v7959_v20 = vadd.f32 %v7817_v18, %v5117_v16  ;;  %v7819_v21 = vpop.f32.mrb[13].mxu1 }
 0x716   : > { %v7960_v25 = vadd.f32 %v7819_v21, %v5118_v17  ;;  %v7821_v26 = vpop.f32.mrb[14].mxu1 }
 0x717   : > { %7975 = vst [vmem:[%s12301_s5 + $0x20] sm:$0xff] %v7959_v20  ;;  %v7967_v30 = vadd.f32 %v7821_v26, %v5125_v19  ;;  %v7823_v31 = vpop.f32.mrb[15].mxu1 }
 0x718   : > { %7976 = vst [vmem:[%s12301_s5 + $0x28] sm:$0xff] %v7960_v25  ;;  %v7968_v35 = vadd.f32 %v7823_v31, %v5126_v24 }
 0x719   : > { %7983 = vst [vmem:[%s12301_s5 + $0x60] sm:$0x1] %v7967_v30 }
 0x71a   : > { %7984 = vst [vmem:[%s12301_s5 + $0x68] sm:$0x1] %v7968_v35 }
 0x71e   : > { %v7995_v40 = vld [vmem:[%s12301_s5 + $0x20] sm:$0xff] }
 0x71f   : > { %v7996_v53 = vld [vmem:[%s12301_s5 + $0x28] sm:$0xff]  ;;  %v8053_v57 = vadd.f32 %v8028_v46, %v7995_v40 }
 0x720   : > { %v8054_v7 = vadd.f32 %v8032_v38, %v7996_v53  ;;  %v8003_v1 = vld [vmem:[%s12301_s5 + $0x60] sm:$0x1] }
 0x721   : > { %10418 = vtanh.f32 %v8053_v57  ;;  %v8004_v3 = vld [vmem:[%s12301_s5 + $0x68] sm:$0x1]  ;;  %v8061_v6 = vadd.f32 %v8028_v46, %v8003_v1 }
 0x722   : > { %10420 = vtanh.f32 %v8054_v7  ;;  %v8062_v32 = vadd.f32 %v8032_v38, %v8004_v3 }
 0x723   : > { %10422 = vtanh.f32 %v8055_v58 }
 0x724   : > { %10424 = vtanh.f32 %v8056_v60 }
 0x725   : > { %10426 = vtanh.f32 %v8057_v62 }
 0x726   : > { %10428 = vtanh.f32 %v8058_v0 }
 0x727   : > { %10430 = vtanh.f32 %v8059_v2 }
 0x728   : > { %10432 = vtanh.f32 %v8060_v4 }
 0x729   : > { %10434 = vtanh.f32 %v8061_v6 }
 0x72a   : > { %10436 = vtanh.f32 %v8062_v32 }
 0x72b   : > { %v10419_v27 = vpop.eup %10418  ;;  %10438 = vtanh.f32 %v8063_v10 }
 0x72c   : > { %v10421_v14 = vpop.eup %10420  ;;  %8085 = vst [vmem:[%s12301_s5 + $0x20] sm:$0xff] %v10419_v27  ;;  %10440 = vtanh.f32 %v8064_v23 }
 0x72d   : > { %v10423_v15 = vpop.eup %10422  ;;  %8086 = vst [vmem:[%s12301_s5 + $0x28] sm:$0xff] %v10421_v14 }
 0x72e   : > { %v10425_v29 = vpop.eup %10424  ;;  %8087 = vst [vmem:[%s12301_s5 + $0x30] sm:$0xff] %v10423_v15 }
 0x72f   : > { %v10427_v28 = vpop.eup %10426  ;;  %8088 = vst [vmem:[%s12301_s5 + $0x38] sm:$0xff] %v10425_v29 }
 0x730   : > { %v10429_v16 = vpop.eup %10428  ;;  %8089 = vst [vmem:[%s12301_s5 + $0x40] sm:$0x1] %v10427_v28 }
 0x731   : > { %v10431_v17 = vpop.eup %10430  ;;  %8090 = vst [vmem:[%s12301_s5 + $0x48] sm:$0x1] %v10429_v16 }
 0x732   : > { %v10433_v18 = vpop.eup %10432  ;;  %8091 = vst [vmem:[%s12301_s5 + $0x50] sm:$0x1] %v10431_v17 }
 0x733   : > { %v10435_v19 = vpop.eup %10434  ;;  %8092 = vst [vmem:[%s12301_s5 + $0x58] sm:$0x1] %v10433_v18 }
 0x734   : > { %v10437_v20 = vpop.eup %10436  ;;  %8093 = vst [vmem:[%s12301_s5 + $0x60] sm:$0x1] %v10435_v19 }
 0x735   : > { %v10439_v21 = vpop.eup %10438  ;;  %8094 = vst [vmem:[%s12301_s5 + $0x68] sm:$0x1] %v10437_v20 }
 0x736   : > { %v10441_v24 = vpop.eup %10440  ;;  %8095 = vst [vmem:[%s12301_s5 + $0x70] sm:$0x1] %v10439_v21 }
 0x737   : > { %8096 = vst [vmem:[%s12301_s5 + $0x78] sm:$0x1] %v10441_v24 }
 0x738 PF: > { %p19_p4 = scmp.ge.s32.totalorder %s10665_s22, 6   ;;  %s12324_s18 = smov %s10594_s19 }
 0x739   : > { %s12325_s19 = smov %s10598_s20  ;;  %s12326_s20 = smov %s10675_s25 }
 0x73a   : > { %s12327_s21 = smov %s10665_s22  ;;  %21 = sbr.rel (!%p19_p4) target bundleno = 8 (0x8), region = 112 }
 0x741   :  { %8108 = vsyncpa [#allocation3], 1 }
 0x742   :  { %8110 = vsyncpa [#allocation3 + $0x1], 1 }
 0x743   :  { %8111 = vsyncpa [#allocation5], 1 }
 0x744   :  { %8113 = vsyncpa [#allocation5 + $0x1], 1 }
 0x745   :  { %8114 = vsyncpa [#allocation8], 1 }

</bundles_post_ra>
